<compile_context>
chip_gen: v5e
topology: v5e:2x2
jax: 0.10.0
libtpu: 0.0.40
codegen_flags: <defaults>
</compile_context>

<pallas_src>
import math
import functools

import jax
import jax.numpy as jnp
from jax import lax
from jax.experimental import pallas as pl
from jax.experimental.pallas import tpu as pltpu


def _round_up(x, m):
    return ((x + m - 1) // m) * m


def student_kernel(x_ref, w1_ref, w2s_ref, o_ref, acc_ref, *, n_rem):
    """One (batch tile, N tile) grid step.

    x_ref:   (tb, tn)  input activations
    w1_ref:  (tn, K)   pre-transposed first-layer weights
    w2s_ref: (1, K)    second-layer weights with 1/sqrt(N) folded in
    o_ref:   (1, tb)   lane-dense output row
    acc_ref: (tb, K)   f32 accumulator, resident across the N axis
    """
    n_idx = pl.program_id(1)
    n_last = pl.num_programs(1) - 1

    @pl.when(n_idx == 0)
    def _init():
        acc_ref[...] = jnp.zeros_like(acc_ref)

    x = x_ref[...]
    w1 = w1_ref[...]

    # Mask the partial last contraction tile (N % tn != 0): the OOB part of the
    # VMEM buffers is undefined, so zero it before the dot (select, not mul, so
    # NaN/Inf garbage cannot leak through 0 * NaN).
    if n_rem:
        valid = jnp.where(n_idx == n_last, n_rem, x.shape[1])
        col = lax.broadcasted_iota(jnp.int32, x.shape, 1)
        x = jnp.where(col < valid, x, jnp.zeros_like(x))
        row = lax.broadcasted_iota(jnp.int32, w1.shape, 0)
        w1 = jnp.where(row < valid, w1, jnp.zeros_like(w1))

    # MXU partial contraction, f32 accumulation.
    acc_ref[...] += jnp.dot(x, w1, preferred_element_type=jnp.float32)

    @pl.when(n_idx == n_last)
    def _finish():
        # ReLU (1/sqrt(N) already folded into w2s), then the tiny second layer
        # as a VPU broadcast-mul + cross-lane reduce; store lane-dense (1, tb).
        h = jnp.maximum(acc_ref[...], 0.0)
        out = jnp.sum(h * w2s_ref[...], axis=-1)            # (tb,)
        o_ref[...] = out.reshape(1, -1).astype(o_ref.dtype)


def student_forward(x, w1, w2, *, block_b=512, block_n=4096):
    """x: (B, N), w1: (K, N) [fc1.weight], w2: (1, K) [fc2.weight] -> (B, 1) f32.

    x / w1 may be f32 or bf16 (bf16 HBM storage halves streamed bytes); the
    contraction always accumulates in f32 and the output is explicitly f32.
    """
    B, N = x.shape
    K, N2 = w1.shape
    assert N2 == N and w2.shape == (1, K)

    # One-time wrapper-side prep (tiny vs. streaming x):
    #  - transpose W1 to (N, K) so the kernel contracts (tb,tn)@(tn,K) with no
    #    per-grid-step transpose of the RHS,
    #  - fold 1/sqrt(N) into the (1, K) second-layer weights (ReLU is
    #    positively homogeneous).
    w1t = w1.T
    w2s = w2.astype(jnp.float32) * (1.0 / math.sqrt(N))

    # Tile sizes: multiples of 128 (lane-dense output row, (8,128) constraint).
    # Edge blocks may be partial; no padding copies of x are ever made.
    tb = min(_round_up(block_b, 128), _round_up(B, 128))
    tn = min(_round_up(block_n, 128), _round_up(N, 128))
    nb = pl.cdiv(B, tb)
    nn = pl.cdiv(N, tn)
    n_rem = N % tn

    kernel = functools.partial(student_kernel, n_rem=n_rem)

    x_item = jnp.dtype(x.dtype).itemsize
    w_item = jnp.dtype(w1t.dtype).itemsize

    # VMEM budget (double-buffered inputs/outputs + accumulator), with the
    # K=12 lane axis padded to 128.
    vmem_est = (2 * tb * tn * x_item        # x tiles
                + 2 * tn * 128 * w_item     # W1 tiles (lane-padded)
                + 2 * 8 * 128 * 4           # w2s
                + 2 * 8 * tb * 4            # output row
                + tb * 128 * 4)             # accumulator scratch
    vmem_limit = int(min(max(vmem_est * 1.25, 4 << 20), 48 << 20))

    out_row = pl.pallas_call(
        kernel,
        out_shape=jax.ShapeDtypeStruct((1, B), jnp.float32),
        grid=(nb, nn),
        in_specs=[
            pl.BlockSpec((tb, tn), lambda i, n: (i, n)),   # x: stream (batch, N) tiles
            pl.BlockSpec((tn, K), lambda i, n: (n, 0)),    # W1^T: stream N tiles
            pl.BlockSpec((1, K), lambda i, n: (0, 0)),     # w2/sqrt(N): resident
        ],
        out_specs=pl.BlockSpec((1, tb), lambda i, n: (0, i)),
        scratch_shapes=[pltpu.VMEM((tb, K), jnp.float32)],
        compiler_params=pltpu.CompilerParams(
            # Batch tiles are independent -> shard across v7x's two TensorCores;
            # N is the reduction axis (accumulator-resident), kept last.
            dimension_semantics=("parallel", "arbitrary"),
            vmem_limit_bytes=vmem_limit,
        ),
        cost_estimate=pl.CostEstimate(
            flops=2 * B * N * K + 2 * B * K,
            transcendentals=0,
            bytes_accessed=B * N * x_item + N * K * w_item + K * 4 + B * 4,
        ),
    )(x, w1t, w2s)

    # (1, B) -> (B, 1): metadata-only reshape.
    return out_row.reshape(B, 1)


if __name__ == "__main__":
    # Small shapes consistent with the module (module defaults K=12; N shrunk
    # from 50000 for a fast self-test — the kernel N-tiles, so the real N also
    # works with the same code path).
    K_ = 12
    N_ = 512
    B_ = 1024

    key = jax.random.PRNGKey(0)
    kx, k1, k2 = jax.random.split(key, 3)

    x = jax.random.normal(kx, (B_, N_), dtype=jnp.float32)
    w1 = jax.random.normal(k1, (K_, N_), dtype=jnp.float32)   # fc1.weight (nn.init.normal_)
    w2 = jax.random.normal(k2, (1, K_), dtype=jnp.float32)    # fc2.weight (nn.init.normal_)

    out = jax.block_until_ready(student_forward(x, w1, w2))
    ref = jnp.maximum(x @ w1.T / math.sqrt(N_), 0.0) @ w2.T
    assert out.shape == (B_, 1)
    assert jnp.allclose(out, ref, atol=1e-3, rtol=1e-3), float(jnp.max(jnp.abs(out - ref)))

    # Ragged shapes: exercises the partial batch tile (OOB output columns are
    # dropped by Pallas) and the masked partial contraction tile (N % tn != 0)
    # with NO padding copy of x.
    B2, N2_ = 300, 384
    x2 = jax.random.normal(kx, (B2, N2_), dtype=jnp.float32)
    w1b = jax.random.normal(k1, (K_, N2_), dtype=jnp.float32)
    out2 = jax.block_until_ready(
        student_forward(x2, w1b, w2, block_b=128, block_n=256))
    ref2 = jnp.maximum(x2 @ w1b.T / math.sqrt(N2_), 0.0) @ w2.T
    assert out2.shape == (B2, 1)
    assert jnp.allclose(out2, ref2, atol=1e-3, rtol=1e-3), float(jnp.max(jnp.abs(out2 - ref2)))

    print("KERNEL_OK")
</pallas_src>

<mosaic_0001>
module attributes {stable_mosaic.version = 11 : i64} {
  func.func @student_kernel(%arg0: i32, %arg1: i32, %arg2: memref<512x512xf32, #tpu.memory_space<vmem>>, %arg3: memref<512x12xf32, #tpu.memory_space<vmem>>, %arg4: memref<1x12xf32, #tpu.memory_space<vmem>>, %arg5: memref<1x512xf32, #tpu.memory_space<vmem>>, %arg6: memref<512x12xf32, #tpu.memory_space<vmem>>) attributes {dimension_semantics = [#tpu.dimension_semantics<parallel>, #tpu.dimension_semantics<arbitrary>], iteration_bounds = array<i64: 2, 1>, scalar_prefetch = 0 : i64, scratch_operands = 1 : i64, tpu.core_type = #tpu.core_type<tc>, window_params = [{transform_indices = @transform_0, window_bounds = array<i64: 512, 512>}, {transform_indices = @transform_1, window_bounds = array<i64: 512, 12>}, {pipeline_mode = #tpu.pipeline_mode<synchronous>, transform_indices = @transform_2, window_bounds = array<i64: 1, 12>}, {transform_indices = @transform_3, window_bounds = array<i64: 1, 512>}]} {
    %c0_i32 = arith.constant 0 : i32
    %0 = arith.cmpi eq, %arg1, %c0_i32 : i32
    %1 = arith.extui %0 : i1 to i32
    %c0_i32_0 = arith.constant 0 : i32
    %2 = arith.cmpi ne, %1, %c0_i32_0 : i32
    scf.if %2 {
      %cst_10 = arith.constant 0.000000e+00 : f32
      %12 = vector.broadcast %cst_10 : f32 to vector<512x12xf32>
      %c0_11 = arith.constant 0 : index
      %c0_12 = arith.constant 0 : index
      %13 = vector.load %arg6[%c0_11, %c0_12] : memref<512x12xf32, #tpu.memory_space<vmem>>, vector<512x12xf32>
      tpu.vector_store %arg6[%c0_11, %c0_12], %12 {strides = array<i32>} : memref<512x12xf32, #tpu.memory_space<vmem>>, vector<512x12xf32>,
    } else {
    }
    %c0 = arith.constant 0 : index
    %c0_1 = arith.constant 0 : index
    %3 = vector.load %arg2[%c0, %c0_1] : memref<512x512xf32, #tpu.memory_space<vmem>>, vector<512x512xf32>
    %c0_2 = arith.constant 0 : index
    %c0_3 = arith.constant 0 : index
    %4 = vector.load %arg3[%c0_2, %c0_3] : memref<512x12xf32, #tpu.memory_space<vmem>>, vector<512x12xf32>
    %c0_4 = arith.constant 0 : index
    %c0_5 = arith.constant 0 : index
    %5 = vector.load %arg6[%c0_4, %c0_5] : memref<512x12xf32, #tpu.memory_space<vmem>>, vector<512x12xf32>
    %cst = arith.constant dense<0.000000e+00> : vector<512x12xf32>
    %6 = tpu.matmul %3, %4, %cst {dimension_numbers = #tpu.dot_dimension_numbers<[1], [0], [0], [1], [0, 0, 1, 1], [], []>} : vector<512x512xf32>, vector<512x12xf32>, vector<512x12xf32> -> vector<512x12xf32>
    %7 = arith.addf %5, %6 : vector<512x12xf32>
    %c0_6 = arith.constant 0 : index
    %c0_7 = arith.constant 0 : index
    %8 = vector.load %arg6[%c0_6, %c0_7] : memref<512x12xf32, #tpu.memory_space<vmem>>, vector<512x12xf32>
    tpu.vector_store %arg6[%c0_6, %c0_7], %7 {strides = array<i32>} : memref<512x12xf32, #tpu.memory_space<vmem>>, vector<512x12xf32>,
    %c0_i32_8 = arith.constant 0 : i32
    %9 = arith.cmpi eq, %arg1, %c0_i32_8 : i32
    %10 = arith.extui %9 : i1 to i32
    %c0_i32_9 = arith.constant 0 : i32
    %11 = arith.cmpi ne, %10, %c0_i32_9 : i32
    scf.if %11 {
      %c0_10 = arith.constant 0 : index
      %c0_11 = arith.constant 0 : index
      %12 = vector.load %arg6[%c0_10, %c0_11] : memref<512x12xf32, #tpu.memory_space<vmem>>, vector<512x12xf32>
      %cst_12 = arith.constant 0.000000e+00 : f32
      %13 = vector.broadcast %cst_12 : f32 to vector<512x12xf32>
      %14 = arith.maximumf %12, %13 : vector<512x12xf32>
      %c0_13 = arith.constant 0 : index
      %c0_14 = arith.constant 0 : index
      %15 = vector.load %arg4[%c0_13, %c0_14] : memref<1x12xf32, #tpu.memory_space<vmem>>, vector<1x12xf32>
      %16 = vector.broadcast %15 : vector<1x12xf32> to vector<512x12xf32>
      %17 = arith.mulf %14, %16 : vector<512x12xf32>
      %cst_15 = arith.constant dense<0.000000e+00> : vector<512xf32>
      %18 = vector.multi_reduction <add>, %17, %cst_15 [1] : vector<512x12xf32> to vector<512xf32>
      %19 = vector.shape_cast %18 : vector<512xf32> to vector<1x512xf32>
      %c0_16 = arith.constant 0 : index
      %c0_17 = arith.constant 0 : index
      %20 = vector.load %arg5[%c0_16, %c0_17] : memref<1x512xf32, #tpu.memory_space<vmem>>, vector<1x512xf32>
      tpu.vector_store %arg5[%c0_16, %c0_17], %19 {strides = array<i32>} : memref<1x512xf32, #tpu.memory_space<vmem>>, vector<1x512xf32>,
    } else {
    }
    return
  }
  func.func @transform_0(%arg0: i32, %arg1: i32) -> (i32, i32) {
    %c0_i32 = arith.constant 0 : i32
    return %arg0, %arg1 : i32, i32
  }
  func.func @transform_1(%arg0: i32, %arg1: i32) -> (i32, i32) {
    %c0_i32 = arith.constant 0 : i32
    %c0_i32_0 = arith.constant 0 : i32
    return %arg1, %c0_i32 : i32, i32
  }
  func.func @transform_2(%arg0: i32, %arg1: i32) -> (i32, i32) {
    %c0_i32 = arith.constant 0 : i32
    %c0_i32_0 = arith.constant 0 : i32
    %c0_i32_1 = arith.constant 0 : i32
    return %c0_i32, %c0_i32_0 : i32, i32
  }
  func.func @transform_3(%arg0: i32, %arg1: i32) -> (i32, i32) {
    %c0_i32 = arith.constant 0 : i32
    %c0_i32_0 = arith.constant 0 : i32
    return %c0_i32, %arg0 : i32, i32
  }
}

</mosaic_0001>

<bundles_post_ra>
// kernel: tpu_custom_call.1
= control target key start
LH: loop header
LB: loop body
LE: loop exit
PB: predicated region body
PF: predicated region fallthrough
CT: control target
= control target key end

     0   :  { %s5427_s0 = inlined_call_operand.hbm [shape: f32[1024,512], index: 0, kind: input, shape index: {}]   ;;  %s5428_s1 = inlined_call_operand.vmem [shape: f32[512,12], index: 1, kind: input, shape index: {}]   ;;  %s5429_s2 = inlined_call_operand.hbm [shape: f32[1,12], index: 2, kind: input, shape index: {}]   ;;  %s5430_s3 = inlined_call_operand.hbm [shape: f32[1,1024], index: 3, kind: output, shape index: {}]  }
   0x1   :  { %5432 = sst [smem:[#allocation12_spill]] %s5429_s2 }
   0x2   :  { %8 = vsyncpa [#allocation4], 0 }
   0x3   :  { %10 = vsyncpa [#allocation4 + $0x1], 0 }
   0x4   :  { %11 = vsyncpa [#allocation7], 0 }
   0x5   :  { %12 = vsyncpa [#allocation5], 0 }
   0x6   :  { %14 = vsyncpa [#allocation5 + $0x1], 0  ;;  %s3979_s12 = smov 0   ;;  %s3981_s13 = smov 0  }
   0x7   :  { %s3983_s14 = smov 0   ;;  %s3985_s15 = smov 0  }
   0x8   :  { %s3987_s16 = smov 0   ;;  %s3989_s17 = smov 0  }
   0x9 LB: > { %s3701_s18 = sadd.s32 4294967295, %s3952_s17   ;;  %s3702_s19 = sadd.s32 4294967294, %s3952_s17   ;;  %s3952_s17 = sphi %s3989_s17, %s20_s17   ;;  %s3948_s16 = sphi %s3987_s16, %s5447_s16   ;;  %s3944_s15 = sphi %s3985_s15, %s5446_s15   ;;  %s3940_s14 = sphi %s3983_s14, %s5445_s14   ;;  %s3936_s13 = sphi %s3981_s13, %s5444_s13   ;;  %s3932_s12 = sphi %s3979_s12, %s5443_s12  }
   0xa   : > { %s41_s20 = sadd.s32 1, %s3940_s14  ;;  %p48_p0 = scmp.ne.s32.totalorder %s3940_s14, %s3936_s13 }
   0xb   : > { %p49_p1 = scmp.eq.s32.totalorder %s3952_s17, 0  ;;  %p54_p2 = scmp.ne.s32.totalorder %s3936_s13, %s3932_s12 }
   0xc   : > { %p4017_p3 = scmp.eq.s32.totalorder %s3701_s18, 0  ;;  %p125_p4 = scmp.eq.s32.totalorder %s3701_s18, 1 }
   0xd   : > { %p4021_p5 = por %p49_p1, %p48_p0  ;;  %p131_p6 = scmp.eq.s32.totalorder %s3702_s19, 1 }
   0xe   : > { %p4027_p7 = por %p4017_p3, %p54_p2  ;;  %p4031_p8 = por %p125_p4, %p48_p0 }
   0xf   : > { %p4035_p9 = por %p131_p6, %p54_p2  ;;  %p3703_p10 = scmp.ge.s32.totalorder %s3952_s17, 1 }
  0x10   : > { %p138_p11 = scmp.lt.s32.totalorder %s3952_s17, 3  ;;  %s5438_s2 = sld [smem:[#allocation12_spill]] }
  0x11   : > { %s3954_s30 = smov [#allocation6]   ;;  %p3706_p13 = scmp.ge.s32.totalorder %s3952_s17, 2 }
  0x12   : > { %p4044_p12 = pnand %p3703_p10, %p138_p11  ;;  %s161_s4 = sshll.u32 %s3954_s30, 4  ;;  %s162_s4 = int_to_ptr.vmem [resolvable:$true] %s161_s4 }
  0x13   : > { %p3742_p1 = scmp.lt.s32.totalorder %s3952_s17, 2  ;;  %s32_s6 = sadd.s32 1, %s3948_s16 }
  0x14   : > { %p3729_p0 = pneg %p4044_p12  ;;  %p34_p6 = scmp.ge.s32.totalorder %s32_s6, 2 }
  0x15   : > { %p4056_p4 = pnand %p3742_p1, %p4021_p5  ;;  %s172_s7 = sand.u32 1, %s3940_s14  }
  0x16   : > { %s159_s28 = sshll.u32 %s5438_s2, 4  ;;  %p3730_p2 = pnand %p3729_p0, %p4017_p3  ;;  %s160_s28 = int_to_ptr.hbm [resolvable:$true] %s159_s28 }
  0x17   : > { %s5449_s6 = smov (%p34_p6, %s32_s6), 0  ;;  %s3707_s8 = sshll.u32 %s172_s7, 11 }
  0x18   : > { %3732 = dma.hbm_to_vmem [thread:$0]  (!%p3730_p2), %s160_s28, 16, %s162_s4, [#allocation7]  }
  0x19   : > { %s36_s9 = ssub.s32 %s3948_s16, %s5449_s6  ;;  %s3720_s10 = sshll.u32 %s3948_s16, 11 }
  0x1a   : > { %p39_p10 = scmp.eq.s32.totalorder %s36_s9, 0  ;;  %s184_s19 = scalar_lea.hbm %s5427_s0, %s3720_s10 }
  0x1b   : > { %s176_s22 = scalar_lea.vmem [#allocation3], %s3707_s8  ;;  %s185_s30 = sshll.u32 %s184_s19, 4  ;;  %s186_s30 = int_to_ptr.hbm [resolvable:$true] %s185_s30 }
  0x1c   : > { %s187_s26 = sshll.u32 %s176_s22, 4  ;;  %s173_s28 = scalar_lea.sflag [#allocation4], %s172_s7  ;;  %s188_s26 = int_to_ptr.vmem [resolvable:$true] %s187_s26 }
  0x1d   : > { %s4073_s27 = scalar_select %p39_p10, %s3940_s14, %s41_s20  }
  0x1e   : > { %s3955_s4 = smov 512   ;;  %s3956_s2 = smov 32  }
  0x1f   : > { %3736 = dma.hbm_to_vmem [thread:$0]  (!%p4056_p4), %s186_s30, 32768, %s188_s26, %s173_s28, %s3955_s4, %s3955_s4, %s3956_s2  }
  0x20   : > { %199 = sbr.rel (%p4044_p12) target bundleno = 1701 (0x6a5), region = 32  ;;  %s4080_s9 = sand.u32 (!%p4044_p12), 1, %s3936_s13  }
  0x21   : > { %s3712_s8 = sshll.u32 (!%p4044_p12), %s4080_s9, 11  ;;  %s202_s20 = scalar_lea.sflag (!%p4044_p12), [#allocation4], %s4080_s9 }
  0x22   : > { %s4084_s10 = scalar_lea.vmem (!%p4044_p12), [#allocation3], %s3712_s8 }
  0x25   : > { %3919 = dma.done.wait (%p4027_p7), %s202_s20, 32768  }
  0x26   : > { %3921 = vsyncadd (%p4027_p7), %s202_s20, 4294934528 }
  0x27   : > { %3923 = dma.done.wait (%p4017_p3), [#allocation7], 16  }
  0x28   : > { %3925 = vsyncadd (%p4017_p3), [#allocation7], 4294967280  ;;  %v620_v0 = vld [vmem:[%s5428_s1 + $0x178] sm:$0xff]  ;;  %v619_v1 = vld [vmem:[%s5428_s1 + $0x170] sm:$0xff]  ;;  %vm252_vm0 = vcmask 97280   ;;  %vm3413_vm1 = vcmask 130112  }
  0x29   : > { %v636_v2 = vld [vmem:[%s5428_s1 + $0x1f8] sm:$0xff]  ;;  %1119 = vmatpush.msra.mxu2 %v620_v0  ;;  %v618_v5 = vld [vmem:[%s5428_s1 + $0x168] sm:$0xff]  ;;  %v635_v6 = vld [vmem:[%s5428_s1 + $0x1f0] sm:$0xff]  ;;  %vm3417_vm2 = vcmask 195712   ;;  %vm3421_vm3 = vcmask 261312   ;;  %vm3425_vm4 = vcmask 326912  }
  0x2a   : > { %1328 = vmatpush.msra.mxu3 %v636_v2  ;;  %v588_v3 = vld [vmem:[%s5428_s1 + $0x78] sm:$0xff]  ;;  %v587_v7 = vld [vmem:[%s5428_s1 + $0x70] sm:$0xff]  ;;  %v634_v9 = vld [vmem:[%s5428_s1 + $0x1e8] sm:$0xff]  ;;  %vm3429_vm5 = vcmask 392512   ;;  %vm3433_vm6 = vcmask 458112   ;;  %vm3437_vm7 = vcmask 523712  }
  0x2b   : > { %v604_v4 = vld [vmem:[%s5428_s1 + $0xf8] sm:$0xff]  ;;  %701 = vmatpush.msra.mxu0 %v588_v3  ;;  %v603_v8 = vld [vmem:[%s5428_s1 + $0xf0] sm:$0xff]  ;;  %1120 = vmatpush.msra.mxu2 %v619_v1  ;;  %v586_v10 = vld [vmem:[%s5428_s1 + $0x68] sm:$0xff]  ;;  %vm3441_vm8 = vcmask 589312   ;;  %vm3445_vm9 = vcmask 654912   ;;  %vm3449_vm10 = vcmask 720512  }
  0x2c   : > { %910 = vmatpush.msra.mxu1 %v604_v4  ;;  %1329 = vmatpush.msra.mxu3 %v635_v6  ;;  %v617_v11 = vld [vmem:[%s5428_s1 + $0x160] sm:$0xff]  ;;  %v602_v12 = vld [vmem:[%s5428_s1 + $0xe8] sm:$0xff]  ;;  %v616_v16 = vld [vmem:[%s5428_s1 + $0x158] sm:$0xff]  ;;  %vm3453_vm11 = vcmask 786112   ;;  %vm3457_vm12 = vcmask 851712   ;;  %vm3461_vm13 = vcmask 917312  }
  0x2d   : > { %702 = vmatpush.msra.mxu0 %v587_v7  ;;  %v633_v13 = vld [vmem:[%s5428_s1 + $0x1e0] sm:$0xff]  ;;  %1121 = vmatpush.msra.mxu2 %v618_v5  ;;  %v632_v17 = vld [vmem:[%s5428_s1 + $0x1d8] sm:$0xff]  ;;  %v615_v20 = vld [vmem:[%s5428_s1 + $0x150] sm:$0xff]  ;;  %vm5431_vm14 = vcmask 982912   ;;  %vm3469_vm15 = vcmask 1048512   ;;  %s3716_s2 = sshll.u32 %s3944_s15, 2 }
  0x2e   : > { %911 = vmatpush.msra.mxu1 %v603_v8  ;;  %1330 = vmatpush.msra.mxu3 %v634_v9  ;;  %v585_v14 = vld [vmem:[%s5428_s1 + $0x60] sm:$0xff]  ;;  %v584_v18 = vld [vmem:[%s5428_s1 + $0x58] sm:$0xff]  ;;  %v631_v21 = vld [vmem:[%s5428_s1 + $0x1d0] sm:$0xff]  ;;  %s3590_s7 = scalar_lea.hbm %s5430_s3, %s3716_s2  ;;  %s3580_s23 = scalar_lea.sflag [#allocation5], %s4080_s9 }
  0x2f   : > { %v601_v15 = vld [vmem:[%s5428_s1 + $0xe0] sm:$0xff]  ;;  %703 = vmatpush.msra.mxu0 %v586_v10  ;;  %1122 = vmatpush.msra.mxu2 %v617_v11  ;;  %v600_v19 = vld [vmem:[%s5428_s1 + $0xd8] sm:$0xff]  ;;  %v583_v22 = vld [vmem:[%s5428_s1 + $0x50] sm:$0xff]  ;;  %s3594_s18 = sshll.u32 %s3590_s7, 4  ;;  %s3886_s30 = scalar_lea.hbm %s5430_s3, 8  ;;  %s3595_s18 = int_to_ptr.hbm [resolvable:$true] %s3594_s18 }
  0x30   : > { %912 = vmatpush.msra.mxu1 %v602_v12  ;;  %1331 = vmatpush.msra.mxu3 %v633_v13  ;;  %v599_v23 = vld [vmem:[%s5428_s1 + $0xd0] sm:$0xff]  ;;  %v614_v24 = vld [vmem:[%s5428_s1 + $0x148] sm:$0xff]  ;;  %v613_v28 = vld [vmem:[%s5428_s1 + $0x140] sm:$0xff]  ;;  %s3880_s19 = sshra.s32 %s3595_s18, 4  ;;  %s3881_s19 = int_to_ptr.hbm [resolvable:$true] %s3880_s19 }
  0x31   : > { %704 = vmatpush.msra.mxu0 %v585_v14  ;;  %1123 = vmatpush.msra.mxu2 %v616_v16  ;;  %v630_v25 = vld [vmem:[%s5428_s1 + $0x1c8] sm:$0xff]  ;;  %v629_v29 = vld [vmem:[%s5428_s1 + $0x1c0] sm:$0xff]  ;;  %v612_v32 = vld [vmem:[%s5428_s1 + $0x138] sm:$0xff]  ;;  %s3882_s21 = scalar_lea.hbm %s3881_s19, 4  ;;  %p3887_p11 = scmp.lt.s32.totalorder %s3881_s19, %s5430_s3 }
  0x32   : > { %913 = vmatpush.msra.mxu1 %v601_v15  ;;  %1332 = vmatpush.msra.mxu3 %v632_v17  ;;  %v582_v26 = vld [vmem:[%s5428_s1 + $0x48] sm:$0xff]  ;;  %v581_v30 = vld [vmem:[%s5428_s1 + $0x40] sm:$0xff]  ;;  %v628_v33 = vld [vmem:[%s5428_s1 + $0x1b8] sm:$0xff]  ;;  %p3883_p3 = scmp.ne.s32.totalorder %s3881_s19, %s3882_s21  ;;  %p3888_p12 = scmp.lt.s32.totalorder %s3886_s30, %s3882_s21 }
  0x33   : > { %705 = vmatpush.msra.mxu0 %v584_v18  ;;  %1124 = vmatpush.msra.mxu2 %v615_v20  ;;  %v598_v27 = vld [vmem:[%s5428_s1 + $0xc8] sm:$0xff]  ;;  %v597_v31 = vld [vmem:[%s5428_s1 + $0xc0] sm:$0xff]  ;;  %v580_v34 = vld [vmem:[%s5428_s1 + $0x38] sm:$0xff] }
  0x34   : > { %914 = vmatpush.msra.mxu1 %v600_v19  ;;  %1333 = vmatpush.msra.mxu3 %v631_v21  ;;  %v596_v35 = vld [vmem:[%s5428_s1 + $0xb8] sm:$0xff]  ;;  %v611_v36 = vld [vmem:[%s5428_s1 + $0x130] sm:$0xff]  ;;  %v610_v40 = vld [vmem:[%s5428_s1 + $0x128] sm:$0xff]  ;;  %p3884_p5 = pnand %p3883_p3, %p4031_p8  ;;  %p3889_p0 = por %p3888_p12, %p3887_p11 }
  0x35   : > { %706 = vmatpush.msra.mxu0 %v583_v22  ;;  %1125 = vmatpush.msra.mxu2 %v614_v24  ;;  %v627_v37 = vld [vmem:[%s5428_s1 + $0x1b0] sm:$0xff]  ;;  %v626_v41 = vld [vmem:[%s5428_s1 + $0x1a8] sm:$0xff]  ;;  %v609_v44 = vld [vmem:[%s5428_s1 + $0x120] sm:$0xff] }
  0x36   : > { %915 = vmatpush.msra.mxu1 %v599_v23  ;;  %1334 = vmatpush.msra.mxu3 %v630_v25  ;;  %v579_v38 = vld [vmem:[%s5428_s1 + $0x30] sm:$0xff]  ;;  %v578_v42 = vld [vmem:[%s5428_s1 + $0x28] sm:$0xff]  ;;  %v625_v45 = vld [vmem:[%s5428_s1 + $0x1a0] sm:$0xff]  ;;  %p3885_p7 = pneg %p3884_p5 }
  0x37   : > { %707 = vmatpush.msra.mxu0 %v582_v26  ;;  %1126 = vmatpush.msra.mxu2 %v613_v28  ;;  %v595_v39 = vld [vmem:[%s5428_s1 + $0xb0] sm:$0xff]  ;;  %v594_v43 = vld [vmem:[%s5428_s1 + $0xa8] sm:$0xff]  ;;  %v577_v46 = vld [vmem:[%s5428_s1 + $0x20] sm:$0xff] }
  0x38   : > { %916 = vmatpush.msra.mxu1 %v598_v27  ;;  %1335 = vmatpush.msra.mxu3 %v629_v29  ;;  %v593_v47 = vld [vmem:[%s5428_s1 + $0xa0] sm:$0xff]  ;;  %v608_v48 = vld [vmem:[%s5428_s1 + $0x118] sm:$0xff]  ;;  %v607_v52 = vld [vmem:[%s5428_s1 + $0x110] sm:$0xff]  ;;  %p3890_p1 = pnand %p3889_p0, %p3885_p7 }
  0x39   : > { %708 = vmatpush.msra.mxu0 %v581_v30  ;;  %1127 = vmatpush.msra.mxu2 %v612_v32  ;;  %v624_v49 = vld [vmem:[%s5428_s1 + $0x198] sm:$0xff]  ;;  %v623_v53 = vld [vmem:[%s5428_s1 + $0x190] sm:$0xff]  ;;  %v606_v56 = vld [vmem:[%s5428_s1 + $0x108] sm:$0xff] }
  0x3a   : > { %917 = vmatpush.msra.mxu1 %v597_v31  ;;  %1336 = vmatpush.msra.mxu3 %v628_v33  ;;  %v576_v50 = vld [vmem:[%s5428_s1 + $0x18] sm:$0xff]  ;;  %v575_v54 = vld [vmem:[%s5428_s1 + $0x10] sm:$0xff]  ;;  %v622_v57 = vld [vmem:[%s5428_s1 + $0x188] sm:$0xff] }
  0x3b   : > { %709 = vmatpush.msra.mxu0 %v580_v34  ;;  %1128 = vmatpush.msra.mxu2 %v611_v36  ;;  %v592_v51 = vld [vmem:[%s5428_s1 + $0x98] sm:$0xff]  ;;  %v591_v55 = vld [vmem:[%s5428_s1 + $0x90] sm:$0xff]  ;;  %v574_v58 = vld [vmem:[%s5428_s1 + $0x8] sm:$0xff] }
  0x3c   : > { %918 = vmatpush.msra.mxu1 %v596_v35  ;;  %1337 = vmatpush.msra.mxu3 %v627_v37  ;;  %v590_v59 = vld [vmem:[%s5428_s1 + $0x88] sm:$0xff]  ;;  %v605_v60 = vld [vmem:[%s5428_s1 + $0x100] sm:$0xff]  ;;  %v319_v62 = vld [vmem:[%s4084_s10 + $0x10] sm:$0xff] }
  0x3d   : > { %710 = vmatpush.msra.mxu0 %v579_v38  ;;  %1129 = vmatpush.msra.mxu2 %v610_v40  ;;  %v621_v61 = vld [vmem:[%s5428_s1 + $0x180] sm:$0xff]  ;;  %v317_v2 = vld [vmem:[%s4084_s10] sm:$0xff]  ;;  %v318_v3 = vld [vmem:[%s4084_s10 + $0x8] sm:$0xff] }
  0x3e   : > { %919 = vmatpush.msra.mxu1 %v595_v39  ;;  %1338 = vmatpush.msra.mxu3 %v626_v41  ;;  %v320_v63 = vld [vmem:[%s4084_s10 + $0x18] sm:$0xff]  ;;  %v323_v4 = vld [vmem:[%s4084_s10 + $0x30] sm:$0xff]  ;;  %v321_v6 = vld [vmem:[%s4084_s10 + $0x20] sm:$0xff] }
  0x3f   : > { %711 = vmatpush.msra.mxu0 %v578_v42  ;;  %1130 = vmatpush.msra.mxu2 %v609_v44  ;;  %v573_v0 = vld [vmem:[%s5428_s1] sm:$0xff]  ;;  %v322_v7 = vld [vmem:[%s4084_s10 + $0x28] sm:$0xff]  ;;  %v327_v8 = vld [vmem:[%s4084_s10 + $0x50] sm:$0xff] }
  0x40   : > { %920 = vmatpush.msra.mxu1 %v594_v43  ;;  %1339 = vmatpush.msra.mxu3 %v625_v45  ;;  %v589_v1 = vld [vmem:[%s5428_s1 + $0x80] sm:$0xff]  ;;  %v325_v10 = vld [vmem:[%s4084_s10 + $0x40] sm:$0xff]  ;;  %v326_v11 = vld [vmem:[%s4084_s10 + $0x48] sm:$0xff] }
  0x41   : > { %712 = vmatpush.msra.mxu0 %v577_v46  ;;  %1131 = vmatpush.msra.mxu2 %v608_v48  ;;  %v324_v5 = vld [vmem:[%s4084_s10 + $0x38] sm:$0xff]  ;;  %v331_v12 = vld [vmem:[%s4084_s10 + $0x70] sm:$0xff]  ;;  %v329_v14 = vld [vmem:[%s4084_s10 + $0x60] sm:$0xff] }
  0x42   : > { %921 = vmatpush.msra.mxu1 %v593_v47  ;;  %1340 = vmatpush.msra.mxu3 %v624_v49  ;;  %v328_v9 = vld [vmem:[%s4084_s10 + $0x58] sm:$0xff]  ;;  %v330_v15 = vld [vmem:[%s4084_s10 + $0x68] sm:$0xff]  ;;  %v335_v16 = vld [vmem:[%s4084_s10 + $0x90] sm:$0xff] }
  0x43   : > { %713 = vmatpush.msra.mxu0 %v576_v50  ;;  %1132 = vmatpush.msra.mxu2 %v607_v52  ;;  %v332_v13 = vld [vmem:[%s4084_s10 + $0x78] sm:$0xff]  ;;  %v333_v18 = vld [vmem:[%s4084_s10 + $0x80] sm:$0xff]  ;;  %v334_v19 = vld [vmem:[%s4084_s10 + $0x88] sm:$0xff]  ;;  %v3957_v52 = vmov 0.0  }
  0x44   : > { %922 = vmatpush.msra.mxu1 %v592_v51  ;;  %1341 = vmatpush.msra.mxu3 %v623_v53  ;;  %v336_v17 = vld [vmem:[%s4084_s10 + $0x98] sm:$0xff]  ;;  %v339_v20 = vld [vmem:[%s4084_s10 + $0xb0] sm:$0xff]  ;;  %v337_v22 = vld [vmem:[%s4084_s10 + $0xa0] sm:$0xff]  ;;  %253 = vst.msk [vmem:[#allocation2] sm:$0xff] %vm252_vm0, %v3957_v52 }
  0x45   : > { %714 = vmatpush.msra.mxu0 %v575_v54  ;;  %1133 = vmatpush.msra.mxu2 %v606_v56  ;;  %v340_v21 = vld [vmem:[%s4084_s10 + $0xb8] sm:$0xff]  ;;  %v338_v23 = vld [vmem:[%s4084_s10 + $0xa8] sm:$0xff]  ;;  %v343_v24 = vld [vmem:[%s4084_s10 + $0xd0] sm:$0xff]  ;;  %254 = vst.msk [vmem:[#allocation2 + $0x8] sm:$0xff] %vm252_vm0, %v3957_v52 }
  0x46   : > { %923 = vmatpush.msra.mxu1 %v591_v55  ;;  %1342 = vmatpush.msra.mxu3 %v622_v57  ;;  %v344_v25 = vld [vmem:[%s4084_s10 + $0xd8] sm:$0xff]  ;;  %v341_v26 = vld [vmem:[%s4084_s10 + $0xc0] sm:$0xff]  ;;  %v342_v27 = vld [vmem:[%s4084_s10 + $0xc8] sm:$0xff]  ;;  %255 = vst.msk [vmem:[#allocation2 + $0x10] sm:$0xff] %vm252_vm0, %v3957_v52 }
  0x47   : > { %715 = vmatpush.msra.mxu0 %v574_v58  ;;  %1134 = vmatpush.msra.mxu2 %v605_v60  ;;  %v347_v28 = vld [vmem:[%s4084_s10 + $0xf0] sm:$0xff]  ;;  %v348_v29 = vld [vmem:[%s4084_s10 + $0xf8] sm:$0xff]  ;;  %v345_v30 = vld [vmem:[%s4084_s10 + $0xe0] sm:$0xff]  ;;  %256 = vst.msk [vmem:[#allocation2 + $0x18] sm:$0xff] %vm252_vm0, %v3957_v52 }
  0x48   : > { %924 = vmatpush.msra.mxu1 %v590_v59  ;;  %1343 = vmatpush.msra.mxu3 %v621_v61  ;;  %v346_v31 = vld [vmem:[%s4084_s10 + $0xe8] sm:$0xff]  ;;  %v351_v32 = vld [vmem:[%s4084_s10 + $0x110] sm:$0xff]  ;;  %v352_v33 = vld [vmem:[%s4084_s10 + $0x118] sm:$0xff]  ;;  %257 = vst.msk [vmem:[#allocation2 + $0x20] sm:$0xff] %vm252_vm0, %v3957_v52 }
  0x49   : > { %1135 = vmatmul.f32.vlgmr.msra.gmra.mxu2 %v319_v62  ;;  %1344 = vmatmul.f32.vlgmr.msra.gmra.mxu3 %v320_v63  ;;  %v349_v34 = vld [vmem:[%s4084_s10 + $0x100] sm:$0xff]  ;;  %v350_v35 = vld [vmem:[%s4084_s10 + $0x108] sm:$0xff]  ;;  %v355_v36 = vld [vmem:[%s4084_s10 + $0x130] sm:$0xff]  ;;  %258 = vst.msk [vmem:[#allocation2 + $0x28] sm:$0xff] %vm252_vm0, %v3957_v52 }
  0x4a   : > { %716 = vmatpush.msra.mxu0 %v573_v0  ;;  %925 = vmatpush.msra.mxu1 %v589_v1  ;;  %v356_v37 = vld [vmem:[%s4084_s10 + $0x138] sm:$0xff]  ;;  %v353_v38 = vld [vmem:[%s4084_s10 + $0x120] sm:$0xff]  ;;  %v354_v39 = vld [vmem:[%s4084_s10 + $0x128] sm:$0xff]  ;;  %259 = vst.msk [vmem:[#allocation2 + $0x30] sm:$0xff] %vm252_vm0, %v3957_v52 }
  0x4b   : > { %717 = vmatmul.f32.vlgmr.msra.gmra.mxu0 %v317_v2  ;;  %926 = vmatmul.f32.vlgmr.msra.gmra.mxu1 %v318_v3  ;;  %v359_v40 = vld [vmem:[%s4084_s10 + $0x150] sm:$0xff]  ;;  %v360_v41 = vld [vmem:[%s4084_s10 + $0x158] sm:$0xff]  ;;  %v357_v42 = vld [vmem:[%s4084_s10 + $0x140] sm:$0xff]  ;;  %260 = vst.msk [vmem:[#allocation2 + $0x38] sm:$0xff] %vm252_vm0, %v3957_v52 }
  0x4c   : > { %v358_v43 = vld [vmem:[%s4084_s10 + $0x148] sm:$0xff]  ;;  %v363_v44 = vld [vmem:[%s4084_s10 + $0x170] sm:$0xff]  ;;  %v364_v45 = vld [vmem:[%s4084_s10 + $0x178] sm:$0xff]  ;;  %261 = vst.msk [vmem:[#allocation2 + $0x40] sm:$0xff] %vm252_vm0, %v3957_v52 }
  0x4d   : > { %v361_v46 = vld [vmem:[%s4084_s10 + $0x160] sm:$0xff]  ;;  %v362_v47 = vld [vmem:[%s4084_s10 + $0x168] sm:$0xff]  ;;  %v367_v48 = vld [vmem:[%s4084_s10 + $0x190] sm:$0xff]  ;;  %262 = vst.msk [vmem:[#allocation2 + $0x48] sm:$0xff] %vm252_vm0, %v3957_v52 }
  0x4e   : > { %v368_v49 = vld [vmem:[%s4084_s10 + $0x198] sm:$0xff]  ;;  %v365_v50 = vld [vmem:[%s4084_s10 + $0x180] sm:$0xff]  ;;  %v366_v51 = vld [vmem:[%s4084_s10 + $0x188] sm:$0xff]  ;;  %263 = vst.msk [vmem:[#allocation2 + $0x50] sm:$0xff] %vm252_vm0, %v3957_v52 }
  0x4f   : > { %v371_v53 = vld [vmem:[%s4084_s10 + $0x1b0] sm:$0xff]  ;;  %v372_v54 = vld [vmem:[%s4084_s10 + $0x1b8] sm:$0xff]  ;;  %v369_v55 = vld [vmem:[%s4084_s10 + $0x1a0] sm:$0xff]  ;;  %264 = vst.msk [vmem:[#allocation2 + $0x58] sm:$0xff] %vm252_vm0, %v3957_v52 }
  0x50   : > { %v370_v56 = vld [vmem:[%s4084_s10 + $0x1a8] sm:$0xff]  ;;  %265 = vst.msk [vmem:[#allocation2 + $0x60] sm:$0xff] %vm252_vm0, %v3957_v52  ;;  %v375_v57 = vld [vmem:[%s4084_s10 + $0x1d0] sm:$0xff]  ;;  %v376_v58 = vld [vmem:[%s4084_s10 + $0x1d8] sm:$0xff] }
  0x51   : > { %1138 = vmatmul.f32.gmra.mxu2 %v323_v4  ;;  %1347 = vmatmul.f32.gmra.mxu3 %v324_v5  ;;  %266 = vst.msk [vmem:[#allocation2 + $0x68] sm:$0xff] %vm252_vm0, %v3957_v52  ;;  %v373_v59 = vld [vmem:[%s4084_s10 + $0x1c0] sm:$0xff]  ;;  %v374_v60 = vld [vmem:[%s4084_s10 + $0x1c8] sm:$0xff]  ;;  %v379_v61 = vld [vmem:[%s4084_s10 + $0x1f0] sm:$0xff] }
  0x52   : > { %267 = vst.msk [vmem:[#allocation2 + $0x70] sm:$0xff] %vm252_vm0, %v3957_v52  ;;  %v380_v62 = vld [vmem:[%s4084_s10 + $0x1f8] sm:$0xff]  ;;  %v377_v63 = vld [vmem:[%s4084_s10 + $0x1e0] sm:$0xff]  ;;  %v378_v0 = vld [vmem:[%s4084_s10 + $0x1e8] sm:$0xff] }
  0x53   : > { %720 = vmatmul.f32.gmra.mxu0 %v321_v6  ;;  %929 = vmatmul.f32.gmra.mxu1 %v322_v7  ;;  %268 = vst.msk [vmem:[#allocation2 + $0x78] sm:$0xff] %vm252_vm0, %v3957_v52  ;;  %v383_v1 = vld [vmem:[%s4084_s10 + $0x210] sm:$0xff]  ;;  %v384_v2 = vld [vmem:[%s4084_s10 + $0x218] sm:$0xff]  ;;  %v381_v5 = vld [vmem:[%s4084_s10 + $0x200] sm:$0xff] }
  0x54   : > { %269 = vst.msk [vmem:[#allocation2 + $0x80] sm:$0xff] %vm252_vm0, %v3957_v52  ;;  %v382_v6 = vld [vmem:[%s4084_s10 + $0x208] sm:$0xff] }
  0x55   : > { %270 = vst.msk [vmem:[#allocation2 + $0x88] sm:$0xff] %vm252_vm0, %v3957_v52 }
  0x56   : > { %271 = vst.msk [vmem:[#allocation2 + $0x90] sm:$0xff] %vm252_vm0, %v3957_v52 }
  0x57   : > { %272 = vst.msk [vmem:[#allocation2 + $0x98] sm:$0xff] %vm252_vm0, %v3957_v52 }
  0x58   : > { %273 = vst.msk [vmem:[#allocation2 + $0xa0] sm:$0xff] %vm252_vm0, %v3957_v52 }
  0x59   : > { %1141 = vmatmul.f32.gmra.mxu2 %v327_v8  ;;  %1350 = vmatmul.f32.gmra.mxu3 %v328_v9  ;;  %274 = vst.msk [vmem:[#allocation2 + $0xa8] sm:$0xff] %vm252_vm0, %v3957_v52 }
  0x5a   : > { %275 = vst.msk [vmem:[#allocation2 + $0xb0] sm:$0xff] %vm252_vm0, %v3957_v52 }
  0x5b   : > { %723 = vmatmul.f32.gmra.mxu0 %v325_v10  ;;  %932 = vmatmul.f32.gmra.mxu1 %v326_v11  ;;  %276 = vst.msk [vmem:[#allocation2 + $0xb8] sm:$0xff] %vm252_vm0, %v3957_v52  ;;  %v637_v11 = vld [vmem:[#allocation2] sm:$0xff] }
  0x5c   : > { %277 = vst.msk [vmem:[#allocation2 + $0xc0] sm:$0xff] %vm252_vm0, %v3957_v52 }
  0x5d   : > { %278 = vst.msk [vmem:[#allocation2 + $0xc8] sm:$0xff] %vm252_vm0, %v3957_v52 }
  0x5e   : > { %279 = vst.msk [vmem:[#allocation2 + $0xd0] sm:$0xff] %vm252_vm0, %v3957_v52 }
  0x5f   : > { %280 = vst.msk [vmem:[#allocation2 + $0xd8] sm:$0xff] %vm252_vm0, %v3957_v52 }
  0x60   : > { %281 = vst.msk [vmem:[#allocation2 + $0xe0] sm:$0xff] %vm252_vm0, %v3957_v52 }
  0x61   : > { %1144 = vmatmul.f32.gmra.mxu2 %v331_v12  ;;  %1353 = vmatmul.f32.gmra.mxu3 %v332_v13  ;;  %282 = vst.msk [vmem:[#allocation2 + $0xe8] sm:$0xff] %vm252_vm0, %v3957_v52  ;;  %v387_v12 = vld [vmem:[%s4084_s10 + $0x230] sm:$0xff]  ;;  %v388_v13 = vld [vmem:[%s4084_s10 + $0x238] sm:$0xff] }
  0x62   : > { %283 = vst.msk [vmem:[#allocation2 + $0xf0] sm:$0xff] %vm252_vm0, %v3957_v52 }
  0x63   : > { %726 = vmatmul.f32.gmra.mxu0 %v329_v14  ;;  %935 = vmatmul.f32.gmra.mxu1 %v330_v15  ;;  %284 = vst.msk [vmem:[#allocation2 + $0xf8] sm:$0xff] %vm252_vm0, %v3957_v52 }
  0x64   : > { %285 = vst.msk [vmem:[#allocation2 + $0x100] sm:$0xff] %vm252_vm0, %v3957_v52 }
  0x65   : > { %286 = vst.msk [vmem:[#allocation2 + $0x108] sm:$0xff] %vm252_vm0, %v3957_v52 }
  0x66   : > { %287 = vst.msk [vmem:[#allocation2 + $0x110] sm:$0xff] %vm252_vm0, %v3957_v52 }
  0x67   : > { %288 = vst.msk [vmem:[#allocation2 + $0x118] sm:$0xff] %vm252_vm0, %v3957_v52 }
  0x68   : > { %289 = vst.msk [vmem:[#allocation2 + $0x120] sm:$0xff] %vm252_vm0, %v3957_v52 }
  0x69   : > { %1147 = vmatmul.f32.gmra.mxu2 %v335_v16  ;;  %1356 = vmatmul.f32.gmra.mxu3 %v336_v17  ;;  %290 = vst.msk [vmem:[#allocation2 + $0x128] sm:$0xff] %vm252_vm0, %v3957_v52  ;;  %v385_v17 = vld [vmem:[%s4084_s10 + $0x220] sm:$0xff] }
  0x6a   : > { %291 = vst.msk [vmem:[#allocation2 + $0x130] sm:$0xff] %vm252_vm0, %v3957_v52 }
  0x6b   : > { %729 = vmatmul.f32.gmra.mxu0 %v333_v18  ;;  %938 = vmatmul.f32.gmra.mxu1 %v334_v19  ;;  %292 = vst.msk [vmem:[#allocation2 + $0x138] sm:$0xff] %vm252_vm0, %v3957_v52  ;;  %v386_v18 = vld [vmem:[%s4084_s10 + $0x228] sm:$0xff] }
  0x6c   : > { %293 = vst.msk [vmem:[#allocation2 + $0x140] sm:$0xff] %vm252_vm0, %v3957_v52 }
  0x6d   : > { %294 = vst.msk [vmem:[#allocation2 + $0x148] sm:$0xff] %vm252_vm0, %v3957_v52 }
  0x6e   : > { %295 = vst.msk [vmem:[#allocation2 + $0x150] sm:$0xff] %vm252_vm0, %v3957_v52 }
  0x6f   : > { %296 = vst.msk [vmem:[#allocation2 + $0x158] sm:$0xff] %vm252_vm0, %v3957_v52 }
  0x70   : > { %297 = vst.msk [vmem:[#allocation2 + $0x160] sm:$0xff] %vm252_vm0, %v3957_v52 }
  0x71   : > { %1150 = vmatmul.f32.gmra.mxu2 %v339_v20  ;;  %1359 = vmatmul.f32.gmra.mxu3 %v340_v21  ;;  %298 = vst.msk [vmem:[#allocation2 + $0x168] sm:$0xff] %vm252_vm0, %v3957_v52 }
  0x72   : > { %299 = vst.msk [vmem:[#allocation2 + $0x170] sm:$0xff] %vm252_vm0, %v3957_v52 }
  0x73   : > { %732 = vmatmul.f32.gmra.mxu0 %v337_v22  ;;  %941 = vmatmul.f32.gmra.mxu1 %v338_v23  ;;  %v391_v22 = vld [vmem:[%s4084_s10 + $0x250] sm:$0xff]  ;;  %v392_v23 = vld [vmem:[%s4084_s10 + $0x258] sm:$0xff]  ;;  %300 = vst.msk [vmem:[#allocation2 + $0x178] sm:$0xff] %vm252_vm0, %v3957_v52 }
  0x74   : > { %301 = vst.msk [vmem:[#allocation2 + $0x180] sm:$0xff] %vm252_vm0, %v3957_v52 }
  0x75   : > { %302 = vst.msk [vmem:[#allocation2 + $0x188] sm:$0xff] %vm252_vm0, %v3957_v52 }
  0x76   : > { %303 = vst.msk [vmem:[#allocation2 + $0x190] sm:$0xff] %vm252_vm0, %v3957_v52 }
  0x77   : > { %304 = vst.msk [vmem:[#allocation2 + $0x198] sm:$0xff] %vm252_vm0, %v3957_v52 }
  0x78   : > { %305 = vst.msk [vmem:[#allocation2 + $0x1a0] sm:$0xff] %vm252_vm0, %v3957_v52 }
  0x79   : > { %1153 = vmatmul.f32.gmra.mxu2 %v343_v24  ;;  %1362 = vmatmul.f32.gmra.mxu3 %v344_v25  ;;  %306 = vst.msk [vmem:[#allocation2 + $0x1a8] sm:$0xff] %vm252_vm0, %v3957_v52 }
  0x7a   : > { %307 = vst.msk [vmem:[#allocation2 + $0x1b0] sm:$0xff] %vm252_vm0, %v3957_v52 }
  0x7b   : > { %735 = vmatmul.f32.gmra.mxu0 %v341_v26  ;;  %944 = vmatmul.f32.gmra.mxu1 %v342_v27  ;;  %v389_v26 = vld [vmem:[%s4084_s10 + $0x240] sm:$0xff]  ;;  %v390_v27 = vld [vmem:[%s4084_s10 + $0x248] sm:$0xff]  ;;  %308 = vst.msk [vmem:[#allocation2 + $0x1b8] sm:$0xff] %vm252_vm0, %v3957_v52 }
  0x7c   : > { %309 = vst.msk [vmem:[#allocation2 + $0x1c0] sm:$0xff] %vm252_vm0, %v3957_v52 }
  0x7d   : > { %310 = vst.msk [vmem:[#allocation2 + $0x1c8] sm:$0xff] %vm252_vm0, %v3957_v52 }
  0x7e   : > { %311 = vst.msk [vmem:[#allocation2 + $0x1d0] sm:$0xff] %vm252_vm0, %v3957_v52 }
  0x7f   : > { %312 = vst.msk [vmem:[#allocation2 + $0x1d8] sm:$0xff] %vm252_vm0, %v3957_v52 }
  0x80   : > { %313 = vst.msk [vmem:[#allocation2 + $0x1e0] sm:$0xff] %vm252_vm0, %v3957_v52 }
  0x81   : > { %1156 = vmatmul.f32.gmra.mxu2 %v347_v28  ;;  %1365 = vmatmul.f32.gmra.mxu3 %v348_v29  ;;  %v4459_v28 = vld [vmem:[#allocation6] ss:$0 sm:$0xff]  ;;  %314 = vst.msk [vmem:[#allocation2 + $0x1e8] sm:$0xff] %vm252_vm0, %v3957_v52 }
  0x82   : > { %315 = vst.msk [vmem:[#allocation2 + $0x1f0] sm:$0xff] %vm252_vm0, %v3957_v52 }
  0x83   : > { %738 = vmatmul.f32.gmra.mxu0 %v345_v30  ;;  %947 = vmatmul.f32.gmra.mxu1 %v346_v31  ;;  %316 = vst.msk [vmem:[#allocation2 + $0x1f8] sm:$0xff] %vm252_vm0, %v3957_v52  ;;  %v404_v52 = vld [vmem:[%s4084_s10 + $0x2b8] sm:$0xff] }
  0x89   : > { %1159 = vmatmul.f32.gmra.mxu2 %v351_v32  ;;  %1368 = vmatmul.f32.gmra.mxu3 %v352_v33 }
  0x8b   : > { %741 = vmatmul.f32.gmra.mxu0 %v349_v34  ;;  %950 = vmatmul.f32.gmra.mxu1 %v350_v35 }
  0x91   : > { %1162 = vmatmul.f32.gmra.mxu2 %v355_v36  ;;  %1371 = vmatmul.f32.gmra.mxu3 %v356_v37  ;;  %v395_v37 = vld [vmem:[%s4084_s10 + $0x270] sm:$0xff] }
  0x93   : > { %744 = vmatmul.f32.gmra.mxu0 %v353_v38  ;;  %953 = vmatmul.f32.gmra.mxu1 %v354_v39  ;;  %v396_v38 = vld [vmem:[%s4084_s10 + $0x278] sm:$0xff] }
  0x99   : > { %1165 = vmatmul.f32.gmra.mxu2 %v359_v40  ;;  %1374 = vmatmul.f32.gmra.mxu3 %v360_v41 }
  0x9b   : > { %747 = vmatmul.f32.gmra.mxu0 %v357_v42  ;;  %956 = vmatmul.f32.gmra.mxu1 %v358_v43  ;;  %v393_v43 = vld [vmem:[%s4084_s10 + $0x260] sm:$0xff] }
  0xa1   : > { %1168 = vmatmul.f32.gmra.mxu2 %v363_v44  ;;  %1377 = vmatmul.f32.gmra.mxu3 %v364_v45  ;;  %v394_v44 = vld [vmem:[%s4084_s10 + $0x268] sm:$0xff] }
  0xa3   : > { %750 = vmatmul.f32.gmra.mxu0 %v361_v46  ;;  %959 = vmatmul.f32.gmra.mxu1 %v362_v47  ;;  %v638_v47 = vld [vmem:[#allocation2 + $0x8] sm:$0xff] }
  0xa9   : > { %1171 = vmatmul.f32.gmra.mxu2 %v367_v48  ;;  %1380 = vmatmul.f32.gmra.mxu3 %v368_v49  ;;  %v639_v49 = vld [vmem:[#allocation2 + $0x10] sm:$0xff] }
  0xab   : > { %753 = vmatmul.f32.gmra.mxu0 %v365_v50  ;;  %962 = vmatmul.f32.gmra.mxu1 %v366_v51 }
  0xb1   : > { %1174 = vmatmul.f32.gmra.mxu2 %v371_v53  ;;  %1383 = vmatmul.f32.gmra.mxu3 %v372_v54 }
  0xb3   : > { %756 = vmatmul.f32.gmra.mxu0 %v369_v55  ;;  %965 = vmatmul.f32.gmra.mxu1 %v370_v56  ;;  %v640_v55 = vld [vmem:[#allocation2 + $0x18] sm:$0xff]  ;;  %v399_v56 = vld [vmem:[%s4084_s10 + $0x290] sm:$0xff] }
  0xb9   : > { %1177 = vmatmul.f32.gmra.mxu2 %v375_v57  ;;  %1386 = vmatmul.f32.gmra.mxu3 %v376_v58  ;;  %v400_v57 = vld [vmem:[%s4084_s10 + $0x298] sm:$0xff] }
  0xbb   : > { %759 = vmatmul.f32.gmra.mxu0 %v373_v59  ;;  %968 = vmatmul.f32.gmra.mxu1 %v374_v60 }
  0xc1   : > { %1180 = vmatmul.f32.gmra.mxu2 %v379_v61  ;;  %1389 = vmatmul.f32.gmra.mxu3 %v380_v62  ;;  %v397_v62 = vld [vmem:[%s4084_s10 + $0x280] sm:$0xff] }
  0xc3   : > { %762 = vmatmul.f32.gmra.mxu0 %v377_v63  ;;  %971 = vmatmul.f32.gmra.mxu1 %v378_v0  ;;  %v398_v63 = vld [vmem:[%s4084_s10 + $0x288] sm:$0xff] }
  0xc8   : > { %v718_v3 = vpop.f32.mrf.mxu0  ;;  %v927_v4 = vpop.f32.mrf.mxu1 }
  0xc9   : > { %v928_v7 = vadd.f32 %v927_v4, %v718_v3  ;;  %1183 = vmatmul.f32.gmra.mxu2 %v383_v1  ;;  %1392 = vmatmul.f32.gmra.mxu3 %v384_v2 }
  0xcb   : > { %765 = vmatmul.f32.gmra.mxu0 %v381_v5  ;;  %974 = vmatmul.f32.gmra.mxu1 %v382_v6  ;;  %v641_v5 = vld [vmem:[#allocation2 + $0x20] sm:$0xff]  ;;  %v403_v6 = vld [vmem:[%s4084_s10 + $0x2b0] sm:$0xff] }
  0xcc   : > { %v1136_v8 = vpop.f32.mrf.mxu2  ;;  %v1345_v9 = vpop.f32.mrf.mxu3 }
  0xcd   : > { %v1137_v10 = vadd.f32 %v1136_v8, %v928_v7 }
  0xcf   : > { %v1346_v14 = vadd.f32 %v1345_v9, %v1137_v10  ;;  %v401_v10 = vld [vmem:[%s4084_s10 + $0x2a0] sm:$0xff] }
  0xd0   : > { %v721_v15 = vpop.f32.mrf.mxu0  ;;  %v930_v16 = vpop.f32.mrf.mxu1 }
  0xd1   : > { %v1537_v19 = vadd.f32 %v1346_v14, %v637_v11  ;;  %1186 = vmatmul.f32.gmra.mxu2 %v387_v12  ;;  %1395 = vmatmul.f32.gmra.mxu3 %v388_v13  ;;  %v931_v29 = vadd.f32 %v930_v16, %v721_v15  ;;  %v402_v11 = vld [vmem:[%s4084_s10 + $0x2a8] sm:$0xff] }
  0xd3   : > { %1602 = vst.msk [vmem:[#allocation2] sm:$0xff] %vm252_vm0, %v1537_v19  ;;  %768 = vmatmul.f32.gmra.mxu0 %v385_v17  ;;  %977 = vmatmul.f32.gmra.mxu1 %v386_v18 }
  0xd4   : > { %v1139_v20 = vpop.f32.mrf.mxu2  ;;  %v1348_v21 = vpop.f32.mrf.mxu3 }
  0xd5   : > { %v1140_v36 = vadd.f32 %v1139_v20, %v931_v29  ;;  %v408_v29 = vld [vmem:[%s4084_s10 + $0x2d8] sm:$0xff] }
  0xd7   : > { %v1349_v46 = vadd.f32 %v1348_v21, %v1140_v36 }
  0xd8   : > { %v724_v24 = vpop.f32.mrf.mxu0  ;;  %v933_v25 = vpop.f32.mrf.mxu1 }
  0xd9   : > { %1189 = vmatmul.f32.gmra.mxu2 %v391_v22  ;;  %1398 = vmatmul.f32.gmra.mxu3 %v392_v23  ;;  %v934_v31 = vadd.f32 %v933_v25, %v724_v24  ;;  %v1538_v54 = vadd.f32 %v1349_v46, %v638_v47  ;;  %v643_v46 = vld [vmem:[#allocation2 + $0x30] sm:$0xff] }
  0xda   : > { %v1669_v30 = vld [vmem:[#allocation2] sm:$0xff]  ;;  %v411_v47 = vld [vmem:[%s4084_s10 + $0x2f0] sm:$0xff] }
  0xdb   : > { %v1733_v32 = vmax.f32 %v1669_v30, 0.0  ;;  %771 = vmatmul.f32.gmra.mxu0 %v389_v26  ;;  %980 = vmatmul.f32.gmra.mxu1 %v390_v27  ;;  %1603 = vst.msk [vmem:[#allocation2 + $0x8] sm:$0xff] %vm252_vm0, %v1538_v54  ;;  %v642_v26 = vld [vmem:[#allocation2 + $0x28] sm:$0xff]  ;;  %v407_v27 = vld [vmem:[%s4084_s10 + $0x2d0] sm:$0xff]  ;;  %v409_v54 = vld [vmem:[%s4084_s10 + $0x2e0] sm:$0xff] }
  0xdc   : > { %v1142_v33 = vpop.f32.mrf.mxu2  ;;  %v1351_v34 = vpop.f32.mrf.mxu3 }
  0xdd   : > { %v1801_v35 = vmul.f32 %v4459_v28, %v1733_v32  ;;  %v1143_v39 = vadd.f32 %v1142_v33, %v934_v31 }
  0xdf   : > { %v1865_v40 = vsel %vm252_vm0, %v1801_v35, 0.0  ;;  %v1352_v48 = vadd.f32 %v1351_v34, %v1143_v39  ;;  %v405_v34 = vld [vmem:[%s4084_s10 + $0x2c0] sm:$0xff]  ;;  %v406_v35 = vld [vmem:[%s4084_s10 + $0x2c8] sm:$0xff] }
  0xe0   : > { %1866 = vadd.xlane.f32.xlu0 %v1865_v40  ;;  %v727_v41 = vpop.f32.mrf.mxu0  ;;  %v936_v42 = vpop.f32.mrf.mxu1 }
  0xe1   : > { %v937_v45 = vadd.f32 %v936_v42, %v727_v41  ;;  %1192 = vmatmul.f32.gmra.mxu2 %v395_v37  ;;  %1401 = vmatmul.f32.gmra.mxu3 %v396_v38  ;;  %v1539_v58 = vadd.f32 %v1352_v48, %v639_v49  ;;  %v412_v48 = vld [vmem:[%s4084_s10 + $0x2f8] sm:$0xff] }
  0xe2   : > { %v1670_v12 = vld [vmem:[#allocation2 + $0x8] sm:$0xff] }
  0xe3   : > { %774 = vmatmul.f32.gmra.mxu0 %v393_v43  ;;  %983 = vmatmul.f32.gmra.mxu1 %v394_v44  ;;  %1604 = vst.msk [vmem:[#allocation2 + $0x10] sm:$0xff] %vm252_vm0, %v1539_v58  ;;  %v1734_v15 = vmax.f32 %v1670_v12, 0.0 }
  0xe4   : > { %v1145_v50 = vpop.f32.mrf.mxu2  ;;  %v1354_v51 = vpop.f32.mrf.mxu3 }
  0xe5   : > { %v1146_v53 = vadd.f32 %v1145_v50, %v937_v45  ;;  %v1802_v19 = vmul.f32 %v4459_v28, %v1734_v15 }
  0xe7   : > { %v1355_v59 = vadd.f32 %v1354_v51, %v1146_v53  ;;  %v1868_v25 = vsel %vm252_vm0, %v1802_v19, 0.0 }
  0xe8   : > { %v730_v60 = vpop.f32.mrf.mxu0  ;;  %v939_v61 = vpop.f32.mrf.mxu1  ;;  %1869 = vadd.xlane.f32.xlu0 %v1868_v25 }
  0xe9   : > { %v1540_v0 = vadd.f32 %v1355_v59, %v640_v55  ;;  %v940_v1 = vadd.f32 %v939_v61, %v730_v60  ;;  %1195 = vmatmul.f32.gmra.mxu2 %v399_v56  ;;  %1404 = vmatmul.f32.gmra.mxu3 %v400_v57  ;;  %v410_v55 = vld [vmem:[%s4084_s10 + $0x2e8] sm:$0xff] }
  0xea   : > { %v1671_v16 = vld [vmem:[#allocation2 + $0x10] sm:$0xff] }
  0xeb   : > { %777 = vmatmul.f32.gmra.mxu0 %v397_v62  ;;  %986 = vmatmul.f32.gmra.mxu1 %v398_v63  ;;  %1605 = vst.msk [vmem:[#allocation2 + $0x18] sm:$0xff] %vm252_vm0, %v1540_v0  ;;  %v1735_v17 = vmax.f32 %v1671_v16, 0.0  ;;  %v644_v0 = vld [vmem:[#allocation2 + $0x38] sm:$0xff]  ;;  %v645_v16 = vld [vmem:[#allocation2 + $0x40] sm:$0xff] }
  0xec   : > { %v1148_v2 = vpop.f32.mrf.mxu2  ;;  %v1357_v3 = vpop.f32.mrf.mxu3 }
  0xed   : > { %v1149_v4 = vadd.f32 %v1148_v2, %v940_v1  ;;  %v1803_v22 = vmul.f32 %v4459_v28, %v1735_v17  ;;  %v415_v1 = vld [vmem:[%s4084_s10 + $0x310] sm:$0xff]  ;;  %v416_v2 = vld [vmem:[%s4084_s10 + $0x318] sm:$0xff] }
  0xef   : > { %v1358_v7 = vadd.f32 %v1357_v3, %v1149_v4  ;;  %v1871_v30 = vsel %vm252_vm0, %v1803_v22, 0.0 }
  0xf0   : > { %v733_v8 = vpop.f32.mrf.mxu0  ;;  %v942_v9 = vpop.f32.mrf.mxu1  ;;  %1872 = vadd.xlane.f32.xlu1 %v1871_v30  ;;  %v646_v30 = vld [vmem:[#allocation2 + $0x48] sm:$0xff] }
  0xf1   : > { %v1541_v13 = vadd.f32 %v1358_v7, %v641_v5  ;;  %v943_v14 = vadd.f32 %v942_v9, %v733_v8  ;;  %1198 = vmatmul.f32.gmra.mxu2 %v403_v6  ;;  %1407 = vmatmul.f32.gmra.mxu3 %v404_v52  ;;  %v413_v52 = vld [vmem:[%s4084_s10 + $0x300] sm:$0xff]  ;;  %v414_v7 = vld [vmem:[%s4084_s10 + $0x308] sm:$0xff] }
  0xf2   : > { %v1672_v18 = vld [vmem:[#allocation2 + $0x18] sm:$0xff] }
  0xf3   : > { %1606 = vst.msk [vmem:[#allocation2 + $0x20] sm:$0xff] %vm252_vm0, %v1541_v13  ;;  %780 = vmatmul.f32.gmra.mxu0 %v401_v10  ;;  %989 = vmatmul.f32.gmra.mxu1 %v402_v11  ;;  %v1736_v24 = vmax.f32 %v1672_v18, 0.0 }
  0xf4   : > { %v1151_v20 = vpop.f32.mrf.mxu2  ;;  %v1360_v21 = vpop.f32.mrf.mxu3 }
  0xf5   : > { %v1152_v23 = vadd.f32 %v1151_v20, %v943_v14  ;;  %v1804_v37 = vmul.f32 %v4459_v28, %v1736_v24 }
  0xf7   : > { %v1361_v31 = vadd.f32 %v1360_v21, %v1152_v23  ;;  %v1874_v43 = vsel %vm252_vm0, %v1804_v37, 0.0 }
  0xf8   : > { %v736_v32 = vpop.f32.mrf.mxu0  ;;  %v945_v33 = vpop.f32.mrf.mxu1  ;;  %1875 = vadd.xlane.f32.xlu1 %v1874_v43  ;;  %v647_v43 = vld [vmem:[#allocation2 + $0x50] sm:$0xff] }
  0xf9   : > { %v1542_v36 = vadd.f32 %v1361_v31, %v642_v26  ;;  %v946_v38 = vadd.f32 %v945_v33, %v736_v32  ;;  %1201 = vmatmul.f32.gmra.mxu2 %v407_v27  ;;  %1410 = vmatmul.f32.gmra.mxu3 %v408_v29 }
  0xfa   : > { %v1673_v39 = vld [vmem:[#allocation2 + $0x20] sm:$0xff] }
  0xfb   : > { %1607 = vst.msk [vmem:[#allocation2 + $0x28] sm:$0xff] %vm252_vm0, %v1542_v36  ;;  %v1737_v40 = vmax.f32 %v1673_v39, 0.0  ;;  %783 = vmatmul.f32.gmra.mxu0 %v405_v34  ;;  %992 = vmatmul.f32.gmra.mxu1 %v406_v35 }
  0xfc   : > { %v1154_v41 = vpop.f32.mrf.mxu2  ;;  %v1363_v42 = vpop.f32.mrf.mxu3 }
  0xfd   : > { %v1155_v44 = vadd.f32 %v1154_v41, %v946_v38  ;;  %v1805_v45 = vmul.f32 %v4459_v28, %v1737_v40 }
  0xff   : > { %v1364_v49 = vadd.f32 %v1363_v42, %v1155_v44  ;;  %v1877_v50 = vsel %vm252_vm0, %v1805_v45, 0.0 }
 0x100   : > { %1878 = vadd.xlane.f32.xlu2 %v1877_v50  ;;  %v739_v51 = vpop.f32.mrf.mxu0  ;;  %v948_v53 = vpop.f32.mrf.mxu1 }
 0x101   : > { %v1543_v56 = vadd.f32 %v1364_v49, %v643_v46  ;;  %v949_v57 = vadd.f32 %v948_v53, %v739_v51  ;;  %1204 = vmatmul.f32.gmra.mxu2 %v411_v47  ;;  %1413 = vmatmul.f32.gmra.mxu3 %v412_v48  ;;  %v419_v53 = vld [vmem:[%s4084_s10 + $0x330] sm:$0xff] }
 0x102   : > { %v1674_v58 = vld [vmem:[#allocation2 + $0x28] sm:$0xff] }
 0x103   : > { %1608 = vst.msk [vmem:[#allocation2 + $0x30] sm:$0xff] %vm252_vm0, %v1543_v56  ;;  %v1738_v59 = vmax.f32 %v1674_v58, 0.0  ;;  %786 = vmatmul.f32.gmra.mxu0 %v409_v54  ;;  %995 = vmatmul.f32.gmra.mxu1 %v410_v55  ;;  %v420_v54 = vld [vmem:[%s4084_s10 + $0x338] sm:$0xff]  ;;  %v417_v55 = vld [vmem:[%s4084_s10 + $0x320] sm:$0xff]  ;;  %v418_v58 = vld [vmem:[%s4084_s10 + $0x328] sm:$0xff] }
 0x104   : > { %v1157_v60 = vpop.f32.mrf.mxu2  ;;  %v1366_v61 = vpop.f32.mrf.mxu3 }
 0x105   : > { %v1158_v62 = vadd.f32 %v1157_v60, %v949_v57  ;;  %v1806_v63 = vmul.f32 %v4459_v28, %v1738_v59 }
 0x107   : > { %v1367_v3 = vadd.f32 %v1366_v61, %v1158_v62  ;;  %v1880_v4 = vsel %vm252_vm0, %v1806_v63, 0.0  ;;  %v648_v61 = vld [vmem:[#allocation2 + $0x58] sm:$0xff] }
 0x108   : > { %1881 = vadd.xlane.f32.xlu2 %v1880_v4  ;;  %v742_v5 = vpop.f32.mrf.mxu0  ;;  %v951_v6 = vpop.f32.mrf.mxu1  ;;  %v423_v4 = vld [vmem:[%s4084_s10 + $0x350] sm:$0xff] }
 0x109   : > { %v1544_v8 = vadd.f32 %v1367_v3, %v644_v0  ;;  %v952_v9 = vadd.f32 %v951_v6, %v742_v5  ;;  %1207 = vmatmul.f32.gmra.mxu2 %v415_v1  ;;  %1416 = vmatmul.f32.gmra.mxu3 %v416_v2 }
 0x10a   : > { %v1675_v10 = vld [vmem:[#allocation2 + $0x30] sm:$0xff] }
 0x10b   : > { %1609 = vst.msk [vmem:[#allocation2 + $0x38] sm:$0xff] %vm252_vm0, %v1544_v8  ;;  %v1739_v11 = vmax.f32 %v1675_v10, 0.0  ;;  %789 = vmatmul.f32.gmra.mxu0 %v413_v52  ;;  %998 = vmatmul.f32.gmra.mxu1 %v414_v7  ;;  %v424_v52 = vld [vmem:[%s4084_s10 + $0x358] sm:$0xff]  ;;  %v421_v7 = vld [vmem:[%s4084_s10 + $0x340] sm:$0xff]  ;;  %v422_v8 = vld [vmem:[%s4084_s10 + $0x348] sm:$0xff] }
 0x10c   : > { %v1160_v12 = vpop.f32.mrf.mxu2  ;;  %v1369_v13 = vpop.f32.mrf.mxu3 }
 0x10d   : > { %v1161_v14 = vadd.f32 %v1160_v12, %v952_v9  ;;  %v1807_v15 = vmul.f32 %v4459_v28, %v1739_v11 }
 0x10f   : > { %v1370_v17 = vadd.f32 %v1369_v13, %v1161_v14  ;;  %v1883_v18 = vsel %vm252_vm0, %v1807_v15, 0.0  ;;  %v649_v13 = vld [vmem:[#allocation2 + $0x60] sm:$0xff] }
 0x110   : > { %1884 = vadd.xlane.f32.xlu0 %v1883_v18  ;;  %v745_v19 = vpop.f32.mrf.mxu0  ;;  %v954_v20 = vpop.f32.mrf.mxu1 }
 0x111   : > { %v1545_v21 = vadd.f32 %v1370_v17, %v645_v16  ;;  %v955_v22 = vadd.f32 %v954_v20, %v745_v19  ;;  %1210 = vmatmul.f32.gmra.mxu2 %v419_v53  ;;  %1419 = vmatmul.f32.gmra.mxu3 %v420_v54  ;;  %v427_v20 = vld [vmem:[%s4084_s10 + $0x370] sm:$0xff] }
 0x112   : > { %v1676_v23 = vld [vmem:[#allocation2 + $0x38] sm:$0xff] }
 0x113   : > { %1610 = vst.msk [vmem:[#allocation2 + $0x40] sm:$0xff] %vm252_vm0, %v1545_v21  ;;  %v1740_v24 = vmax.f32 %v1676_v23, 0.0  ;;  %792 = vmatmul.f32.gmra.mxu0 %v417_v55  ;;  %1001 = vmatmul.f32.gmra.mxu1 %v418_v58  ;;  %v428_v21 = vld [vmem:[%s4084_s10 + $0x378] sm:$0xff]  ;;  %v425_v23 = vld [vmem:[%s4084_s10 + $0x360] sm:$0xff] }
 0x114   : > { %v1163_v25 = vpop.f32.mrf.mxu2  ;;  %v1372_v26 = vpop.f32.mrf.mxu3  ;;  %v652_v58 = vld [vmem:[#allocation2 + $0x78] sm:$0xff] }
 0x115   : > { %v1164_v27 = vadd.f32 %v1163_v25, %v955_v22  ;;  %v1808_v29 = vmul.f32 %v4459_v28, %v1740_v24  ;;  %v426_v24 = vld [vmem:[%s4084_s10 + $0x368] sm:$0xff] }
 0x117   : > { %v1373_v31 = vadd.f32 %v1372_v26, %v1164_v27  ;;  %v1886_v32 = vsel %vm252_vm0, %v1808_v29, 0.0 }
 0x118   : > { %1887 = vadd.xlane.f32.xlu1 %v1886_v32  ;;  %v748_v33 = vpop.f32.mrf.mxu0  ;;  %v957_v34 = vpop.f32.mrf.mxu1 }
 0x119   : > { %v1546_v35 = vadd.f32 %v1373_v31, %v646_v30  ;;  %v958_v36 = vadd.f32 %v957_v34, %v748_v33  ;;  %1213 = vmatmul.f32.gmra.mxu2 %v423_v4  ;;  %1422 = vmatmul.f32.gmra.mxu3 %v424_v52  ;;  %v650_v31 = vld [vmem:[#allocation2 + $0x68] sm:$0xff] }
 0x11a   : > { %v1677_v37 = vld [vmem:[#allocation2 + $0x40] sm:$0xff] }
 0x11b   : > { %1611 = vst.msk [vmem:[#allocation2 + $0x48] sm:$0xff] %vm252_vm0, %v1546_v35  ;;  %v1741_v38 = vmax.f32 %v1677_v37, 0.0  ;;  %795 = vmatmul.f32.gmra.mxu0 %v421_v7  ;;  %1004 = vmatmul.f32.gmra.mxu1 %v422_v8 }
 0x11c   : > { %v1166_v39 = vpop.f32.mrf.mxu2  ;;  %v1375_v40 = vpop.f32.mrf.mxu3 }
 0x11d   : > { %v1167_v41 = vadd.f32 %v1166_v39, %v958_v36  ;;  %v1809_v42 = vmul.f32 %v4459_v28, %v1741_v38 }
 0x11f   : > { %v1376_v44 = vadd.f32 %v1375_v40, %v1167_v41  ;;  %v1889_v45 = vsel %vm252_vm0, %v1809_v42, 0.0 }
 0x120   : > { %1890 = vadd.xlane.f32.xlu2 %v1889_v45  ;;  %v751_v46 = vpop.f32.mrf.mxu0  ;;  %v960_v47 = vpop.f32.mrf.mxu1 }
 0x121   : > { %v1547_v48 = vadd.f32 %v1376_v44, %v647_v43  ;;  %v961_v49 = vadd.f32 %v960_v47, %v751_v46  ;;  %1216 = vmatmul.f32.gmra.mxu2 %v427_v20  ;;  %1425 = vmatmul.f32.gmra.mxu3 %v428_v21  ;;  %v651_v44 = vld [vmem:[#allocation2 + $0x70] sm:$0xff] }
 0x122   : > { %v1678_v50 = vld [vmem:[#allocation2 + $0x48] sm:$0xff] }
 0x123   : > { %1612 = vst.msk [vmem:[#allocation2 + $0x50] sm:$0xff] %vm252_vm0, %v1547_v48  ;;  %v1742_v51 = vmax.f32 %v1678_v50, 0.0  ;;  %798 = vmatmul.f32.gmra.mxu0 %v425_v23  ;;  %1007 = vmatmul.f32.gmra.mxu1 %v426_v24  ;;  %v3958_v23 = vmov 0  }
 0x124   : > { %v1169_v56 = vpop.f32.mrf.mxu2  ;;  %v1378_v57 = vpop.f32.mrf.mxu3  ;;  %3798 = vset.pattern.permute.xlu1 %v3958_v23  ;;  %3799 = vset.pattern.permute.xlu2 %v3958_v23 }
 0x125   : > { %v1170_v59 = vadd.f32 %v1169_v56, %v961_v49  ;;  %v1810_v60 = vmul.f32 %v4459_v28, %v1742_v51  ;;  %3800 = vset.pattern.permute.xlu0 %v3958_v23  ;;  %v657_v23 = vld [vmem:[#allocation2 + $0xa0] sm:$0xff] }
 0x127   : > { %v1379_v62 = vadd.f32 %v1378_v57, %v1170_v59  ;;  %v1892_v63 = vsel %vm252_vm0, %v1810_v60, 0.0 }
 0x128   : > { %1893 = vadd.xlane.f32.xlu0 %v1892_v63  ;;  %v754_v0 = vpop.f32.mrf.mxu0  ;;  %v963_v1 = vpop.f32.mrf.mxu1 }
 0x129   : > { %v1548_v2 = vadd.f32 %v1379_v62, %v648_v61  ;;  %v964_v3 = vadd.f32 %v963_v1, %v754_v0 }
 0x12a   : > { %v1679_v5 = vld [vmem:[#allocation2 + $0x50] sm:$0xff] }
 0x12b   : > { %1613 = vst.msk [vmem:[#allocation2 + $0x58] sm:$0xff] %vm252_vm0, %v1548_v2  ;;  %v1743_v6 = vmax.f32 %v1679_v5, 0.0 }
 0x12c   : > { %v1172_v9 = vpop.f32.mrf.mxu2  ;;  %v1381_v10 = vpop.f32.mrf.mxu3 }
 0x12d   : > { %v1173_v11 = vadd.f32 %v1172_v9, %v964_v3  ;;  %v1811_v12 = vmul.f32 %v4459_v28, %v1743_v6  ;;  %v653_v6 = vld [vmem:[#allocation2 + $0x80] sm:$0xff] }
 0x12f   : > { %v1382_v14 = vadd.f32 %v1381_v10, %v1173_v11  ;;  %v1895_v15 = vsel %vm252_vm0, %v1811_v12, 0.0 }
 0x130   : > { %1896 = vadd.xlane.f32.xlu1 %v1895_v15  ;;  %v757_v16 = vpop.f32.mrf.mxu0  ;;  %v966_v17 = vpop.f32.mrf.mxu1 }
 0x131   : > { %v1549_v18 = vadd.f32 %v1382_v14, %v649_v13  ;;  %v967_v19 = vadd.f32 %v966_v17, %v757_v16 }
 0x132   : > { %v1680_v22 = vld [vmem:[#allocation2 + $0x58] sm:$0xff] }
 0x133   : > { %1614 = vst.msk [vmem:[#allocation2 + $0x60] sm:$0xff] %vm252_vm0, %v1549_v18  ;;  %v1744_v25 = vmax.f32 %v1680_v22, 0.0 }
 0x134   : > { %v1175_v26 = vpop.f32.mrf.mxu2  ;;  %v1384_v27 = vpop.f32.mrf.mxu3 }
 0x135   : > { %v1176_v29 = vadd.f32 %v1175_v26, %v967_v19  ;;  %v1812_v30 = vmul.f32 %v4459_v28, %v1744_v25 }
 0x137   : > { %v1385_v32 = vadd.f32 %v1384_v27, %v1176_v29  ;;  %v1898_v33 = vsel %vm252_vm0, %v1812_v30, 0.0  ;;  %v654_v30 = vld [vmem:[#allocation2 + $0x88] sm:$0xff] }
 0x138   : > { %1899 = vadd.xlane.f32.xlu2 %v1898_v33  ;;  %v760_v34 = vpop.f32.mrf.mxu0  ;;  %v969_v35 = vpop.f32.mrf.mxu1 }
 0x139   : > { %v1550_v36 = vadd.f32 %v1385_v32, %v650_v31  ;;  %v970_v37 = vadd.f32 %v969_v35, %v760_v34 }
 0x13a   : > { %v1681_v38 = vld [vmem:[#allocation2 + $0x60] sm:$0xff] }
 0x13b   : > { %1615 = vst.msk [vmem:[#allocation2 + $0x68] sm:$0xff] %vm252_vm0, %v1550_v36  ;;  %v1745_v39 = vmax.f32 %v1681_v38, 0.0 }
 0x13c   : > { %v1178_v40 = vpop.f32.mrf.mxu2  ;;  %v1387_v41 = vpop.f32.mrf.mxu3 }
 0x13d   : > { %v1179_v42 = vadd.f32 %v1178_v40, %v970_v37  ;;  %v1813_v43 = vmul.f32 %v4459_v28, %v1745_v39 }
 0x13f   : > { %v1388_v45 = vadd.f32 %v1387_v41, %v1179_v42  ;;  %v1901_v46 = vsel %vm252_vm0, %v1813_v43, 0.0 }
 0x140   : > { %1902 = vadd.xlane.f32.xlu0 %v1901_v46  ;;  %v763_v47 = vpop.f32.mrf.mxu0  ;;  %v972_v48 = vpop.f32.mrf.mxu1 }
 0x141   : > { %v1551_v49 = vadd.f32 %v1388_v45, %v651_v44  ;;  %v973_v50 = vadd.f32 %v972_v48, %v763_v47  ;;  %v655_v47 = vld [vmem:[#allocation2 + $0x90] sm:$0xff] }
 0x142   : > { %v1682_v51 = vld [vmem:[#allocation2 + $0x68] sm:$0xff] }
 0x143   : > { %1616 = vst.msk [vmem:[#allocation2 + $0x70] sm:$0xff] %vm252_vm0, %v1551_v49  ;;  %v1746_v53 = vmax.f32 %v1682_v51, 0.0 }
 0x144   : > { %v1181_v54 = vpop.f32.mrf.mxu2  ;;  %v1390_v55 = vpop.f32.mrf.mxu3 }
 0x145   : > { %v1182_v56 = vadd.f32 %v1181_v54, %v973_v50  ;;  %v1814_v57 = vmul.f32 %v4459_v28, %v1746_v53 }
 0x147   : > { %v1391_v59 = vadd.f32 %v1390_v55, %v1182_v56  ;;  %v1904_v60 = vsel %vm252_vm0, %v1814_v57, 0.0 }
 0x148   : > { %1905 = vadd.xlane.f32.xlu1 %v1904_v60  ;;  %v766_v61 = vpop.f32.mrf.mxu0  ;;  %v975_v62 = vpop.f32.mrf.mxu1 }
 0x149   : > { %v1552_v63 = vadd.f32 %v1391_v59, %v652_v58  ;;  %v976_v0 = vadd.f32 %v975_v62, %v766_v61 }
 0x14a   : > { %v1683_v1 = vld [vmem:[#allocation2 + $0x70] sm:$0xff] }
 0x14b   : > { %1617 = vst.msk [vmem:[#allocation2 + $0x78] sm:$0xff] %vm252_vm0, %v1552_v63  ;;  %v1747_v2 = vmax.f32 %v1683_v1, 0.0 }
 0x14c   : > { %v1184_v3 = vpop.f32.mrf.mxu2  ;;  %v1393_v52 = vpop.f32.mrf.mxu3 }
 0x14d   : > { %v1815_v4 = vmul.f32 %v4459_v28, %v1747_v2  ;;  %v1185_v5 = vadd.f32 %v1184_v3, %v976_v0 }
 0x14f   : > { %v1907_v7 = vsel %vm252_vm0, %v1815_v4, 0.0  ;;  %v1394_v8 = vadd.f32 %v1393_v52, %v1185_v5  ;;  %v656_v5 = vld [vmem:[#allocation2 + $0x98] sm:$0xff] }
 0x150   : > { %1908 = vadd.xlane.f32.xlu2 %v1907_v7  ;;  %v769_v18 = vpop.f32.mrf.mxu0  ;;  %v978_v19 = vpop.f32.mrf.mxu1 }
 0x151   : > { %v1553_v9 = vadd.f32 %v1394_v8, %v653_v6  ;;  %v979_v22 = vadd.f32 %v978_v19, %v769_v18 }
 0x152   : > { %v1684_v10 = vld [vmem:[#allocation2 + $0x78] sm:$0xff] }
 0x153   : > { %v1867_v11 = vpop.xlane.xlu0 %1866  ;;  %1618 = vst.msk [vmem:[#allocation2 + $0x80] sm:$0xff] %vm252_vm0, %v1553_v9  ;;  %v1748_v12 = vmax.f32 %v1684_v10, 0.0 }
 0x154   : > { %v2121_v13 = vperm.slane %v1867_v11, 0  ;;  %v2122_v14 = vperm.slane %v1867_v11, 1  ;;  %v2123_v15 = vperm.slane %v1867_v11, 2  ;;  %v2124_v16 = vperm.slane %v1867_v11, 3  ;;  %v1187_v27 = vpop.f32.mrf.mxu2  ;;  %v1396_v31 = vpop.f32.mrf.mxu3 }
 0x155   : > { %v2125_v17 = vperm.slane %v1867_v11, 4  ;;  %v1816_v20 = vmul.f32 %v4459_v28, %v1748_v12  ;;  %v2126_v21 = vperm.slane %v1867_v11, 5  ;;  %v2127_v24 = vperm.slane %v1867_v11, 6 }
 0x156   : > { %2633 = vst [vmem:[#allocation1] ss:$9 sm:$0xff] %v2121_v13  ;;  %v2128_v26 = vperm.slane %v1867_v11, 7  ;;  %v1188_v29 = vadd.f32 %v1187_v27, %v979_v22 }
 0x157   : > { %2635 = vst [vmem:[#allocation1 + $0x1] ss:$9 sm:$0xff] %v2122_v14  ;;  %v1910_v25 = vsel %vm252_vm0, %v1816_v20, 0.0 }
 0x158   : > { %2637 = vst [vmem:[#allocation1 + $0x2] ss:$9 sm:$0xff] %v2123_v15  ;;  %1911 = vadd.xlane.f32.xlu0 %v1910_v25  ;;  %v1397_v32 = vadd.f32 %v1396_v31, %v1188_v29  ;;  %v772_v35 = vpop.f32.mrf.mxu0  ;;  %v981_v36 = vpop.f32.mrf.mxu1  ;;  %v432_v29 = vld [vmem:[%s4084_s10 + $0x398] sm:$0xff] }
 0x159   : > { %2639 = vst [vmem:[#allocation1 + $0x3] ss:$9 sm:$0xff] %v2124_v16  ;;  %v982_v37 = vadd.f32 %v981_v36, %v772_v35  ;;  %1428 = vmatmul.f32.gmra.mxu3 %v432_v29 }
 0x15a   : > { %2641 = vst [vmem:[#allocation1 + $0x4] ss:$9 sm:$0xff] %v2125_v17  ;;  %v1554_v33 = vadd.f32 %v1397_v32, %v654_v30  ;;  %v429_v32 = vld [vmem:[%s4084_s10 + $0x380] sm:$0xff] }
 0x15b   : > { %2643 = vst [vmem:[#allocation1 + $0x5] ss:$9 sm:$0xff] %v2126_v21  ;;  %v1870_v38 = vpop.xlane.xlu0 %1869  ;;  %801 = vmatmul.f32.gmra.mxu0 %v429_v32 }
 0x15c   : > { %2645 = vst [vmem:[#allocation1 + $0x6] ss:$9 sm:$0xff] %v2127_v24  ;;  %v1190_v39 = vpop.f32.mrf.mxu2  ;;  %v2129_v40 = vperm.slane %v1870_v38, 0  ;;  %v2130_v41 = vperm.slane %v1870_v38, 1  ;;  %v2131_v42 = vperm.slane %v1870_v38, 2  ;;  %v2132_v44 = vperm.slane %v1870_v38, 3  ;;  %v1399_v48 = vpop.f32.mrf.mxu3 }
 0x15d   : > { %2647 = vst [vmem:[#allocation1 + $0x7] ss:$9 sm:$0xff] %v2128_v26  ;;  %v1191_v43 = vadd.f32 %v1190_v39, %v982_v37  ;;  %v2133_v45 = vperm.slane %v1870_v38, 4  ;;  %v2134_v46 = vperm.slane %v1870_v38, 5  ;;  %v2135_v49 = vperm.slane %v1870_v38, 6  ;;  %v431_v26 = vld [vmem:[%s4084_s10 + $0x390] sm:$0xff] }
 0x15e   : > { %1619 = vst.msk [vmem:[#allocation2 + $0x88] sm:$0xff] %vm252_vm0, %v1554_v33  ;;  %v2136_v51 = vperm.slane %v1870_v38, 7  ;;  %1219 = vmatmul.f32.gmra.mxu2 %v431_v26  ;;  %v430_v33 = vld [vmem:[%s4084_s10 + $0x388] sm:$0xff] }
 0x15f   : > { %v1400_v50 = vadd.f32 %v1399_v48, %v1191_v43  ;;  %1010 = vmatmul.f32.gmra.mxu1 %v430_v33 }
 0x160   : > { %v775_v54 = vpop.f32.mrf.mxu0  ;;  %v984_v55 = vpop.f32.mrf.mxu1 }
 0x161   : > { %v1555_v53 = vadd.f32 %v1400_v50, %v655_v47  ;;  %v985_v57 = vadd.f32 %v984_v55, %v775_v54  ;;  %v658_v47 = vld [vmem:[#allocation2 + $0xa8] sm:$0xff]  ;;  %v435_v50 = vld [vmem:[%s4084_s10 + $0x3b0] sm:$0xff] }
 0x163   : > { %v1873_v56 = vpop.xlane.xlu1 %1872  ;;  %1620 = vst.msk [vmem:[#allocation2 + $0x90] sm:$0xff] %vm252_vm0, %v1555_v53  ;;  %v436_v53 = vld [vmem:[%s4084_s10 + $0x3b8] sm:$0xff] }
 0x164   : > { %v2648_v34 = vld [vmem:[#allocation1] sm:$0xff]  ;;  %v2137_v58 = vperm.slane %v1873_v56, 0  ;;  %v1193_v59 = vpop.f32.mrf.mxu2  ;;  %v2138_v60 = vperm.slane %v1873_v56, 1  ;;  %v2139_v62 = vperm.slane %v1873_v56, 2  ;;  %v2140_v0 = vperm.slane %v1873_v56, 3  ;;  %v1402_v1 = vpop.f32.mrf.mxu3  ;;  %1431 = vmatmul.f32.gmra.mxu3 %v436_v53 }
 0x165   : > { %3217 = vperm.xlu1 %3798, %v2648_v34   ;;  %2649 = vst [vmem:[#allocation1] ss:$9 sm:$0xff] %v2129_v40  ;;  %v1194_v61 = vadd.f32 %v1193_v59, %v985_v57  ;;  %v2141_v2 = vperm.slane %v1873_v56, 4  ;;  %v2142_v4 = vperm.slane %v1873_v56, 5  ;;  %v2143_v6 = vperm.slane %v1873_v56, 6  ;;  %v434_v57 = vld [vmem:[%s4084_s10 + $0x3a8] sm:$0xff] }
 0x166   : > { %2650 = vst [vmem:[#allocation1 + $0x1] ss:$9 sm:$0xff] %v2130_v41  ;;  %v2144_v52 = vperm.slane %v1873_v56, 7  ;;  %1222 = vmatmul.f32.gmra.mxu2 %v435_v50  ;;  %v433_v56 = vld [vmem:[%s4084_s10 + $0x3a0] sm:$0xff] }
 0x167   : > { %2651 = vst [vmem:[#allocation1 + $0x2] ss:$9 sm:$0xff] %v2131_v42  ;;  %v1403_v3 = vadd.f32 %v1402_v1, %v1194_v61  ;;  %804 = vmatmul.f32.gmra.mxu0 %v433_v56  ;;  %1013 = vmatmul.f32.gmra.mxu1 %v434_v57 }
 0x168   : > { %2652 = vst [vmem:[#allocation1 + $0x3] ss:$9 sm:$0xff] %v2132_v44  ;;  %v778_v8 = vpop.f32.mrf.mxu0  ;;  %v987_v9 = vpop.f32.mrf.mxu1 }
 0x169   : > { %2653 = vst [vmem:[#allocation1 + $0x4] ss:$9 sm:$0xff] %v2133_v45  ;;  %v1556_v7 = vadd.f32 %v1403_v3, %v656_v5  ;;  %v988_v11 = vadd.f32 %v987_v9, %v778_v8 }
 0x16a   : > { %2654 = vst [vmem:[#allocation1 + $0x5] ss:$9 sm:$0xff] %v2134_v46 }
 0x16b   : > { %2655 = vst [vmem:[#allocation1 + $0x6] ss:$9 sm:$0xff] %v2135_v49  ;;  %v1876_v10 = vpop.xlane.xlu1 %1875 }
 0x16c   : > { %2656 = vst [vmem:[#allocation1 + $0x7] ss:$9 sm:$0xff] %v2136_v51  ;;  %v2145_v12 = vperm.slane %v1876_v10, 0  ;;  %v1196_v13 = vpop.f32.mrf.mxu2  ;;  %v2146_v14 = vperm.slane %v1876_v10, 1  ;;  %v2147_v16 = vperm.slane %v1876_v10, 2  ;;  %v2148_v18 = vperm.slane %v1876_v10, 3  ;;  %v1405_v19 = vpop.f32.mrf.mxu3 }
 0x16d   : > { %1621 = vst.msk [vmem:[#allocation2 + $0x98] sm:$0xff] %vm252_vm0, %v1556_v7  ;;  %v1197_v15 = vadd.f32 %v1196_v13, %v988_v11  ;;  %v2149_v20 = vperm.slane %v1876_v10, 4  ;;  %v2150_v22 = vperm.slane %v1876_v10, 5  ;;  %v2151_v24 = vperm.slane %v1876_v10, 6 }
 0x16e   : > { %v2152_v25 = vperm.slane %v1876_v10, 7  ;;  %v659_v10 = vld [vmem:[#allocation2 + $0xb0] sm:$0xff] }
 0x16f   : > { %v1406_v21 = vadd.f32 %v1405_v19, %v1197_v15  ;;  %v439_v15 = vld [vmem:[%s4084_s10 + $0x3d0] sm:$0xff]  ;;  %v4598_v19 = vld [vmem:[#allocation6] ss:$0 sm:$0xff] }
 0x170   : > { %v781_v30 = vpop.f32.mrf.mxu0  ;;  %v990_v31 = vpop.f32.mrf.mxu1  ;;  %1225 = vmatmul.f32.gmra.mxu2 %v439_v15 }
 0x171   : > { %v1557_v27 = vadd.f32 %v1406_v21, %v657_v23  ;;  %v991_v35 = vadd.f32 %v990_v31, %v781_v30  ;;  %v437_v21 = vld [vmem:[%s4084_s10 + $0x3c0] sm:$0xff] }
 0x172   : > { %807 = vmatmul.f32.gmra.mxu0 %v437_v21 }
 0x173   : > { %v2657_v63 = vld [vmem:[#allocation1] sm:$0xff]  ;;  %v1879_v34 = vpop.xlane.xlu2 %1878  ;;  %1622 = vst.msk [vmem:[#allocation2 + $0xa0] sm:$0xff] %vm252_vm0, %v1557_v27 }
 0x174   : > { %2658 = vst [vmem:[#allocation1] ss:$9 sm:$0xff] %v2137_v58  ;;  %3220 = vperm.xlu2 %3799, %v2657_v63   ;;  %v2153_v36 = vperm.slane %v1879_v34, 0  ;;  %v1199_v37 = vpop.f32.mrf.mxu2  ;;  %v2154_v38 = vperm.slane %v1879_v34, 1  ;;  %v2155_v40 = vperm.slane %v1879_v34, 2  ;;  %v2156_v42 = vperm.slane %v1879_v34, 3  ;;  %v1408_v43 = vpop.f32.mrf.mxu3 }
 0x175   : > { %2659 = vst [vmem:[#allocation1 + $0x1] ss:$9 sm:$0xff] %v2138_v60  ;;  %v1200_v39 = vadd.f32 %v1199_v37, %v991_v35  ;;  %v2157_v44 = vperm.slane %v1879_v34, 4  ;;  %v2158_v46 = vperm.slane %v1879_v34, 5  ;;  %v2159_v48 = vperm.slane %v1879_v34, 6  ;;  %v1685_v60 = vld [vmem:[#allocation2 + $0x80] sm:$0xff] }
 0x176   : > { %2660 = vst [vmem:[#allocation1 + $0x2] ss:$9 sm:$0xff] %v2139_v62  ;;  %v2160_v49 = vperm.slane %v1879_v34, 7  ;;  %v1749_v61 = vmax.f32 %v1685_v60, 0.0  ;;  %v1688_v30 = vld [vmem:[#allocation2 + $0x98] sm:$0xff] }
 0x177   : > { %2661 = vst [vmem:[#allocation1 + $0x3] ss:$9 sm:$0xff] %v2140_v0  ;;  %v1409_v45 = vadd.f32 %v1408_v43, %v1200_v39 }
 0x178   : > { %2662 = vst [vmem:[#allocation1 + $0x4] ss:$9 sm:$0xff] %v2141_v2  ;;  %v784_v54 = vpop.f32.mrf.mxu0  ;;  %v993_v55 = vpop.f32.mrf.mxu1  ;;  %v1817_v3 = vmul.f32 %v4459_v28, %v1749_v61  ;;  %v1686_v28 = vld [vmem:[#allocation2 + $0x88] sm:$0xff] }
 0x179   : > { %2663 = vst [vmem:[#allocation1 + $0x5] ss:$9 sm:$0xff] %v2142_v4  ;;  %v1558_v51 = vadd.f32 %v1409_v45, %v658_v47  ;;  %v994_v59 = vadd.f32 %v993_v55, %v784_v54  ;;  %v660_v45 = vld [vmem:[#allocation2 + $0xb8] sm:$0xff] }
 0x17a   : > { %2664 = vst [vmem:[#allocation1 + $0x6] ss:$9 sm:$0xff] %v2143_v6  ;;  %v1913_v8 = vsel %vm252_vm0, %v1817_v3, 0.0 }
 0x17b   : > { %2665 = vst [vmem:[#allocation1 + $0x7] ss:$9 sm:$0xff] %v2144_v52  ;;  %v1882_v58 = vpop.xlane.xlu2 %1881 }
 0x17c   : > { %1623 = vst.msk [vmem:[#allocation2 + $0xa8] sm:$0xff] %vm252_vm0, %v1558_v51  ;;  %v2161_v62 = vperm.slane %v1882_v58, 0  ;;  %v1202_v63 = vpop.f32.mrf.mxu2  ;;  %v2162_v0 = vperm.slane %v1882_v58, 1  ;;  %v2163_v2 = vperm.slane %v1882_v58, 2  ;;  %v2164_v5 = vperm.slane %v1882_v58, 3  ;;  %v1411_v6 = vpop.f32.mrf.mxu3 }
 0x17d   : > { %v1203_v1 = vadd.f32 %v1202_v63, %v994_v59  ;;  %v2165_v52 = vperm.slane %v1882_v58, 4  ;;  %v2166_v9 = vperm.slane %v1882_v58, 5  ;;  %v2167_v11 = vperm.slane %v1882_v58, 6  ;;  %v661_v59 = vld [vmem:[#allocation2 + $0xc0] sm:$0xff] }
 0x17f   : > { %v1412_v7 = vadd.f32 %v1411_v6, %v1203_v1 }
 0x180   : > { %v996_v13 = vpop.f32.mrf.mxu1 }
 0x182   : > { %v2666_v17 = vld [vmem:[#allocation1] sm:$0xff] }
 0x183   : > { %2667 = vst [vmem:[#allocation1] ss:$9 sm:$0xff] %v2145_v12  ;;  %3223 = vperm.xlu0 %3800, %v2666_v17   ;;  %v787_v12 = vpop.f32.mrf.mxu0  ;;  %v1559_v17 = vadd.f32 %v1412_v7, %v659_v10  ;;  %v1690_v6 = vld [vmem:[#allocation2 + $0xa8] sm:$0xff] }
 0x184   : > { %2668 = vst [vmem:[#allocation1 + $0x1] ss:$9 sm:$0xff] %v2146_v14  ;;  %v2168_v14 = vperm.slane %v1882_v58, 7  ;;  %v1205_v26 = vpop.f32.mrf.mxu2  ;;  %v1414_v27 = vpop.f32.mrf.mxu3  ;;  %v1754_v7 = vmax.f32 %v1690_v6, 0.0 }
 0x185   : > { %2669 = vst [vmem:[#allocation1 + $0x2] ss:$9 sm:$0xff] %v2147_v16  ;;  %v1750_v16 = vmax.f32 %v1686_v28, 0.0 }
 0x186   : > { %2670 = vst [vmem:[#allocation1 + $0x3] ss:$9 sm:$0xff] %v2148_v18  ;;  %v440_v18 = vld [vmem:[%s4084_s10 + $0x3d8] sm:$0xff] }
 0x187   : > { %2671 = vst [vmem:[#allocation1 + $0x4] ss:$9 sm:$0xff] %v2149_v20  ;;  %v1818_v20 = vmul.f32 %v4598_v19, %v1750_v16  ;;  %1434 = vmatmul.f32.gmra.mxu3 %v440_v18 }
 0x188   : > { %2672 = vst [vmem:[#allocation1 + $0x5] ss:$9 sm:$0xff] %v2150_v22  ;;  %v438_v22 = vld [vmem:[%s4084_s10 + $0x3c8] sm:$0xff]  ;;  %v999_v34 = vpop.f32.mrf.mxu1 }
 0x189   : > { %2673 = vst [vmem:[#allocation1 + $0x6] ss:$9 sm:$0xff] %v2151_v24  ;;  %v1916_v23 = vsel %vm252_vm0, %v1818_v20, 0.0  ;;  %v1885_v24 = vpop.xlane.xlu0 %1884  ;;  %1016 = vmatmul.f32.gmra.mxu1 %v438_v22 }
 0x18a   : > { %2674 = vst [vmem:[#allocation1 + $0x7] ss:$9 sm:$0xff] %v2152_v25  ;;  %v997_v25 = vadd.f32 %v996_v13, %v787_v12  ;;  %v2169_v29 = vperm.slane %v1885_v24, 0  ;;  %v2170_v31 = vperm.slane %v1885_v24, 1  ;;  %v2171_v35 = vperm.slane %v1885_v24, 2 }
 0x18b   : > { %1624 = vst.msk [vmem:[#allocation2 + $0xb0] sm:$0xff] %vm252_vm0, %v1559_v17  ;;  %v790_v33 = vpop.f32.mrf.mxu0  ;;  %v2173_v39 = vperm.slane %v1885_v24, 4  ;;  %v2175_v47 = vperm.slane %v1885_v24, 6  ;;  %v2176_v50 = vperm.slane %v1885_v24, 7  ;;  %v1888_v60 = vpop.xlane.xlu1 %1887 }
 0x18c   : > { %v1206_v32 = vadd.f32 %v1205_v26, %v997_v25  ;;  %v1208_v51 = vpop.f32.mrf.mxu2  ;;  %v1417_v56 = vpop.f32.mrf.mxu3  ;;  %v2178_v63 = vperm.slane %v1888_v60, 1  ;;  %v2181_v3 = vperm.slane %v1888_v60, 4 }
 0x18f   : > { %1914 = vadd.xlane.f32.xlu1 %v1913_v8  ;;  %v2184_v8 = vperm.slane %v1888_v60, 7 }
 0x191   : > { %v4585_v41 = vld [vmem:[#allocation1] sm:$0xff] }
 0x192   : > { %2676 = vst [vmem:[#allocation1] ss:$9 sm:$0xff] %v2153_v36  ;;  %v1752_v36 = vmax.f32 %v1688_v30, 0.0 }
 0x193   : > { %2677 = vst [vmem:[#allocation1 + $0x1] ss:$9 sm:$0xff] %v2154_v38  ;;  %v2172_v38 = vperm.slane %v1885_v24, 3 }
 0x194   : > { %2678 = vst [vmem:[#allocation1 + $0x2] ss:$9 sm:$0xff] %v2155_v40  ;;  %v1415_v40 = vadd.f32 %v1414_v27, %v1206_v32  ;;  %v1820_v43 = vmul.f32 %v4598_v19, %v1752_v36 }
 0x195   : > { %2679 = vst [vmem:[#allocation1 + $0x3] ss:$9 sm:$0xff] %v2156_v42  ;;  %v1000_v42 = vadd.f32 %v999_v34, %v790_v33 }
 0x196   : > { %2680 = vst [vmem:[#allocation1 + $0x4] ss:$9 sm:$0xff] %v2157_v44  ;;  %v2174_v44 = vperm.slane %v1885_v24, 5  ;;  %v1560_v53 = vadd.f32 %v1415_v40, %v660_v45 }
 0x197   : > { %2681 = vst [vmem:[#allocation1 + $0x5] ss:$9 sm:$0xff] %v2158_v46  ;;  %v1687_v46 = vld [vmem:[#allocation2 + $0x90] sm:$0xff]  ;;  %v1209_v54 = vadd.f32 %v1208_v51, %v1000_v42 }
 0x198   : > { %2682 = vst [vmem:[#allocation1 + $0x6] ss:$9 sm:$0xff] %v2159_v48  ;;  %v1922_v48 = vsel %vm252_vm0, %v1820_v43, 0.0 }
 0x199   : > { %2683 = vst [vmem:[#allocation1 + $0x7] ss:$9 sm:$0xff] %v2160_v49  ;;  %v1751_v49 = vmax.f32 %v1687_v46, 0.0  ;;  %1923 = vadd.xlane.f32.xlu1 %v1922_v48  ;;  %v1418_v57 = vadd.f32 %v1417_v56, %v1209_v54 }
 0x19a   : > { %1625 = vst.msk [vmem:[#allocation2 + $0xb8] sm:$0xff] %vm252_vm0, %v1560_v53 }
 0x19b   : > { %v1819_v55 = vmul.f32 %v4598_v19, %v1751_v49  ;;  %v1561_v61 = vadd.f32 %v1418_v57, %v661_v59  ;;  %v441_v59 = vld [vmem:[%s4084_s10 + $0x3e0] sm:$0xff] }
 0x19c   : > { %810 = vmatmul.f32.gmra.mxu0 %v441_v59 }
 0x19d   : > { %1917 = vadd.xlane.f32.xlu2 %v1916_v23  ;;  %v1919_v58 = vsel %vm252_vm0, %v1819_v55, 0.0  ;;  %1626 = vst.msk [vmem:[#allocation2 + $0xc0] sm:$0xff] %vm252_vm0, %v1561_v61  ;;  %v1894_v23 = vpop.xlane.xlu0 %1893 }
 0x19e   : > { %v2193_v24 = vperm.slane %v1894_v23, 0  ;;  %v2194_v25 = vperm.slane %v1894_v23, 1  ;;  %v2195_v26 = vperm.slane %v1894_v23, 2  ;;  %v2197_v30 = vperm.slane %v1894_v23, 4 }
 0x19f   : > { %v2199_v32 = vperm.slane %v1894_v23, 6  ;;  %v2200_v33 = vperm.slane %v1894_v23, 7 }
 0x1a0   : > { %v4593_v4 = vld [vmem:[#allocation1] sm:$0xff] }
 0x1a1   : > { %2685 = vst [vmem:[#allocation1] ss:$9 sm:$0xff] %v2161_v62  ;;  %v2177_v62 = vperm.slane %v1888_v60, 0 }
 0x1a2   : > { %2686 = vst [vmem:[#allocation1 + $0x1] ss:$9 sm:$0xff] %v2162_v0  ;;  %v2179_v0 = vperm.slane %v1888_v60, 2 }
 0x1a3   : > { %2687 = vst [vmem:[#allocation1 + $0x2] ss:$9 sm:$0xff] %v2163_v2  ;;  %v2180_v2 = vperm.slane %v1888_v60, 3  ;;  %v1897_v34 = vpop.xlane.xlu1 %1896 }
 0x1a4   : > { %2688 = vst [vmem:[#allocation1 + $0x3] ss:$9 sm:$0xff] %v2164_v5  ;;  %v2182_v5 = vperm.slane %v1888_v60, 5  ;;  %v1693_v17 = vld [vmem:[#allocation2 + $0xc0] sm:$0xff]  ;;  %v2202_v36 = vperm.slane %v1897_v34, 1  ;;  %v2204_v40 = vperm.slane %v1897_v34, 3 }
 0x1a5   : > { %2689 = vst [vmem:[#allocation1 + $0x4] ss:$9 sm:$0xff] %v2165_v52  ;;  %v2183_v52 = vperm.slane %v1888_v60, 6  ;;  %v1757_v20 = vmax.f32 %v1693_v17, 0.0  ;;  %v2205_v42 = vperm.slane %v1897_v34, 4  ;;  %v2206_v43 = vperm.slane %v1897_v34, 5 }
 0x1a6   : > { %2690 = vst [vmem:[#allocation1 + $0x5] ss:$9 sm:$0xff] %v2166_v9  ;;  %v1822_v9 = vmul.f32 %v4598_v19, %v1754_v7  ;;  %v2208_v45 = vperm.slane %v1897_v34, 7  ;;  %v442_v60 = vld [vmem:[%s4084_s10 + $0x3e8] sm:$0xff] }
 0x1a7   : > { %2691 = vst [vmem:[#allocation1 + $0x6] ss:$9 sm:$0xff] %v2167_v11  ;;  %v1891_v11 = vpop.xlane.xlu2 %1890  ;;  %v1825_v22 = vmul.f32 %v4598_v19, %v1757_v20  ;;  %1019 = vmatmul.f32.gmra.mxu1 %v442_v60  ;;  %v663_v60 = vld [vmem:[#allocation2 + $0xd0] sm:$0xff] }
 0x1a8   : > { %2692 = vst [vmem:[#allocation1 + $0x7] ss:$9 sm:$0xff] %v2168_v14  ;;  %v1928_v10 = vsel %vm252_vm0, %v1822_v9, 0.0  ;;  %v2185_v12 = vperm.slane %v1891_v11, 0  ;;  %v2186_v13 = vperm.slane %v1891_v11, 1  ;;  %v2187_v28 = vperm.slane %v1891_v11, 2 }
 0x1a9   : > { %v2188_v15 = vperm.slane %v1891_v11, 3  ;;  %v2189_v16 = vperm.slane %v1891_v11, 4  ;;  %v2191_v18 = vperm.slane %v1891_v11, 6  ;;  %v2192_v21 = vperm.slane %v1891_v11, 7 }
 0x1ad   : > { %1920 = vadd.xlane.f32.xlu0 %v1919_v58  ;;  %v444_v58 = vld [vmem:[%s4084_s10 + $0x3f8] sm:$0xff] }
 0x1ae   : > { %1437 = vmatmul.f32.gmra.mxu3 %v444_v58 }
 0x1af   : > { %v4605_v37 = vld [vmem:[#allocation1] sm:$0xff]  ;;  %v1900_v46 = vpop.xlane.xlu2 %1899 }
 0x1b0   : > { %2694 = vst [vmem:[#allocation1] ss:$9 sm:$0xff] %v2169_v29  ;;  %v2196_v29 = vperm.slane %v1894_v23, 3  ;;  %v2209_v48 = vperm.slane %v1900_v46, 0  ;;  %v2210_v49 = vperm.slane %v1900_v46, 1  ;;  %v2212_v53 = vperm.slane %v1900_v46, 3 }
 0x1b1   : > { %2695 = vst [vmem:[#allocation1 + $0x1] ss:$9 sm:$0xff] %v2170_v31  ;;  %v2198_v31 = vperm.slane %v1894_v23, 5  ;;  %v2213_v54 = vperm.slane %v1900_v46, 4  ;;  %v2214_v55 = vperm.slane %v1900_v46, 5  ;;  %v2215_v56 = vperm.slane %v1900_v46, 6 }
 0x1b2   : > { %2696 = vst [vmem:[#allocation1 + $0x2] ss:$9 sm:$0xff] %v2171_v35  ;;  %3229 = vperm.xlu1 %3798, %v4593_v4   ;;  %v1937_v4 = vsel %vm252_vm0, %v1825_v22, 0.0  ;;  %v2201_v35 = vperm.slane %v1897_v34, 0  ;;  %v2216_v57 = vperm.slane %v1900_v46, 7 }
 0x1b3   : > { %2697 = vst [vmem:[#allocation1 + $0x3] ss:$9 sm:$0xff] %v2172_v38  ;;  %v2203_v38 = vperm.slane %v1897_v34, 2  ;;  %v1903_v61 = vpop.xlane.xlu0 %1902 }
 0x1b4   : > { %2698 = vst [vmem:[#allocation1 + $0x4] ss:$9 sm:$0xff] %v2173_v39  ;;  %v2220_v6 = vperm.slane %v1903_v61, 3  ;;  %v2221_v7 = vperm.slane %v1903_v61, 4  ;;  %v2222_v9 = vperm.slane %v1903_v61, 5 }
 0x1b5   : > { %2699 = vst [vmem:[#allocation1 + $0x5] ss:$9 sm:$0xff] %v2174_v44  ;;  %3226 = vperm.xlu2 %3799, %v4585_v41   ;;  %1929 = vadd.xlane.f32.xlu0 %v1928_v10  ;;  %v2190_v41 = vperm.slane %v1891_v11, 5  ;;  %v2207_v44 = vperm.slane %v1897_v34, 6  ;;  %v2223_v10 = vperm.slane %v1903_v61, 6  ;;  %v2224_v11 = vperm.slane %v1903_v61, 7 }
 0x1b6   : > { %2700 = vst [vmem:[#allocation1 + $0x6] ss:$9 sm:$0xff] %v2175_v47  ;;  %v443_v47 = vld [vmem:[%s4084_s10 + $0x3f0] sm:$0xff]  ;;  %v449_v34 = vld [vmem:[%s4084_s10 + $0x420] sm:$0xff] }
 0x1b7   : > { %2701 = vst [vmem:[#allocation1 + $0x7] ss:$9 sm:$0xff] %v2176_v50  ;;  %1228 = vmatmul.f32.gmra.mxu2 %v443_v47  ;;  %v2211_v50 = vperm.slane %v1900_v46, 2 }
 0x1bd   : > { %1938 = vadd.xlane.f32.xlu0 %v1937_v4  ;;  %v451_v4 = vld [vmem:[%s4084_s10 + $0x430] sm:$0xff] }
 0x1be   : > { %v2702_v1 = vld [vmem:[#allocation1] sm:$0xff] }
 0x1bf   : > { %2703 = vst [vmem:[#allocation1] ss:$9 sm:$0xff] %v2177_v62  ;;  %3235 = vperm.xlu1 %3798, %v2702_v1   ;;  %v447_v62 = vld [vmem:[%s4084_s10 + $0x410] sm:$0xff]  ;;  %v793_v1 = vpop.f32.mrf.mxu0 }
 0x1c0   : > { %2704 = vst [vmem:[#allocation1 + $0x1] ss:$9 sm:$0xff] %v2178_v63  ;;  %1231 = vmatmul.f32.gmra.mxu2 %v447_v62  ;;  %v2217_v63 = vperm.slane %v1903_v61, 0 }
 0x1c1   : > { %2705 = vst [vmem:[#allocation1 + $0x2] ss:$9 sm:$0xff] %v2179_v0  ;;  %v2218_v0 = vperm.slane %v1903_v61, 1 }
 0x1c2   : > { %2706 = vst [vmem:[#allocation1 + $0x3] ss:$9 sm:$0xff] %v2180_v2  ;;  %v1002_v2 = vpop.f32.mrf.mxu1 }
 0x1c3   : > { %2707 = vst [vmem:[#allocation1 + $0x4] ss:$9 sm:$0xff] %v2181_v3  ;;  %v2219_v3 = vperm.slane %v1903_v61, 2  ;;  %v1003_v17 = vadd.f32 %v1002_v2, %v793_v1  ;;  %v664_v2 = vld [vmem:[#allocation2 + $0xd8] sm:$0xff] }
 0x1c4   : > { %2708 = vst [vmem:[#allocation1 + $0x5] ss:$9 sm:$0xff] %v2182_v5 }
 0x1c5   : > { %2709 = vst [vmem:[#allocation1 + $0x6] ss:$9 sm:$0xff] %v2183_v52  ;;  %v1211_v52 = vpop.f32.mrf.mxu2 }
 0x1c6   : > { %2710 = vst [vmem:[#allocation1 + $0x7] ss:$9 sm:$0xff] %v2184_v8  ;;  %v4632_v8 = vpop.xlane.xlu2 %1908 }
 0x1c8   : > { %1234 = vmatmul.f32.gmra.mxu2 %v451_v4  ;;  %v454_v4 = vld [vmem:[%s4084_s10 + $0x448] sm:$0xff] }
 0x1ca   : > { %v1005_v20 = vpop.f32.mrf.mxu1 }
 0x1cb   : > { %v4663_v62 = vpop.xlane.xlu0 %1911 }
 0x1cd   : > { %v4617_v14 = vld [vmem:[#allocation1] sm:$0xff]  ;;  %v1214_v22 = vpop.f32.mrf.mxu2 }
 0x1ce   : > { %2712 = vst [vmem:[#allocation1] ss:$9 sm:$0xff] %v2185_v12  ;;  %v1420_v12 = vpop.f32.mrf.mxu3 }
 0x1cf   : > { %2713 = vst [vmem:[#allocation1 + $0x1] ss:$9 sm:$0xff] %v2186_v13  ;;  %v448_v13 = vld [vmem:[%s4084_s10 + $0x418] sm:$0xff] }
 0x1d0   : > { %2714 = vst [vmem:[#allocation1 + $0x2] ss:$9 sm:$0xff] %v2187_v28  ;;  %v4635_v28 = vpop.xlane.xlu1 %1905  ;;  %1440 = vmatmul.f32.gmra.mxu3 %v448_v13  ;;  %v2234_v13 = vperm.slane %v4632_v8, 1 }
 0x1d1   : > { %2715 = vst [vmem:[#allocation1 + $0x3] ss:$9 sm:$0xff] %v2188_v15  ;;  %v445_v15 = vld [vmem:[%s4084_s10 + $0x400] sm:$0xff]  ;;  %v2229_v47 = vperm.slane %v4635_v28, 4  ;;  %v2231_v59 = vperm.slane %v4635_v28, 6 }
 0x1d2   : > { %2716 = vst [vmem:[#allocation1 + $0x4] ss:$9 sm:$0xff] %v2189_v16  ;;  %v446_v16 = vld [vmem:[%s4084_s10 + $0x408] sm:$0xff]  ;;  %813 = vmatmul.f32.gmra.mxu0 %v445_v15 }
 0x1d3   : > { %2717 = vst [vmem:[#allocation1 + $0x5] ss:$9 sm:$0xff] %v2190_v41  ;;  %v3408_v41 = vlaneseq  ;;  %1022 = vmatmul.f32.gmra.mxu1 %v446_v16  ;;  %v455_v16 = vld [vmem:[%s4084_s10 + $0x450] sm:$0xff] }
 0x1d4   : > { %2718 = vst [vmem:[#allocation1 + $0x6] ss:$9 sm:$0xff] %v2191_v18  ;;  %v796_v18 = vpop.f32.mrf.mxu0  ;;  %1237 = vmatmul.f32.gmra.mxu2 %v455_v16 }
 0x1d5   : > { %2719 = vst [vmem:[#allocation1 + $0x7] ss:$9 sm:$0xff] %v2192_v21  ;;  %v4640_v21 = vand.u32 127, %v3408_v41  ;;  %v1217_v61 = vpop.f32.mrf.mxu2 }
 0x1d7   : > { %v4644_v23 = vadd.s32 4294967288, %v4640_v21 }
 0x1da   : > { %816 = vmatmul.f32.gmra.mxu0 %v449_v34  ;;  %v2240_v34 = vperm.slane %v4632_v8, 7 }
 0x1dc   : > { %v4621_v27 = vld [vmem:[#allocation1] sm:$0xff] }
 0x1dd   : > { %2721 = vst [vmem:[#allocation1] ss:$9 sm:$0xff] %v2193_v24  ;;  %v3221_v24 = vpop.permute.xlu2 %3220 }
 0x1de   : > { %2722 = vst [vmem:[#allocation1 + $0x1] ss:$9 sm:$0xff] %v2194_v25  ;;  %v2225_v25 = vperm.slane %v4635_v28, 0 }
 0x1df   : > { %2723 = vst [vmem:[#allocation1 + $0x2] ss:$9 sm:$0xff] %v2195_v26  ;;  %v1212_v26 = vadd.f32 %v1211_v52, %v1003_v17  ;;  %v456_v17 = vld [vmem:[%s4084_s10 + $0x458] sm:$0xff] }
 0x1e0   : > { %2724 = vst [vmem:[#allocation1 + $0x3] ss:$9 sm:$0xff] %v2196_v29  ;;  %v1423_v29 = vpop.f32.mrf.mxu3 }
 0x1e1   : > { %2725 = vst [vmem:[#allocation1 + $0x4] ss:$9 sm:$0xff] %v2197_v30  ;;  %v452_v30 = vld [vmem:[%s4084_s10 + $0x438] sm:$0xff] }
 0x1e2   : > { %2726 = vst [vmem:[#allocation1 + $0x5] ss:$9 sm:$0xff] %v2198_v31  ;;  %v1689_v31 = vld [vmem:[#allocation2 + $0xa0] sm:$0xff]  ;;  %1443 = vmatmul.f32.gmra.mxu3 %v452_v30  ;;  %v2238_v30 = vperm.slane %v4632_v8, 5 }
 0x1e3   : > { %2727 = vst [vmem:[#allocation1 + $0x6] ss:$9 sm:$0xff] %v2199_v32  ;;  %v2226_v32 = vperm.slane %v4635_v28, 1 }
 0x1e4   : > { %2728 = vst [vmem:[#allocation1 + $0x7] ss:$9 sm:$0xff] %v2200_v33  ;;  %v1006_v33 = vadd.f32 %v1005_v20, %v796_v18  ;;  %v453_v18 = vld [vmem:[%s4084_s10 + $0x440] sm:$0xff]  ;;  %v2235_v20 = vperm.slane %v4632_v8, 2 }
 0x1e5   : > { %819 = vmatmul.f32.gmra.mxu0 %v453_v18 }
 0x1ea   : > { %1446 = vmatmul.f32.gmra.mxu3 %v456_v17 }
 0x1eb   : > { %v2729_v39 = vld [vmem:[#allocation1] sm:$0xff] }
 0x1ec   : > { %2730 = vst [vmem:[#allocation1] ss:$9 sm:$0xff] %v2201_v35  ;;  %3244 = vperm.xlu0 %3800, %v2729_v39   ;;  %v1753_v35 = vmax.f32 %v1689_v31, 0.0  ;;  %v3412_v39 = vperm.slane %v3221_v24, %v4644_v23 }
 0x1ed   : > { %2731 = vst [vmem:[#allocation1 + $0x1] ss:$9 sm:$0xff] %v2202_v36  ;;  %v3218_v36 = vpop.permute.xlu1 %3217 }
 0x1ee   : > { %2732 = vst [vmem:[#allocation1 + $0x2] ss:$9 sm:$0xff] %v2203_v38  ;;  %v2227_v38 = vperm.slane %v4635_v28, 2  ;;  %v1821_v46 = vmul.f32 %v4598_v19, %v1753_v35 }
 0x1ef   : > { %2733 = vst [vmem:[#allocation1 + $0x3] ss:$9 sm:$0xff] %v2204_v40  ;;  %v450_v40 = vld [vmem:[%s4084_s10 + $0x428] sm:$0xff] }
 0x1f0   : > { %2734 = vst [vmem:[#allocation1 + $0x4] ss:$9 sm:$0xff] %v2205_v42  ;;  %v3410_v42 = vperm.slane %v3218_v36, %v4640_v21  ;;  %1025 = vmatmul.f32.gmra.mxu1 %v450_v40  ;;  %v1925_v58 = vsel %vm252_vm0, %v1821_v46, 0.0  ;;  %v459_v46 = vld [vmem:[%s4084_s10 + $0x470] sm:$0xff] }
 0x1f1   : > { %2735 = vst [vmem:[#allocation1 + $0x5] ss:$9 sm:$0xff] %v2206_v43  ;;  %1926 = vadd.xlane.f32.xlu2 %v1925_v58  ;;  %1240 = vmatmul.f32.gmra.mxu2 %v459_v46  ;;  %v2247_v58 = vperm.slane %v4663_v62, 6 }
 0x1f2   : > { %2736 = vst [vmem:[#allocation1 + $0x6] ss:$9 sm:$0xff] %v2207_v44  ;;  %v2228_v44 = vperm.slane %v4635_v28, 3 }
 0x1f3   : > { %2737 = vst [vmem:[#allocation1 + $0x7] ss:$9 sm:$0xff] %v2208_v45  ;;  %v1215_v45 = vadd.f32 %v1214_v22, %v1006_v33 }
 0x1f5   : > { %v3224_v15 = vpop.permute.xlu0 %3223 }
 0x1f8   : > { %1028 = vmatmul.f32.gmra.mxu1 %v454_v4  ;;  %v462_v4 = vld [vmem:[%s4084_s10 + $0x488] sm:$0xff] }
 0x1fa   : > { %v4624_v51 = vld [vmem:[#allocation1] sm:$0xff] }
 0x1fb   : > { %2739 = vst [vmem:[#allocation1] ss:$9 sm:$0xff] %v2209_v48  ;;  %v1421_v48 = vadd.f32 %v1420_v12, %v1212_v26 }
 0x1fc   : > { %2740 = vst [vmem:[#allocation1 + $0x1] ss:$9 sm:$0xff] %v2210_v49  ;;  %v799_v49 = vpop.f32.mrf.mxu0 }
 0x1fd   : > { %2741 = vst [vmem:[#allocation1 + $0x2] ss:$9 sm:$0xff] %v2211_v50  ;;  %v1008_v50 = vpop.f32.mrf.mxu1 }
 0x1fe   : > { %2742 = vst [vmem:[#allocation1 + $0x3] ss:$9 sm:$0xff] %v2212_v53  ;;  %v3414_v53 = vsel %vm3413_vm1, %v3412_v39, %v3410_v42 }
 0x1ff   : > { %2743 = vst [vmem:[#allocation1 + $0x4] ss:$9 sm:$0xff] %v2213_v54  ;;  %v2230_v54 = vperm.slane %v4635_v28, 5 }
 0x200   : > { %2744 = vst [vmem:[#allocation1 + $0x5] ss:$9 sm:$0xff] %v2214_v55  ;;  %v662_v55 = vld [vmem:[#allocation2 + $0xc8] sm:$0xff] }
 0x201   : > { %2745 = vst [vmem:[#allocation1 + $0x6] ss:$9 sm:$0xff] %v2215_v56  ;;  %v1424_v56 = vadd.f32 %v1423_v29, %v1215_v45  ;;  %v1562_v1 = vadd.f32 %v1421_v48, %v662_v55  ;;  %v2237_v29 = vperm.slane %v4632_v8, 4  ;;  %v1220_v45 = vpop.f32.mrf.mxu2  ;;  %v2243_v48 = vperm.slane %v4663_v62, 2 }
 0x202   : > { %2746 = vst [vmem:[#allocation1 + $0x7] ss:$9 sm:$0xff] %v2216_v57  ;;  %v1009_v57 = vadd.f32 %v1008_v50, %v799_v49  ;;  %v2245_v55 = vperm.slane %v4663_v62, 4 }
 0x203   : > { %1627 = vst.msk [vmem:[#allocation2 + $0xc8] sm:$0xff] %vm252_vm0, %v1562_v1  ;;  %v457_v1 = vld [vmem:[%s4084_s10 + $0x460] sm:$0xff] }
 0x204   : > { %v802_v39 = vpop.f32.mrf.mxu0  ;;  %822 = vmatmul.f32.gmra.mxu0 %v457_v1 }
 0x205   : > { %v1011_v40 = vpop.f32.mrf.mxu1 }
 0x206   : > { %v1012_v42 = vadd.f32 %v1011_v40, %v802_v39 }
 0x208   : > { %v1221_v49 = vadd.f32 %v1220_v45, %v1012_v42 }
 0x209   : > { %v4630_v5 = vld [vmem:[#allocation1] sm:$0xff]  ;;  %3232 = vperm.xlu2 %3799, %v4605_v37   ;;  %v2246_v37 = vperm.slane %v4663_v62, 5 }
 0x20a   : > { %2748 = vst [vmem:[#allocation1] ss:$9 sm:$0xff] %v2217_v63  ;;  %v2232_v63 = vperm.slane %v4635_v28, 7  ;;  %v4673_v28 = vadd.s32 4294967280, %v4640_v21 }
 0x20b   : > { %2749 = vst [vmem:[#allocation1 + $0x1] ss:$9 sm:$0xff] %v2218_v0  ;;  %v1218_v0 = vadd.f32 %v1217_v61, %v1009_v57  ;;  %v665_v57 = vld [vmem:[#allocation2 + $0xe0] sm:$0xff]  ;;  %v1915_v61 = vpop.xlane.xlu1 %1914 }
 0x20c   : > { %2750 = vst [vmem:[#allocation1 + $0x2] ss:$9 sm:$0xff] %v2219_v3  ;;  %v1426_v3 = vpop.f32.mrf.mxu3  ;;  %v3416_v26 = vperm.slane %v3224_v15, %v4673_v28  ;;  %v2254_v15 = vperm.slane %v1915_v61, 5  ;;  %v2255_v16 = vperm.slane %v1915_v61, 6  ;;  %v2256_v18 = vperm.slane %v1915_v61, 7 }
 0x20d   : > { %2751 = vst [vmem:[#allocation1 + $0x3] ss:$9 sm:$0xff] %v2220_v6  ;;  %v1563_v6 = vadd.f32 %v1424_v56, %v663_v60  ;;  %v1427_v52 = vadd.f32 %v1426_v3, %v1218_v0  ;;  %v2250_v0 = vperm.slane %v1915_v61, 1  ;;  %v1014_v3 = vpop.f32.mrf.mxu1 }
 0x20e   : > { %2752 = vst [vmem:[#allocation1 + $0x4] ss:$9 sm:$0xff] %v2221_v7  ;;  %v4688_v31 = vsel %vm3417_vm2, %v3416_v26, %v3414_v53  ;;  %v2244_v53 = vperm.slane %v4663_v62, 3 }
 0x20f   : > { %2753 = vst [vmem:[#allocation1 + $0x5] ss:$9 sm:$0xff] %v2222_v9  ;;  %v1564_v7 = vadd.f32 %v1427_v52, %v664_v2  ;;  %v1691_v9 = vld [vmem:[#allocation2 + $0xb0] sm:$0xff]  ;;  %v458_v2 = vld [vmem:[%s4084_s10 + $0x468] sm:$0xff] }
 0x210   : > { %2754 = vst [vmem:[#allocation1 + $0x6] ss:$9 sm:$0xff] %v2223_v10  ;;  %v1755_v10 = vmax.f32 %v1691_v9, 0.0  ;;  %1031 = vmatmul.f32.gmra.mxu1 %v458_v2  ;;  %v467_v2 = vld [vmem:[%s4084_s10 + $0x4b0] sm:$0xff] }
 0x211   : > { %2755 = vst [vmem:[#allocation1 + $0x7] ss:$9 sm:$0xff] %v2224_v11  ;;  %v2233_v11 = vperm.slane %v4632_v8, 0  ;;  %3238 = vperm.xlu2 %3799, %v4617_v14   ;;  %v2251_v14 = vperm.slane %v1915_v61, 2 }
 0x212   : > { %1628 = vst.msk [vmem:[#allocation2 + $0xd0] sm:$0xff] %vm252_vm0, %v1563_v6  ;;  %v1823_v12 = vmul.f32 %v4598_v19, %v1755_v10  ;;  %v463_v6 = vld [vmem:[%s4084_s10 + $0x490] sm:$0xff]  ;;  %v464_v10 = vld [vmem:[%s4084_s10 + $0x498] sm:$0xff] }
 0x213   : > { %1629 = vst.msk [vmem:[#allocation2 + $0xd8] sm:$0xff] %vm252_vm0, %v1564_v7  ;;  %v1223_v7 = vpop.f32.mrf.mxu2  ;;  %1243 = vmatmul.f32.gmra.mxu2 %v463_v6  ;;  %v4723_v46 = vpop.xlane.xlu1 %1923 }
 0x214   : > { %v1931_v22 = vsel %vm252_vm0, %v1823_v12, 0.0  ;;  %v2252_v12 = vperm.slane %v1915_v61, 3 }
 0x215   : > { %1932 = vadd.xlane.f32.xlu1 %v1931_v22  ;;  %v1017_v26 = vpop.f32.mrf.mxu1 }
 0x218   : > { %v4654_v43 = vld [vmem:[#allocation1] sm:$0xff]  ;;  %1034 = vmatmul.f32.gmra.mxu1 %v462_v4 }
 0x219   : > { %2757 = vst [vmem:[#allocation1] ss:$9 sm:$0xff] %v2225_v25  ;;  %v2236_v25 = vperm.slane %v4632_v8, 3 }
 0x21a   : > { %2758 = vst [vmem:[#allocation1 + $0x1] ss:$9 sm:$0xff] %v2226_v32  ;;  %v2239_v32 = vperm.slane %v4632_v8, 6  ;;  %v1696_v33 = vld [vmem:[#allocation2 + $0xd8] sm:$0xff]  ;;  %v2242_v8 = vperm.slane %v4663_v62, 1 }
 0x21b   : > { %2759 = vst [vmem:[#allocation1 + $0x2] ss:$9 sm:$0xff] %v2227_v38  ;;  %v1760_v35 = vmax.f32 %v1696_v33, 0.0  ;;  %1246 = vmatmul.f32.gmra.mxu2 %v467_v2 }
 0x21c   : > { %2760 = vst [vmem:[#allocation1 + $0x3] ss:$9 sm:$0xff] %v2228_v44  ;;  %v2241_v44 = vperm.slane %v4663_v62, 0 }
 0x21d   : > { %2761 = vst [vmem:[#allocation1 + $0x4] ss:$9 sm:$0xff] %v2229_v47  ;;  %v1828_v36 = vmul.f32 %v4598_v19, %v1760_v35  ;;  %v460_v47 = vld [vmem:[%s4084_s10 + $0x478] sm:$0xff]  ;;  %v1918_v35 = vpop.xlane.xlu2 %1917 }
 0x21e   : > { %2762 = vst [vmem:[#allocation1 + $0x5] ss:$9 sm:$0xff] %v2230_v54  ;;  %1449 = vmatmul.f32.gmra.mxu3 %v460_v47  ;;  %v1429_v54 = vpop.f32.mrf.mxu3  ;;  %v2257_v39 = vperm.slane %v1918_v35, 0  ;;  %v2258_v42 = vperm.slane %v1918_v35, 1  ;;  %v2261_v45 = vperm.slane %v1918_v35, 4  ;;  %v2262_v47 = vperm.slane %v1918_v35, 5 }
 0x21f   : > { %2763 = vst [vmem:[#allocation1 + $0x6] ss:$9 sm:$0xff] %v2231_v59  ;;  %v1946_v38 = vsel %vm252_vm0, %v1828_v36, 0.0  ;;  %v1430_v56 = vadd.f32 %v1429_v54, %v1221_v49  ;;  %v2248_v59 = vperm.slane %v4663_v62, 7  ;;  %v805_v62 = vpop.f32.mrf.mxu0  ;;  %v2264_v49 = vperm.slane %v1918_v35, 7 }
 0x220   : > { %2764 = vst [vmem:[#allocation1 + $0x7] ss:$9 sm:$0xff] %v2232_v63  ;;  %1947 = vadd.xlane.f32.xlu0 %v1946_v38  ;;  %v2249_v63 = vperm.slane %v1915_v61, 0  ;;  %v1015_v52 = vadd.f32 %v1014_v3, %v805_v62  ;;  %v468_v3 = vld [vmem:[%s4084_s10 + $0x4b8] sm:$0xff] }
 0x221   : > { %v1565_v60 = vadd.f32 %v1430_v56, %v665_v57  ;;  %v1921_v56 = vpop.xlane.xlu0 %1920 }
 0x222   : > { %v2267_v62 = vperm.slane %v1921_v56, 2 }
 0x223   : > { %1630 = vst.msk [vmem:[#allocation2 + $0xe0] sm:$0xff] %vm252_vm0, %v1565_v60 }
 0x225   : > { %v3227_v54 = vpop.permute.xlu2 %3226 }
 0x226   : > { %v1432_v9 = vpop.f32.mrf.mxu3  ;;  %1452 = vmatmul.f32.gmra.mxu3 %v464_v10  ;;  %v466_v10 = vld [vmem:[%s4084_s10 + $0x4a8] sm:$0xff] }
 0x227   : > { %v4681_v24 = vld [vmem:[#allocation1] sm:$0xff]  ;;  %1037 = vmatmul.f32.gmra.mxu1 %v466_v10 }
 0x228   : > { %2766 = vst [vmem:[#allocation1] ss:$9 sm:$0xff] %v2233_v11 }
 0x229   : > { %2767 = vst [vmem:[#allocation1 + $0x1] ss:$9 sm:$0xff] %v2234_v13  ;;  %v1224_v13 = vadd.f32 %v1223_v7, %v1015_v52 }
 0x22a   : > { %2768 = vst [vmem:[#allocation1 + $0x2] ss:$9 sm:$0xff] %v2235_v20  ;;  %v461_v20 = vld [vmem:[%s4084_s10 + $0x480] sm:$0xff] }
 0x22b   : > { %2769 = vst [vmem:[#allocation1 + $0x3] ss:$9 sm:$0xff] %v2236_v25  ;;  %v1433_v17 = vadd.f32 %v1432_v9, %v1224_v13  ;;  %v808_v25 = vpop.f32.mrf.mxu0  ;;  %825 = vmatmul.f32.gmra.mxu0 %v461_v20  ;;  %v465_v9 = vld [vmem:[%s4084_s10 + $0x4a0] sm:$0xff] }
 0x22c   : > { %2770 = vst [vmem:[#allocation1 + $0x4] ss:$9 sm:$0xff] %v2237_v29  ;;  %v1018_v29 = vadd.f32 %v1017_v26, %v808_v25  ;;  %v472_v25 = vld [vmem:[%s4084_s10 + $0x4d8] sm:$0xff]  ;;  %v469_v26 = vld [vmem:[%s4084_s10 + $0x4c0] sm:$0xff] }
 0x22d   : > { %2771 = vst [vmem:[#allocation1 + $0x5] ss:$9 sm:$0xff] %v2238_v30  ;;  %v1226_v30 = vpop.f32.mrf.mxu2 }
 0x22e   : > { %2772 = vst [vmem:[#allocation1 + $0x6] ss:$9 sm:$0xff] %v2239_v32  ;;  %3241 = vperm.xlu1 %3798, %v4621_v27   ;;  %v2253_v27 = vperm.slane %v1915_v61, 4  ;;  %v1435_v32 = vpop.f32.mrf.mxu3  ;;  %v1227_v33 = vadd.f32 %v1226_v30, %v1018_v29  ;;  %v4731_v61 = vadd.s32 4294967264, %v4640_v21  ;;  %1455 = vmatmul.f32.gmra.mxu3 %v468_v3  ;;  %v470_v29 = vld [vmem:[%s4084_s10 + $0x4c8] sm:$0xff] }
 0x22f   : > { %2773 = vst [vmem:[#allocation1 + $0x7] ss:$9 sm:$0xff] %v2240_v34  ;;  %v667_v34 = vld [vmem:[#allocation2 + $0xf0] sm:$0xff]  ;;  %1040 = vmatmul.f32.gmra.mxu1 %v470_v29 }
 0x230   : > { %v1436_v36 = vadd.f32 %v1435_v32, %v1227_v33  ;;  %v2274_v32 = vperm.slane %v4723_v46, 1  ;;  %v2275_v33 = vperm.slane %v4723_v46, 2 }
 0x232   : > { %v1567_v38 = vadd.f32 %v1436_v36, %v667_v34  ;;  %v2276_v34 = vperm.slane %v4723_v46, 3  ;;  %v2277_v36 = vperm.slane %v4723_v46, 4 }
 0x233   : > { %828 = vmatmul.f32.gmra.mxu0 %v465_v9  ;;  %v669_v9 = vld [vmem:[#allocation2 + $0x100] sm:$0xff] }
 0x234   : > { %3253 = vperm.xlu0 %3800, %v4654_v43   ;;  %v666_v43 = vld [vmem:[#allocation2 + $0xe8] sm:$0xff]  ;;  %1632 = vst.msk [vmem:[#allocation2 + $0xf0] sm:$0xff] %vm252_vm0, %v1567_v38  ;;  %v2278_v38 = vperm.slane %v4723_v46, 5 }
 0x235   : > { %v1566_v22 = vadd.f32 %v1433_v17, %v666_v43  ;;  %v2270_v43 = vperm.slane %v1921_v56, 5  ;;  %v2271_v17 = vperm.slane %v1921_v56, 6 }
 0x236   : > { %v4700_v50 = vld [vmem:[#allocation1] sm:$0xff]  ;;  %1458 = vmatmul.f32.gmra.mxu3 %v472_v25 }
 0x237   : > { %2775 = vst [vmem:[#allocation1] ss:$9 sm:$0xff] %v2241_v44  ;;  %v2259_v44 = vperm.slane %v1918_v35, 2 }
 0x238   : > { %2776 = vst [vmem:[#allocation1 + $0x1] ss:$9 sm:$0xff] %v2242_v8  ;;  %v2260_v8 = vperm.slane %v1918_v35, 3 }
 0x239   : > { %2777 = vst [vmem:[#allocation1 + $0x2] ss:$9 sm:$0xff] %v2243_v48  ;;  %v2263_v48 = vperm.slane %v1918_v35, 6 }
 0x23a   : > { %2778 = vst [vmem:[#allocation1 + $0x3] ss:$9 sm:$0xff] %v2244_v53  ;;  %v4726_v53 = vadd.s32 4294967272, %v4640_v21 }
 0x23b   : > { %2779 = vst [vmem:[#allocation1 + $0x4] ss:$9 sm:$0xff] %v2245_v55  ;;  %v1692_v55 = vld [vmem:[#allocation2 + $0xb8] sm:$0xff]  ;;  %v1699_v1 = vld [vmem:[#allocation2 + $0xf0] sm:$0xff]  ;;  %831 = vmatmul.f32.gmra.mxu0 %v469_v26 }
 0x23c   : > { %2780 = vst [vmem:[#allocation1 + $0x5] ss:$9 sm:$0xff] %v2246_v37  ;;  %v1756_v37 = vmax.f32 %v1692_v55, 0.0  ;;  %v3420_v57 = vperm.slane %v3227_v54, %v4726_v53  ;;  %v1438_v54 = vpop.f32.mrf.mxu3  ;;  %v1695_v26 = vld [vmem:[#allocation2 + $0xd0] sm:$0xff] }
 0x23d   : > { %2781 = vst [vmem:[#allocation1 + $0x6] ss:$9 sm:$0xff] %v2247_v58  ;;  %v2265_v58 = vperm.slane %v1921_v56, 0 }
 0x23e   : > { %2782 = vst [vmem:[#allocation1 + $0x7] ss:$9 sm:$0xff] %v2248_v59  ;;  %v2266_v59 = vperm.slane %v1921_v56, 1  ;;  %v1824_v60 = vmul.f32 %v4598_v19, %v1756_v37 }
 0x23f   : > { %1631 = vst.msk [vmem:[#allocation2 + $0xe8] sm:$0xff] %vm252_vm0, %v1566_v22  ;;  %v471_v22 = vld [vmem:[%s4084_s10 + $0x4d0] sm:$0xff] }
 0x240   : > { %v1934_v52 = vsel %vm252_vm0, %v1824_v60, 0.0  ;;  %1249 = vmatmul.f32.gmra.mxu2 %v471_v22  ;;  %v476_v60 = vld [vmem:[%s4084_s10 + $0x4f8] sm:$0xff] }
 0x241   : > { %1935 = vadd.xlane.f32.xlu2 %v1934_v52  ;;  %1461 = vmatmul.f32.gmra.mxu3 %v476_v60 }
 0x245   : > { %v4715_v11 = vld [vmem:[#allocation1] sm:$0xff] }
 0x246   : > { %2784 = vst [vmem:[#allocation1] ss:$9 sm:$0xff] %v2249_v63  ;;  %v3230_v63 = vpop.permute.xlu1 %3229 }
 0x247   : > { %2785 = vst [vmem:[#allocation1 + $0x1] ss:$9 sm:$0xff] %v2250_v0  ;;  %v1694_v0 = vld [vmem:[#allocation2 + $0xc8] sm:$0xff]  ;;  %v3424_v7 = vperm.slane %v3230_v63, %v4731_v61 }
 0x248   : > { %2786 = vst [vmem:[#allocation1 + $0x2] ss:$9 sm:$0xff] %v2251_v14  ;;  %v2268_v14 = vperm.slane %v1921_v56, 3  ;;  %v1758_v13 = vmax.f32 %v1694_v0, 0.0 }
 0x249   : > { %2787 = vst [vmem:[#allocation1 + $0x3] ss:$9 sm:$0xff] %v2252_v12  ;;  %v3422_v12 = vsel %vm3421_vm3, %v3420_v57, %v4688_v31 }
 0x24a   : > { %2788 = vst [vmem:[#allocation1 + $0x4] ss:$9 sm:$0xff] %v2253_v27  ;;  %v2269_v27 = vperm.slane %v1921_v56, 4  ;;  %v1826_v31 = vmul.f32 %v4598_v19, %v1758_v13  ;;  %v4778_v13 = vadd.s32 4294967248, %v4640_v21 }
 0x24b   : > { %2789 = vst [vmem:[#allocation1 + $0x5] ss:$9 sm:$0xff] %v2254_v15  ;;  %v1763_v15 = vmax.f32 %v1699_v1, 0.0  ;;  %v473_v1 = vld [vmem:[%s4084_s10 + $0x4e0] sm:$0xff] }
 0x24c   : > { %2790 = vst [vmem:[#allocation1 + $0x6] ss:$9 sm:$0xff] %v2255_v16  ;;  %v4744_v16 = vsel %vm3425_vm4, %v3424_v7, %v3422_v12  ;;  %v1940_v4 = vsel %vm252_vm0, %v1826_v31, 0.0  ;;  %834 = vmatmul.f32.gmra.mxu0 %v473_v1 }
 0x24d   : > { %2791 = vst [vmem:[#allocation1 + $0x7] ss:$9 sm:$0xff] %v2256_v18  ;;  %v2272_v18 = vperm.slane %v1921_v56, 7  ;;  %v1831_v20 = vmul.f32 %v4598_v19, %v1763_v15  ;;  %v2273_v19 = vperm.slane %v4723_v46, 0 }
 0x24e   : > { %v3236_v15 = vpop.permute.xlu1 %3235 }
 0x24f   : > { %v1955_v30 = vsel %vm252_vm0, %v1831_v20, 0.0  ;;  %v3432_v29 = vperm.slane %v3236_v15, %v4778_v13 }
 0x253   : > { %v1441_v52 = vpop.f32.mrf.mxu3 }
 0x254   : > { %v4720_v40 = vld [vmem:[#allocation1] sm:$0xff] }
 0x255   : > { %2793 = vst [vmem:[#allocation1] ss:$9 sm:$0xff] %v2257_v39  ;;  %v2279_v39 = vperm.slane %v4723_v46, 6 }
 0x256   : > { %2794 = vst [vmem:[#allocation1 + $0x1] ss:$9 sm:$0xff] %v2258_v42  ;;  %v2280_v42 = vperm.slane %v4723_v46, 7 }
 0x257   : > { %2795 = vst [vmem:[#allocation1 + $0x2] ss:$9 sm:$0xff] %v2259_v44  ;;  %v811_v44 = vpop.f32.mrf.mxu0 }
 0x258   : > { %2796 = vst [vmem:[#allocation1 + $0x3] ss:$9 sm:$0xff] %v2260_v8  ;;  %1941 = vadd.xlane.f32.xlu1 %v1940_v4  ;;  %v1020_v8 = vpop.f32.mrf.mxu1 }
 0x259   : > { %2797 = vst [vmem:[#allocation1 + $0x4] ss:$9 sm:$0xff] %v2261_v45  ;;  %3247 = vperm.xlu2 %3799, %v4624_v51   ;;  %v1021_v45 = vadd.f32 %v1020_v8, %v811_v44 }
 0x25a   : > { %2798 = vst [vmem:[#allocation1 + $0x5] ss:$9 sm:$0xff] %v2262_v47  ;;  %v1229_v47 = vpop.f32.mrf.mxu2 }
 0x25b   : > { %2799 = vst [vmem:[#allocation1 + $0x6] ss:$9 sm:$0xff] %v2263_v48  ;;  %v1230_v48 = vadd.f32 %v1229_v47, %v1021_v45  ;;  %v479_v47 = vld [vmem:[%s4084_s10 + $0x510] sm:$0xff] }
 0x25c   : > { %2800 = vst [vmem:[#allocation1 + $0x7] ss:$9 sm:$0xff] %v2264_v49  ;;  %v668_v49 = vld [vmem:[#allocation2 + $0xf8] sm:$0xff] }
 0x25d   : > { %v1439_v46 = vadd.f32 %v1438_v54, %v1230_v48 }
 0x25e   : > { %1956 = vadd.xlane.f32.xlu0 %v1955_v30 }
 0x25f   : > { %v1568_v55 = vadd.f32 %v1439_v46, %v668_v49  ;;  %v814_v51 = vpop.f32.mrf.mxu0  ;;  %v4791_v49 = vld [vmem:[#allocation6] ss:$0 sm:$0xff] }
 0x260   : > { %v1023_v56 = vpop.f32.mrf.mxu1 }
 0x261   : > { %1633 = vst.msk [vmem:[#allocation2 + $0xf8] sm:$0xff] %vm252_vm0, %v1568_v55  ;;  %v1024_v37 = vadd.f32 %v1023_v56, %v814_v51  ;;  %v1697_v56 = vld [vmem:[#allocation2 + $0xe0] sm:$0xff] }
 0x262   : > { %v1761_v1 = vmax.f32 %v1697_v56, 0.0 }
 0x263   : > { %v4735_v6 = vld [vmem:[#allocation1] sm:$0xff] }
 0x264   : > { %2802 = vst [vmem:[#allocation1] ss:$9 sm:$0xff] %v2265_v58  ;;  %v1927_v57 = vpop.xlane.xlu2 %1926  ;;  %v1232_v58 = vpop.f32.mrf.mxu2 }
 0x265   : > { %2803 = vst [vmem:[#allocation1 + $0x1] ss:$9 sm:$0xff] %v2266_v59  ;;  %v475_v59 = vld [vmem:[%s4084_s10 + $0x4f0] sm:$0xff]  ;;  %v2281_v63 = vperm.slane %v1927_v57, 0  ;;  %v2282_v0 = vperm.slane %v1927_v57, 1  ;;  %v2285_v3 = vperm.slane %v1927_v57, 4 }
 0x266   : > { %2804 = vst [vmem:[#allocation1 + $0x2] ss:$9 sm:$0xff] %v2267_v62  ;;  %1252 = vmatmul.f32.gmra.mxu2 %v475_v59  ;;  %v2284_v62 = vperm.slane %v1927_v57, 3  ;;  %v2286_v7 = vperm.slane %v1927_v57, 5  ;;  %v2287_v10 = vperm.slane %v1927_v57, 6  ;;  %v478_v59 = vld [vmem:[%s4084_s10 + $0x508] sm:$0xff] }
 0x267   : > { %2805 = vst [vmem:[#allocation1 + $0x3] ss:$9 sm:$0xff] %v2268_v14  ;;  %v1233_v14 = vadd.f32 %v1232_v58, %v1024_v37  ;;  %v817_v31 = vpop.f32.mrf.mxu0  ;;  %v477_v58 = vld [vmem:[%s4084_s10 + $0x500] sm:$0xff] }
 0x268   : > { %2806 = vst [vmem:[#allocation1 + $0x4] ss:$9 sm:$0xff] %v2269_v27  ;;  %v4775_v27 = vadd.s32 4294967256, %v4640_v21  ;;  %837 = vmatmul.f32.gmra.mxu0 %v477_v58 }
 0x269   : > { %2807 = vst [vmem:[#allocation1 + $0x5] ss:$9 sm:$0xff] %v2270_v43  ;;  %v1442_v12 = vadd.f32 %v1441_v52, %v1233_v14  ;;  %v2288_v43 = vperm.slane %v1927_v57, 7  ;;  %v1829_v52 = vmul.f32 %v4791_v49, %v1761_v1 }
 0x26a   : > { %2808 = vst [vmem:[#allocation1 + $0x6] ss:$9 sm:$0xff] %v2271_v17 }
 0x26b   : > { %2809 = vst [vmem:[#allocation1 + $0x7] ss:$9 sm:$0xff] %v2272_v18  ;;  %v1569_v17 = vadd.f32 %v1442_v12, %v669_v9 }
 0x26c   : > { %v3233_v22 = vpop.permute.xlu2 %3232  ;;  %v1235_v25 = vpop.f32.mrf.mxu2 }
 0x26d   : > { %v1026_v18 = vpop.f32.mrf.mxu1  ;;  %v3428_v4 = vperm.slane %v3233_v22, %v4775_v27  ;;  %1634 = vst.msk [vmem:[#allocation2 + $0x100] sm:$0xff] %vm252_vm0, %v1569_v17  ;;  %v482_v17 = vld [vmem:[%s4084_s10 + $0x528] sm:$0xff]  ;;  %v1949_v22 = vsel %vm252_vm0, %v1829_v52, 0.0 }
 0x26e   : > { %v1027_v20 = vadd.f32 %v1026_v18, %v817_v31  ;;  %1255 = vmatmul.f32.gmra.mxu2 %v479_v47  ;;  %v4824_v47 = vadd.s32 4294967224, %v4640_v21 }
 0x270   : > { %v1236_v30 = vadd.f32 %v1235_v25, %v1027_v20 }
 0x271   : > { %3250 = vperm.xlu1 %3798, %v4630_v5   ;;  %v474_v5 = vld [vmem:[%s4084_s10 + $0x4e8] sm:$0xff] }
 0x272   : > { %v4758_v35 = vld [vmem:[#allocation1] sm:$0xff]  ;;  %3262 = vperm.xlu0 %3800, %v4715_v11   ;;  %v2283_v11 = vperm.slane %v1927_v57, 2  ;;  %1043 = vmatmul.f32.gmra.mxu1 %v474_v5 }
 0x273   : > { %2811 = vst [vmem:[#allocation1] ss:$9 sm:$0xff] %v2273_v19  ;;  %v3430_v19 = vsel %vm3429_vm5, %v3428_v4, %v4744_v16  ;;  %v480_v57 = vld [vmem:[%s4084_s10 + $0x518] sm:$0xff] }
 0x274   : > { %2812 = vst [vmem:[#allocation1 + $0x1] ss:$9 sm:$0xff] %v2274_v32  ;;  %v670_v32 = vld [vmem:[#allocation2 + $0x108] sm:$0xff]  ;;  %v3239_v16 = vpop.permute.xlu2 %3238  ;;  %1464 = vmatmul.f32.gmra.mxu3 %v480_v57  ;;  %v1238_v4 = vpop.f32.mrf.mxu2 }
 0x275   : > { %2813 = vst [vmem:[#allocation1 + $0x2] ss:$9 sm:$0xff] %v2275_v33  ;;  %v1444_v33 = vpop.f32.mrf.mxu3  ;;  %v1029_v9 = vpop.f32.mrf.mxu1 }
 0x276   : > { %2814 = vst [vmem:[#allocation1 + $0x3] ss:$9 sm:$0xff] %v2276_v34  ;;  %v1445_v34 = vadd.f32 %v1444_v33, %v1236_v30 }
 0x277   : > { %2815 = vst [vmem:[#allocation1 + $0x4] ss:$9 sm:$0xff] %v2277_v36  ;;  %v3434_v36 = vsel %vm3433_vm6, %v3432_v29, %v3430_v19  ;;  %v487_v29 = vld [vmem:[%s4084_s10 + $0x550] sm:$0xff] }
 0x278   : > { %2816 = vst [vmem:[#allocation1 + $0x5] ss:$9 sm:$0xff] %v2278_v38  ;;  %v1759_v38 = vmax.f32 %v1695_v26, 0.0  ;;  %v1570_v8 = vadd.f32 %v1445_v34, %v670_v32 }
 0x279   : > { %2817 = vst [vmem:[#allocation1 + $0x6] ss:$9 sm:$0xff] %v2279_v39  ;;  %v1930_v39 = vpop.xlane.xlu0 %1929 }
 0x27a   : > { %2818 = vst [vmem:[#allocation1 + $0x7] ss:$9 sm:$0xff] %v2280_v42  ;;  %v4787_v42 = vadd.s32 4294967240, %v4640_v21  ;;  %v2289_v44 = vperm.slane %v1930_v39, 0  ;;  %v2290_v45 = vperm.slane %v1930_v39, 1  ;;  %v2291_v48 = vperm.slane %v1930_v39, 2  ;;  %1046 = vmatmul.f32.gmra.mxu1 %v478_v59 }
 0x27b   : > { %1635 = vst.msk [vmem:[#allocation2 + $0x108] sm:$0xff] %vm252_vm0, %v1570_v8  ;;  %v1827_v54 = vmul.f32 %v4791_v49, %v1759_v38  ;;  %v2292_v46 = vperm.slane %v1930_v39, 3  ;;  %v2293_v37 = vperm.slane %v1930_v39, 4  ;;  %v2294_v60 = vperm.slane %v1930_v39, 5  ;;  %v485_v38 = vld [vmem:[%s4084_s10 + $0x540] sm:$0xff] }
 0x27c   : > { %v3436_v51 = vperm.slane %v3239_v16, %v4787_v42  ;;  %v2296_v5 = vperm.slane %v1930_v39, 7  ;;  %v671_v16 = vld [vmem:[#allocation2 + $0x110] sm:$0xff] }
 0x27d   : > { %v1447_v34 = vpop.f32.mrf.mxu3 }
 0x281   : > { %v4772_v2 = vld [vmem:[#allocation1] sm:$0xff]  ;;  %v4807_v12 = vpop.xlane.xlu0 %1938 }
 0x282   : > { %2820 = vst [vmem:[#allocation1] ss:$9 sm:$0xff] %v2281_v63  ;;  %v4801_v63 = vsel %vm3437_vm7, %v3436_v51, %v3434_v36  ;;  %1049 = vmatmul.f32.gmra.mxu1 %v482_v17  ;;  %v488_v36 = vld [vmem:[%s4084_s10 + $0x558] sm:$0xff] }
 0x283   : > { %2821 = vst [vmem:[#allocation1 + $0x1] ss:$9 sm:$0xff] %v2282_v0  ;;  %v2295_v0 = vperm.slane %v1930_v39, 6 }
 0x284   : > { %2822 = vst [vmem:[#allocation1 + $0x2] ss:$9 sm:$0xff] %v2283_v11  ;;  %v1943_v11 = vsel %vm252_vm0, %v1827_v54, 0.0 }
 0x285   : > { %2823 = vst [vmem:[#allocation1 + $0x3] ss:$9 sm:$0xff] %v2284_v62  ;;  %v483_v62 = vld [vmem:[%s4084_s10 + $0x530] sm:$0xff]  ;;  %1944 = vadd.xlane.f32.xlu2 %v1943_v11 }
 0x286   : > { %2824 = vst [vmem:[#allocation1 + $0x4] ss:$9 sm:$0xff] %v2285_v3  ;;  %v1702_v3 = vld [vmem:[#allocation2 + $0x108] sm:$0xff]  ;;  %1258 = vmatmul.f32.gmra.mxu2 %v483_v62 }
 0x287   : > { %2825 = vst [vmem:[#allocation1 + $0x5] ss:$9 sm:$0xff] %v2286_v7  ;;  %v1766_v14 = vmax.f32 %v1702_v3, 0.0  ;;  %v820_v7 = vpop.f32.mrf.mxu0 }
 0x288   : > { %2826 = vst [vmem:[#allocation1 + $0x6] ss:$9 sm:$0xff] %v2287_v10  ;;  %v484_v10 = vld [vmem:[%s4084_s10 + $0x538] sm:$0xff]  ;;  %v1030_v15 = vadd.f32 %v1029_v9, %v820_v7  ;;  %v1933_v31 = vpop.xlane.xlu1 %1932 }
 0x289   : > { %2827 = vst [vmem:[#allocation1 + $0x7] ss:$9 sm:$0xff] %v2288_v43  ;;  %v481_v43 = vld [vmem:[%s4084_s10 + $0x520] sm:$0xff]  ;;  %v1834_v18 = vmul.f32 %v4791_v49, %v1766_v14  ;;  %1467 = vmatmul.f32.gmra.mxu3 %v484_v10  ;;  %v2297_v25 = vperm.slane %v1933_v31, 0  ;;  %v2298_v30 = vperm.slane %v1933_v31, 1  ;;  %v2299_v19 = vperm.slane %v1933_v31, 2  ;;  %v3245_v54 = vpop.permute.xlu0 %3244 }
 0x28a   : > { %840 = vmatmul.f32.gmra.mxu0 %v481_v43  ;;  %v1239_v26 = vadd.f32 %v1238_v4, %v1030_v15  ;;  %v2300_v33 = vperm.slane %v1933_v31, 3  ;;  %v2301_v39 = vperm.slane %v1933_v31, 4  ;;  %v2304_v51 = vperm.slane %v1933_v31, 7  ;;  %v672_v14 = vld [vmem:[#allocation2 + $0x118] sm:$0xff]  ;;  %v1698_v4 = vld [vmem:[#allocation2 + $0xe8] sm:$0xff] }
 0x28b   : > { %v1964_v20 = vsel %vm252_vm0, %v1834_v18, 0.0  ;;  %v3444_v58 = vperm.slane %v3245_v54, %v4824_v47 }
 0x28c   : > { %v1448_v8 = vadd.f32 %v1447_v34, %v1239_v26  ;;  %v4840_v34 = vadd.s32 4294967216, %v4640_v21 }
 0x28d   : > { %v1032_v1 = vpop.f32.mrf.mxu1 }
 0x28e   : > { %1261 = vmatmul.f32.gmra.mxu2 %v487_v29  ;;  %v1571_v57 = vadd.f32 %v1448_v8, %v671_v16 }
 0x28f   : > { %v823_v11 = vpop.f32.mrf.mxu0 }
 0x290   : > { %v4794_v55 = vld [vmem:[#allocation1] sm:$0xff]  ;;  %1636 = vst.msk [vmem:[#allocation2 + $0x110] sm:$0xff] %vm252_vm0, %v1571_v57  ;;  %v1033_v62 = vadd.f32 %v1032_v1, %v823_v11  ;;  %v491_v57 = vld [vmem:[%s4084_s10 + $0x570] sm:$0xff]  ;;  %v2315_v11 = vperm.slane %v4807_v12, 2 }
 0x291   : > { %2829 = vst [vmem:[#allocation1] ss:$9 sm:$0xff] %v2289_v44  ;;  %v4820_v44 = vadd.s32 4294967232, %v4640_v21  ;;  %1470 = vmatmul.f32.gmra.mxu3 %v488_v36 }
 0x292   : > { %2830 = vst [vmem:[#allocation1 + $0x1] ss:$9 sm:$0xff] %v2290_v45  ;;  %v486_v45 = vld [vmem:[%s4084_s10 + $0x548] sm:$0xff]  ;;  %843 = vmatmul.f32.gmra.mxu0 %v485_v38 }
 0x293   : > { %2831 = vst [vmem:[#allocation1 + $0x2] ss:$9 sm:$0xff] %v2291_v48  ;;  %v2302_v48 = vperm.slane %v1933_v31, 5  ;;  %1052 = vmatmul.f32.gmra.mxu1 %v486_v45 }
 0x294   : > { %2832 = vst [vmem:[#allocation1 + $0x3] ss:$9 sm:$0xff] %v2292_v46  ;;  %v2303_v46 = vperm.slane %v1933_v31, 6 }
 0x295   : > { %2833 = vst [vmem:[#allocation1 + $0x4] ss:$9 sm:$0xff] %v2293_v37  ;;  %v1035_v9 = vpop.f32.mrf.mxu1 }
 0x296   : > { %2834 = vst [vmem:[#allocation1 + $0x5] ss:$9 sm:$0xff] %v2294_v60  ;;  %1264 = vmatmul.f32.gmra.mxu2 %v491_v57 }
 0x297   : > { %2835 = vst [vmem:[#allocation1 + $0x6] ss:$9 sm:$0xff] %v2295_v0  ;;  %v1241_v0 = vpop.f32.mrf.mxu2 }
 0x298   : > { %2836 = vst [vmem:[#allocation1 + $0x7] ss:$9 sm:$0xff] %v2296_v5  ;;  %v1242_v3 = vadd.f32 %v1241_v0, %v1033_v62  ;;  %v490_v62 = vld [vmem:[%s4084_s10 + $0x568] sm:$0xff] }
 0x29b   : > { %1950 = vadd.xlane.f32.xlu1 %v1949_v22  ;;  %1055 = vmatmul.f32.gmra.mxu1 %v490_v62 }
 0x29c   : > { %1965 = vadd.xlane.f32.xlu0 %v1964_v20 }
 0x29d   : > { %3256 = vperm.xlu2 %3799, %v4681_v24  }
 0x29f   : > { %v4815_v32 = vld [vmem:[#allocation1] sm:$0xff]  ;;  %v1244_v10 = vpop.f32.mrf.mxu2 }
 0x2a0   : > { %2838 = vst [vmem:[#allocation1] ss:$9 sm:$0xff] %v2297_v25  ;;  %v3242_v56 = vpop.permute.xlu1 %3241 }
 0x2a1   : > { %2839 = vst [vmem:[#allocation1 + $0x1] ss:$9 sm:$0xff] %v2298_v30  ;;  %v3440_v37 = vperm.slane %v3242_v56, %v4820_v44  ;;  %v1450_v5 = vpop.f32.mrf.mxu3  ;;  %v2314_v56 = vperm.slane %v4807_v12, 1 }
 0x2a2   : > { %2840 = vst [vmem:[#allocation1 + $0x2] ss:$9 sm:$0xff] %v2299_v19  ;;  %v1762_v19 = vmax.f32 %v1698_v4, 0.0 }
 0x2a3   : > { %2841 = vst [vmem:[#allocation1 + $0x3] ss:$9 sm:$0xff] %v2300_v33  ;;  %v3442_v59 = vsel %vm3441_vm8, %v3440_v37, %v4801_v63  ;;  %v1451_v63 = vadd.f32 %v1450_v5, %v1242_v3  ;;  %v1700_v37 = vld [vmem:[#allocation2 + $0xf8] sm:$0xff]  ;;  %v489_v5 = vld [vmem:[%s4084_s10 + $0x560] sm:$0xff] }
 0x2a4   : > { %2842 = vst [vmem:[#allocation1 + $0x4] ss:$9 sm:$0xff] %v2301_v39  ;;  %v3446_v60 = vsel %vm3445_vm9, %v3444_v58, %v3442_v59  ;;  %v1830_v8 = vmul.f32 %v4791_v49, %v1762_v19  ;;  %v492_v58 = vld [vmem:[%s4084_s10 + $0x578] sm:$0xff]  ;;  %v1038_v0 = vpop.f32.mrf.mxu1  ;;  %v1764_v1 = vmax.f32 %v1700_v37, 0.0  ;;  %846 = vmatmul.f32.gmra.mxu0 %v489_v5 }
 0x2a5   : > { %2843 = vst [vmem:[#allocation1 + $0x5] ss:$9 sm:$0xff] %v2302_v48  ;;  %v1572_v52 = vadd.f32 %v1451_v63, %v672_v14  ;;  %1473 = vmatmul.f32.gmra.mxu3 %v492_v58  ;;  %v2316_v63 = vperm.slane %v4807_v12, 3  ;;  %v500_v37 = vld [vmem:[%s4084_s10 + $0x5b8] sm:$0xff] }
 0x2a6   : > { %2844 = vst [vmem:[#allocation1 + $0x6] ss:$9 sm:$0xff] %v2303_v46  ;;  %v1952_v54 = vsel %vm252_vm0, %v1830_v8, 0.0  ;;  %v675_v8 = vld [vmem:[#allocation2 + $0x130] sm:$0xff] }
 0x2a7   : > { %2845 = vst [vmem:[#allocation1 + $0x7] ss:$9 sm:$0xff] %v2304_v51  ;;  %v2313_v51 = vperm.slane %v4807_v12, 0  ;;  %v1247_v14 = vpop.f32.mrf.mxu2 }
 0x2a8   : > { %v826_v7 = vpop.f32.mrf.mxu0  ;;  %1637 = vst.msk [vmem:[#allocation2 + $0x118] sm:$0xff] %vm252_vm0, %v1572_v52 }
 0x2a9   : > { %v1036_v15 = vadd.f32 %v1035_v9, %v826_v7  ;;  %v1453_v24 = vpop.f32.mrf.mxu3  ;;  %v2317_v9 = vperm.slane %v4807_v12, 4 }
 0x2ab   : > { %v1245_v43 = vadd.f32 %v1244_v10, %v1036_v15  ;;  %v1832_v10 = vmul.f32 %v4791_v49, %v1764_v1  ;;  %v498_v1 = vld [vmem:[%s4084_s10 + $0x5a8] sm:$0xff] }
 0x2ad   : > { %v1454_v17 = vadd.f32 %v1453_v24, %v1245_v43  ;;  %v2318_v24 = vperm.slane %v4807_v12, 5  ;;  %v4863_v43 = vpop.xlane.xlu0 %1947  ;;  %v1958_v4 = vsel %vm252_vm0, %v1832_v10, 0.0 }
 0x2ae   : > { %v4837_v25 = vld [vmem:[#allocation1] sm:$0xff] }
 0x2b0   : > { %3271 = vperm.xlu0 %3800, %v4758_v35   ;;  %v673_v35 = vld [vmem:[#allocation2 + $0x120] sm:$0xff]  ;;  %v829_v59 = vpop.f32.mrf.mxu0 }
 0x2b1   : > { %v1573_v31 = vadd.f32 %v1454_v17, %v673_v35  ;;  %v1039_v3 = vadd.f32 %v1038_v0, %v829_v59  ;;  %v1456_v7 = vpop.f32.mrf.mxu3  ;;  %v674_v35 = vld [vmem:[#allocation2 + $0x128] sm:$0xff]  ;;  %v2319_v17 = vperm.slane %v4807_v12, 6  ;;  %v497_v0 = vld [vmem:[%s4084_s10 + $0x5a0] sm:$0xff] }
 0x2b3   : > { %1638 = vst.msk [vmem:[#allocation2 + $0x120] sm:$0xff] %vm252_vm0, %v1573_v31  ;;  %v1248_v15 = vadd.f32 %v1247_v14, %v1039_v3 }
 0x2b4   : > { %3259 = vperm.xlu1 %3798, %v4700_v50   ;;  %v1936_v18 = vpop.xlane.xlu2 %1935 }
 0x2b5   : > { %v2305_v20 = vperm.slane %v1936_v18, 0  ;;  %v2306_v22 = vperm.slane %v1936_v18, 1  ;;  %v2307_v50 = vperm.slane %v1936_v18, 2  ;;  %v2308_v26 = vperm.slane %v1936_v18, 3 }
 0x2b6   : > { %v2309_v29 = vperm.slane %v1936_v18, 4  ;;  %v2310_v30 = vperm.slane %v1936_v18, 5  ;;  %v2311_v33 = vperm.slane %v1936_v18, 6  ;;  %v2312_v38 = vperm.slane %v1936_v18, 7 }
 0x2b7   : > { %2847 = vst [vmem:[#allocation1] ss:$9 sm:$0xff] %v2305_v20  ;;  %v1457_v18 = vadd.f32 %v1456_v7, %v1248_v15  ;;  %v2320_v20 = vperm.slane %v4807_v12, 7 }
 0x2b8   : > { %2848 = vst [vmem:[#allocation1 + $0x1] ss:$9 sm:$0xff] %v2306_v22  ;;  %v495_v22 = vld [vmem:[%s4084_s10 + $0x590] sm:$0xff]  ;;  %v832_v19 = vpop.f32.mrf.mxu0 }
 0x2b9   : > { %2849 = vst [vmem:[#allocation1 + $0x2] ss:$9 sm:$0xff] %v2307_v50  ;;  %v496_v50 = vld [vmem:[%s4084_s10 + $0x598] sm:$0xff]  ;;  %1267 = vmatmul.f32.gmra.mxu2 %v495_v22 }
 0x2ba   : > { %v1705_v36 = vld [vmem:[#allocation2 + $0x120] sm:$0xff]  ;;  %2850 = vst [vmem:[#allocation1 + $0x3] ss:$9 sm:$0xff] %v2308_v26  ;;  %v1574_v26 = vadd.f32 %v1457_v18, %v674_v35  ;;  %1476 = vmatmul.f32.gmra.mxu3 %v496_v50  ;;  %v676_v22 = vld [vmem:[#allocation2 + $0x138] sm:$0xff] }
 0x2bb   : > { %2851 = vst [vmem:[#allocation1 + $0x4] ss:$9 sm:$0xff] %v2309_v29  ;;  %v1769_v45 = vmax.f32 %v1705_v36, 0.0  ;;  %v493_v29 = vld [vmem:[%s4084_s10 + $0x580] sm:$0xff] }
 0x2bc   : > { %2852 = vst [vmem:[#allocation1 + $0x5] ss:$9 sm:$0xff] %v2310_v30  ;;  %v3248_v39 = vpop.permute.xlu2 %3247  ;;  %v494_v30 = vld [vmem:[%s4084_s10 + $0x588] sm:$0xff]  ;;  %849 = vmatmul.f32.gmra.mxu0 %v493_v29 }
 0x2bd   : > { %2853 = vst [vmem:[#allocation1 + $0x6] ss:$9 sm:$0xff] %v2311_v33  ;;  %v3448_v48 = vperm.slane %v3248_v39, %v4840_v34  ;;  %v1837_v46 = vmul.f32 %v4791_v49, %v1769_v45  ;;  %v1041_v33 = vpop.f32.mrf.mxu1  ;;  %1058 = vmatmul.f32.gmra.mxu1 %v494_v30  ;;  %v4876_v39 = vadd.s32 4294967208, %v4640_v21  ;;  %v1459_v45 = vpop.f32.mrf.mxu3  ;;  %v1701_v30 = vld [vmem:[#allocation2 + $0x100] sm:$0xff] }
 0x2be   : > { %2854 = vst [vmem:[#allocation1 + $0x7] ss:$9 sm:$0xff] %v2312_v38  ;;  %v1042_v36 = vadd.f32 %v1041_v33, %v832_v19 }
 0x2bf   : > { %v4845_v16 = vsel %vm3449_vm10, %v3448_v48, %v3446_v60  ;;  %v1973_v60 = vsel %vm252_vm0, %v1837_v46, 0.0  ;;  %1639 = vst.msk [vmem:[#allocation2 + $0x128] sm:$0xff] %vm252_vm0, %v1574_v26  ;;  %v4879_v48 = vadd.s32 4294967200, %v4640_v21  ;;  %v3254_v46 = vpop.permute.xlu0 %3253 }
 0x2c1   : > { %v3456_v5 = vperm.slane %v3254_v46, %v4879_v48 }
 0x2c2   : > { %1479 = vmatmul.f32.gmra.mxu3 %v500_v37 }
 0x2c3   : > { %v1250_v12 = vpop.f32.mrf.mxu2 }
 0x2c4   : > { %v1251_v38 = vadd.f32 %v1250_v12, %v1042_v36  ;;  %852 = vmatmul.f32.gmra.mxu0 %v497_v0  ;;  %v1765_v36 = vmax.f32 %v1701_v30, 0.0  ;;  %v2337_v0 = vperm.slane %v4863_v43, 0  ;;  %v507_v30 = vld [vmem:[%s4084_s10 + $0x5f0] sm:$0xff] }
 0x2c5   : > { %v4858_v52 = vld [vmem:[#allocation1] sm:$0xff]  ;;  %1061 = vmatmul.f32.gmra.mxu1 %v498_v1  ;;  %v1462_v18 = vpop.f32.mrf.mxu3  ;;  %v503_v1 = vld [vmem:[%s4084_s10 + $0x5d0] sm:$0xff] }
 0x2c6   : > { %1953 = vadd.xlane.f32.xlu2 %v1952_v54  ;;  %2856 = vst [vmem:[#allocation1] ss:$9 sm:$0xff] %v2313_v51  ;;  %v1460_v54 = vadd.f32 %v1459_v45, %v1251_v38  ;;  %v4908_v38 = vadd.s32 4294967192, %v4640_v21 }
 0x2c7   : > { %2857 = vst [vmem:[#allocation1 + $0x1] ss:$9 sm:$0xff] %v2314_v56  ;;  %v499_v56 = vld [vmem:[%s4084_s10 + $0x5b0] sm:$0xff] }
 0x2c8   : > { %2858 = vst [vmem:[#allocation1 + $0x2] ss:$9 sm:$0xff] %v2315_v11  ;;  %v1575_v59 = vadd.f32 %v1460_v54, %v675_v8  ;;  %1270 = vmatmul.f32.gmra.mxu2 %v499_v56  ;;  %v1833_v54 = vmul.f32 %v4791_v49, %v1765_v36  ;;  %v505_v36 = vld [vmem:[%s4084_s10 + $0x5e0] sm:$0xff] }
 0x2c9   : > { %2859 = vst [vmem:[#allocation1 + $0x3] ss:$9 sm:$0xff] %v2316_v63 }
 0x2ca   : > { %2860 = vst [vmem:[#allocation1 + $0x4] ss:$9 sm:$0xff] %v2317_v9 }
 0x2cb   : > { %v4866_v31 = vpop.xlane.xlu1 %1941  ;;  %2861 = vst [vmem:[#allocation1 + $0x5] ss:$9 sm:$0xff] %v2318_v24 }
 0x2cc   : > { %2862 = vst [vmem:[#allocation1 + $0x6] ss:$9 sm:$0xff] %v2319_v17  ;;  %v2321_v51 = vperm.slane %v4866_v31, 0  ;;  %v2322_v57 = vperm.slane %v4866_v31, 1  ;;  %v2323_v11 = vperm.slane %v4866_v31, 2  ;;  %v2324_v3 = vperm.slane %v4866_v31, 3 }
 0x2cd   : > { %2863 = vst [vmem:[#allocation1 + $0x7] ss:$9 sm:$0xff] %v2320_v20  ;;  %v2325_v14 = vperm.slane %v4866_v31, 4  ;;  %v2326_v7 = vperm.slane %v4866_v31, 5  ;;  %v2327_v10 = vperm.slane %v4866_v31, 6  ;;  %v2328_v15 = vperm.slane %v4866_v31, 7 }
 0x2ce   : > { %1640 = vst.msk [vmem:[#allocation2 + $0x130] sm:$0xff] %vm252_vm0, %v1575_v59 }
 0x2d0   : > { %1273 = vmatmul.f32.gmra.mxu2 %v503_v1 }
 0x2d4   : > { %v4890_v62 = vld [vmem:[#allocation1] sm:$0xff] }
 0x2d5   : > { %2865 = vst [vmem:[#allocation1] ss:$9 sm:$0xff] %v2321_v51 }
 0x2d6   : > { %2866 = vst [vmem:[#allocation1 + $0x1] ss:$9 sm:$0xff] %v2322_v57 }
 0x2d7   : > { %2867 = vst [vmem:[#allocation1 + $0x2] ss:$9 sm:$0xff] %v2323_v11  ;;  %v2338_v11 = vperm.slane %v4863_v43, 1 }
 0x2d8   : > { %2868 = vst [vmem:[#allocation1 + $0x3] ss:$9 sm:$0xff] %v2324_v3  ;;  %1276 = vmatmul.f32.gmra.mxu2 %v507_v30 }
 0x2d9   : > { %2869 = vst [vmem:[#allocation1 + $0x4] ss:$9 sm:$0xff] %v2325_v14 }
 0x2da   : > { %1974 = vadd.xlane.f32.xlu0 %v1973_v60  ;;  %2870 = vst [vmem:[#allocation1 + $0x5] ss:$9 sm:$0xff] %v2326_v7 }
 0x2db   : > { %2871 = vst [vmem:[#allocation1 + $0x6] ss:$9 sm:$0xff] %v2327_v10  ;;  %v502_v10 = vld [vmem:[%s4084_s10 + $0x5c8] sm:$0xff] }
 0x2dc   : > { %2872 = vst [vmem:[#allocation1 + $0x7] ss:$9 sm:$0xff] %v2328_v15  ;;  %1064 = vmatmul.f32.gmra.mxu1 %v502_v10 }
 0x2de   : > { %1959 = vadd.xlane.f32.xlu1 %v1958_v4  ;;  %3265 = vperm.xlu2 %3799, %v4720_v40  }
 0x2e3   : > { %v3251_v58 = vpop.permute.xlu1 %3250  ;;  %v4905_v40 = vld [vmem:[#allocation1] sm:$0xff] }
 0x2e4   : > { %v3452_v60 = vperm.slane %v3251_v58, %v4876_v39  ;;  %v1961_v58 = vsel %vm252_vm0, %v1833_v54, 0.0 }
 0x2e6   : > { %v3454_v63 = vsel %vm3453_vm11, %v3452_v60, %v4845_v16  ;;  %v835_v16 = vpop.f32.mrf.mxu0  ;;  %v1703_v60 = vld [vmem:[#allocation2 + $0x110] sm:$0xff] }
 0x2e7   : > { %v3458_v9 = vsel %vm3457_vm12, %v3456_v5, %v3454_v63  ;;  %v504_v5 = vld [vmem:[%s4084_s10 + $0x5d8] sm:$0xff]  ;;  %v2339_v63 = vperm.slane %v4863_v43, 2  ;;  %v1767_v7 = vmax.f32 %v1703_v60, 0.0  ;;  %v4949_v60 = vadd.s32 4294967176, %v4640_v21 }
 0x2e8   : > { %1482 = vmatmul.f32.gmra.mxu3 %v504_v5 }
 0x2e9   : > { %v1253_v17 = vpop.f32.mrf.mxu2 }
 0x2ee   : > { %3280 = vperm.xlu0 %3800, %v4815_v32   ;;  %v838_v3 = vpop.f32.mrf.mxu0 }
 0x2ef   : > { %v1044_v24 = vpop.f32.mrf.mxu1 }
 0x2f0   : > { %v1045_v35 = vadd.f32 %v1044_v24, %v835_v16 }
 0x2f1   : > { %v1256_v16 = vpop.f32.mrf.mxu2 }
 0x2f2   : > { %v1254_v20 = vadd.f32 %v1253_v17, %v1045_v35  ;;  %v2340_v35 = vperm.slane %v4863_v43, 3 }
 0x2f4   : > { %v1463_v50 = vadd.f32 %v1462_v18, %v1254_v20  ;;  %v2341_v18 = vperm.slane %v4863_v43, 4 }
 0x2f6   : > { %v1576_v31 = vadd.f32 %v1463_v50, %v676_v22  ;;  %v2342_v22 = vperm.slane %v4863_v43, 5  ;;  %v677_v50 = vld [vmem:[#allocation2 + $0x140] sm:$0xff] }
 0x2f7   : > { %3268 = vperm.xlu1 %3798, %v4735_v6   ;;  %v1047_v14 = vpop.f32.mrf.mxu1  ;;  %v1465_v24 = vpop.f32.mrf.mxu3 }
 0x2f8   : > { %v1945_v4 = vpop.xlane.xlu2 %1944  ;;  %1641 = vst.msk [vmem:[#allocation2 + $0x138] sm:$0xff] %vm252_vm0, %v1576_v31  ;;  %v1048_v15 = vadd.f32 %v1047_v14, %v838_v3  ;;  %v2343_v31 = vperm.slane %v4863_v43, 6  ;;  %v512_v14 = vld [vmem:[%s4084_s10 + $0x618] sm:$0xff] }
 0x2f9   : > { %v2329_v26 = vperm.slane %v1945_v4, 0  ;;  %v2330_v29 = vperm.slane %v1945_v4, 1  ;;  %v2331_v32 = vperm.slane %v1945_v4, 2  ;;  %v2332_v19 = vperm.slane %v1945_v4, 3 }
 0x2fa   : > { %v2333_v6 = vperm.slane %v1945_v4, 4  ;;  %v2334_v33 = vperm.slane %v1945_v4, 5  ;;  %v2335_v12 = vperm.slane %v1945_v4, 6  ;;  %v2336_v8 = vperm.slane %v1945_v4, 7  ;;  %v4931_v4 = vpop.xlane.xlu0 %1956 }
 0x2fb   : > { %2874 = vst [vmem:[#allocation1] ss:$9 sm:$0xff] %v2329_v26  ;;  %v1257_v20 = vadd.f32 %v1256_v16, %v1048_v15  ;;  %v1835_v26 = vmul.f32 %v4791_v49, %v1767_v7 }
 0x2fc   : > { %2875 = vst [vmem:[#allocation1 + $0x1] ss:$9 sm:$0xff] %v2330_v29 }
 0x2fd   : > { %2876 = vst [vmem:[#allocation1 + $0x2] ss:$9 sm:$0xff] %v2331_v32  ;;  %v1466_v29 = vadd.f32 %v1465_v24, %v1257_v20  ;;  %v2344_v32 = vperm.slane %v4863_v43, 7  ;;  %v1967_v54 = vsel %vm252_vm0, %v1835_v26, 0.0 }
 0x2fe   : > { %2877 = vst [vmem:[#allocation1 + $0x3] ss:$9 sm:$0xff] %v2332_v19 }
 0x2ff   : > { %2878 = vst [vmem:[#allocation1 + $0x4] ss:$9 sm:$0xff] %v2333_v6  ;;  %v1708_v46 = vld [vmem:[#allocation2 + $0x138] sm:$0xff]  ;;  %v1577_v6 = vadd.f32 %v1466_v29, %v677_v50 }
 0x300   : > { %2879 = vst [vmem:[#allocation1 + $0x5] ss:$9 sm:$0xff] %v2334_v33  ;;  %v3257_v45 = vpop.permute.xlu2 %3256  ;;  %v1772_v56 = vmax.f32 %v1708_v46, 0.0  ;;  %v508_v33 = vld [vmem:[%s4084_s10 + $0x5f8] sm:$0xff] }
 0x301   : > { %2880 = vst [vmem:[#allocation1 + $0x6] ss:$9 sm:$0xff] %v2335_v12  ;;  %v3460_v51 = vperm.slane %v3257_v45, %v4908_v38  ;;  %v506_v12 = vld [vmem:[%s4084_s10 + $0x5e8] sm:$0xff]  ;;  %v1050_v45 = vpop.f32.mrf.mxu1  ;;  %1485 = vmatmul.f32.gmra.mxu3 %v508_v33  ;;  %v679_v33 = vld [vmem:[#allocation2 + $0x150] sm:$0xff] }
 0x302   : > { %2881 = vst [vmem:[#allocation1 + $0x7] ss:$9 sm:$0xff] %v2336_v8  ;;  %v1840_v57 = vmul.f32 %v4791_v49, %v1772_v56  ;;  %1067 = vmatmul.f32.gmra.mxu1 %v506_v12  ;;  %v3263_v1 = vpop.permute.xlu0 %3262 }
 0x303   : > { %v4913_v37 = vsel %vm3461_vm13, %v3460_v51, %v3458_v9  ;;  %v501_v9 = vld [vmem:[%s4084_s10 + $0x5c0] sm:$0xff]  ;;  %1642 = vst.msk [vmem:[#allocation2 + $0x140] sm:$0xff] %vm252_vm0, %v1577_v6  ;;  %v3468_v26 = vperm.slane %v3263_v1, %v4949_v60 }
 0x304   : > { %v1982_v59 = vsel %vm252_vm0, %v1840_v57, 0.0  ;;  %855 = vmatmul.f32.gmra.mxu0 %v501_v9  ;;  %v678_v57 = vld [vmem:[#allocation2 + $0x148] sm:$0xff] }
 0x305   : > { %v510_v9 = vld [vmem:[%s4084_s10 + $0x608] sm:$0xff] }
 0x307   : > { %1962 = vadd.xlane.f32.xlu2 %v1961_v58  ;;  %v841_v8 = vpop.f32.mrf.mxu0 }
 0x308   : > { %v1051_v46 = vadd.f32 %v1050_v45, %v841_v8 }
 0x309   : > { %v4926_v17 = vld [vmem:[#allocation1] sm:$0xff]  ;;  %v1259_v51 = vpop.f32.mrf.mxu2  ;;  %1488 = vmatmul.f32.gmra.mxu3 %v512_v14 }
 0x30a   : > { %2883 = vst [vmem:[#allocation1] ss:$9 sm:$0xff] %v2337_v0  ;;  %v1260_v56 = vadd.f32 %v1259_v51, %v1051_v46  ;;  %v4945_v0 = vadd.s32 4294967184, %v4640_v21  ;;  %1070 = vmatmul.f32.gmra.mxu1 %v510_v9  ;;  %v1706_v9 = vld [vmem:[#allocation2 + $0x128] sm:$0xff] }
 0x30b   : > { %2884 = vst [vmem:[#allocation1 + $0x1] ss:$9 sm:$0xff] %v2338_v11  ;;  %v511_v11 = vld [vmem:[%s4084_s10 + $0x610] sm:$0xff] }
 0x30c   : > { %2885 = vst [vmem:[#allocation1 + $0x2] ss:$9 sm:$0xff] %v2339_v63  ;;  %v1468_v43 = vpop.f32.mrf.mxu3  ;;  %858 = vmatmul.f32.gmra.mxu0 %v505_v36  ;;  %v509_v63 = vld [vmem:[%s4084_s10 + $0x600] sm:$0xff]  ;;  %1279 = vmatmul.f32.gmra.mxu2 %v511_v11 }
 0x30d   : > { %2886 = vst [vmem:[#allocation1 + $0x3] ss:$9 sm:$0xff] %v2340_v35  ;;  %v1469_v58 = vadd.f32 %v1468_v43, %v1260_v56  ;;  %v1704_v43 = vld [vmem:[#allocation2 + $0x118] sm:$0xff] }
 0x30e   : > { %2887 = vst [vmem:[#allocation1 + $0x4] ss:$9 sm:$0xff] %v2341_v18  ;;  %v4936_v19 = vpop.xlane.xlu1 %1950 }
 0x30f   : > { %2888 = vst [vmem:[#allocation1 + $0x5] ss:$9 sm:$0xff] %v2342_v22  ;;  %v2346_v5 = vperm.slane %v4936_v19, 1  ;;  %v1578_v3 = vadd.f32 %v1469_v58, %v678_v57  ;;  %v2347_v7 = vperm.slane %v4936_v19, 2  ;;  %v844_v10 = vpop.f32.mrf.mxu0  ;;  %v2348_v24 = vperm.slane %v4936_v19, 3 }
 0x310   : > { %2889 = vst [vmem:[#allocation1 + $0x6] ss:$9 sm:$0xff] %v2343_v31  ;;  %v1053_v15 = vpop.f32.mrf.mxu1  ;;  %v2349_v22 = vperm.slane %v4936_v19, 4  ;;  %v2350_v29 = vperm.slane %v4936_v19, 5  ;;  %v2351_v30 = vperm.slane %v4936_v19, 6  ;;  %v2352_v36 = vperm.slane %v4936_v19, 7 }
 0x311   : > { %2890 = vst [vmem:[#allocation1 + $0x7] ss:$9 sm:$0xff] %v2344_v32  ;;  %v1054_v18 = vadd.f32 %v1053_v15, %v844_v10  ;;  %v1262_v20 = vpop.f32.mrf.mxu2  ;;  %v515_v10 = vld [vmem:[%s4084_s10 + $0x630] sm:$0xff]  ;;  %v516_v15 = vld [vmem:[%s4084_s10 + $0x638] sm:$0xff] }
 0x312   : > { %1643 = vst.msk [vmem:[#allocation2 + $0x148] sm:$0xff] %vm252_vm0, %v1578_v3  ;;  %1491 = vmatmul.f32.gmra.mxu3 %v516_v15  ;;  %v522_v15 = vld [vmem:[%s4084_s10 + $0x668] sm:$0xff] }
 0x313   : > { %v1263_v32 = vadd.f32 %v1262_v20, %v1054_v18  ;;  %v2363_v18 = vperm.slane %v4931_v4, 2  ;;  %v513_v20 = vld [vmem:[%s4084_s10 + $0x620] sm:$0xff] }
 0x314   : > { %861 = vmatmul.f32.gmra.mxu0 %v509_v63  ;;  %v1471_v31 = vpop.f32.mrf.mxu3  ;;  %v2361_v63 = vperm.slane %v4931_v4, 0  ;;  %1282 = vmatmul.f32.gmra.mxu2 %v515_v10 }
 0x315   : > { %v1472_v8 = vadd.f32 %v1471_v31, %v1263_v32  ;;  %v2364_v31 = vperm.slane %v4931_v4, 3 }
 0x317   : > { %v1579_v45 = vadd.f32 %v1472_v8, %v679_v33  ;;  %v680_v8 = vld [vmem:[#allocation2 + $0x158] sm:$0xff] }
 0x318   : > { %1983 = vadd.xlane.f32.xlu0 %v1982_v59  ;;  %v2345_v59 = vperm.slane %v4936_v19, 0  ;;  %v4956_v16 = vld [vmem:[#allocation1] sm:$0xff] }
 0x319   : > { %2893 = vst [vmem:[#allocation1 + $0x1] ss:$9 sm:$0xff] %v2346_v5 }
 0x31a   : > { %2892 = vst [vmem:[#allocation1] ss:$9 sm:$0xff] %v2345_v59 }
 0x31b   : > { %2894 = vst [vmem:[#allocation1 + $0x2] ss:$9 sm:$0xff] %v2347_v7  ;;  %v2362_v7 = vperm.slane %v4931_v4, 1 }
 0x31c   : > { %2895 = vst [vmem:[#allocation1 + $0x3] ss:$9 sm:$0xff] %v2348_v24  ;;  %864 = vmatmul.f32.gmra.mxu0 %v513_v20 }
 0x31d   : > { %2896 = vst [vmem:[#allocation1 + $0x4] ss:$9 sm:$0xff] %v2349_v22  ;;  %v514_v22 = vld [vmem:[%s4084_s10 + $0x628] sm:$0xff] }
 0x31e   : > { %2897 = vst [vmem:[#allocation1 + $0x5] ss:$9 sm:$0xff] %v2350_v29  ;;  %1073 = vmatmul.f32.gmra.mxu1 %v514_v22  ;;  %v1265_v29 = vpop.f32.mrf.mxu2 }
 0x31f   : > { %2898 = vst [vmem:[#allocation1 + $0x6] ss:$9 sm:$0xff] %v2351_v30  ;;  %3274 = vperm.xlu2 %3799, %v4772_v2   ;;  %v1768_v2 = vmax.f32 %v1704_v43, 0.0  ;;  %v2365_v30 = vperm.slane %v4931_v4, 4 }
 0x320   : > { %2899 = vst [vmem:[#allocation1 + $0x7] ss:$9 sm:$0xff] %v2352_v36  ;;  %v2366_v36 = vperm.slane %v4931_v4, 5 }
 0x321   : > { %1968 = vadd.xlane.f32.xlu1 %v1967_v54  ;;  %1644 = vst.msk [vmem:[#allocation2 + $0x150] sm:$0xff] %vm252_vm0, %v1579_v45  ;;  %v1836_v5 = vmul.f32 %v4791_v49, %v1768_v2  ;;  %v847_v24 = vpop.f32.mrf.mxu0  ;;  %v2367_v45 = vperm.slane %v4931_v4, 6 }
 0x323   : > { %v1970_v14 = vsel %vm252_vm0, %v1836_v5, 0.0 }
 0x326   : > { %v3260_v35 = vpop.permute.xlu1 %3259 }
 0x327   : > { %v3464_v50 = vperm.slane %v3260_v35, %v4945_v0  ;;  %v4975_v56 = vld [vmem:[#allocation1] sm:$0xff]  ;;  %v1056_v35 = vpop.f32.mrf.mxu1 }
 0x328   : > { %v1711_v19 = vld [vmem:[#allocation2 + $0x150] sm:$0xff]  ;;  %v1474_v32 = vpop.f32.mrf.mxu3 }
 0x329   : > { %v3466_v6 = vsel %vm5431_vm14, %v3464_v50, %v4913_v37  ;;  %v1775_v58 = vmax.f32 %v1711_v19, 0.0  ;;  %v1057_v50 = vadd.f32 %v1056_v35, %v847_v24  ;;  %v2368_v19 = vperm.slane %v4931_v4, 7 }
 0x32a   : > { %v4969_v12 = vsel %vm3469_vm15, %v3468_v26, %v3466_v6  ;;  %v1770_v6 = vmax.f32 %v1706_v9, 0.0  ;;  %v521_v9 = vld [vmem:[%s4084_s10 + $0x660] sm:$0xff] }
 0x32b   : > { %v1266_v33 = vadd.f32 %v1265_v29, %v1057_v50 }
 0x32c   : > { %3289 = vperm.xlu0 %3800, %v4890_v62  }
 0x339   : > { %v1954_v37 = vpop.xlane.xlu2 %1953 }
 0x33a   : > { %3277 = vperm.xlu1 %3798, %v4794_v55   ;;  %v2353_v54 = vperm.slane %v1954_v37, 0  ;;  %v2354_v46 = vperm.slane %v1954_v37, 1  ;;  %v2355_v51 = vperm.slane %v1954_v37, 2  ;;  %v2356_v62 = vperm.slane %v1954_v37, 3  ;;  %v1059_v4 = vpop.f32.mrf.mxu1 }
 0x33b   : > { %v2357_v57 = vperm.slane %v1954_v37, 4  ;;  %v2358_v59 = vperm.slane %v1954_v37, 5  ;;  %v2359_v11 = vperm.slane %v1954_v37, 6  ;;  %v2360_v1 = vperm.slane %v1954_v37, 7 }
 0x33c   : > { %2901 = vst [vmem:[#allocation1] ss:$9 sm:$0xff] %v2353_v54  ;;  %v1843_v55 = vmul.f32 %v4791_v49, %v1775_v58  ;;  %v1475_v37 = vadd.f32 %v1474_v32, %v1266_v33  ;;  %v519_v54 = vld [vmem:[%s4084_s10 + $0x650] sm:$0xff]  ;;  %v5000_v58 = vpop.xlane.xlu0 %1965 }
 0x33d   : > { %2902 = vst [vmem:[#allocation1 + $0x1] ss:$9 sm:$0xff] %v2354_v46  ;;  %v520_v46 = vld [vmem:[%s4084_s10 + $0x658] sm:$0xff]  ;;  %1285 = vmatmul.f32.gmra.mxu2 %v519_v54 }
 0x33e   : > { %2903 = vst [vmem:[#allocation1 + $0x2] ss:$9 sm:$0xff] %v2355_v51  ;;  %v1991_v3 = vsel %vm252_vm0, %v1843_v55, 0.0  ;;  %v1838_v51 = vmul.f32 %v4791_v49, %v1770_v6  ;;  %v1580_v43 = vadd.f32 %v1475_v37, %v680_v8  ;;  %1494 = vmatmul.f32.gmra.mxu3 %v520_v46 }
 0x33f   : > { %2904 = vst [vmem:[#allocation1 + $0x3] ss:$9 sm:$0xff] %v2356_v62  ;;  %v517_v62 = vld [vmem:[%s4084_s10 + $0x640] sm:$0xff] }
 0x340   : > { %2905 = vst [vmem:[#allocation1 + $0x4] ss:$9 sm:$0xff] %v2357_v57  ;;  %v518_v57 = vld [vmem:[%s4084_s10 + $0x648] sm:$0xff]  ;;  %867 = vmatmul.f32.gmra.mxu0 %v517_v62  ;;  %v1976_v55 = vsel %vm252_vm0, %v1838_v51, 0.0 }
 0x341   : > { %2906 = vst [vmem:[#allocation1 + $0x5] ss:$9 sm:$0xff] %v2358_v59  ;;  %v850_v59 = vpop.f32.mrf.mxu0  ;;  %1076 = vmatmul.f32.gmra.mxu1 %v518_v57  ;;  %v682_v51 = vld [vmem:[#allocation2 + $0x168] sm:$0xff] }
 0x342   : > { %2907 = vst [vmem:[#allocation1 + $0x6] ss:$9 sm:$0xff] %v2359_v11  ;;  %v1060_v49 = vadd.f32 %v1059_v4, %v850_v59  ;;  %v1268_v11 = vpop.f32.mrf.mxu2  ;;  %v1062_v22 = vpop.f32.mrf.mxu1 }
 0x343   : > { %2908 = vst [vmem:[#allocation1 + $0x7] ss:$9 sm:$0xff] %v2360_v1  ;;  %v1477_v1 = vpop.f32.mrf.mxu3 }
 0x344   : > { %1645 = vst.msk [vmem:[#allocation2 + $0x158] sm:$0xff] %vm252_vm0, %v1580_v43  ;;  %v3272_v50 = vpop.permute.xlu0 %3271 }
 0x345   : > { %v3474_v46 = vperm.slane %v3272_v50, %v4673_v28 }
 0x348   : > { %1971 = vadd.xlane.f32.xlu2 %v1970_v14  ;;  %v523_v14 = vld [vmem:[%s4084_s10 + $0x670] sm:$0xff]  ;;  %870 = vmatmul.f32.gmra.mxu0 %v521_v9 }
 0x349   : > { %v853_v24 = vpop.f32.mrf.mxu0  ;;  %1288 = vmatmul.f32.gmra.mxu2 %v523_v14  ;;  %1079 = vmatmul.f32.gmra.mxu1 %v522_v15  ;;  %v5023_v15 = vld [vmem:[#allocation6] ss:$0 sm:$0xff] }
 0x34a   : > { %v4989_v26 = vld [vmem:[#allocation1] sm:$0xff]  ;;  %v1063_v32 = vadd.f32 %v1062_v22, %v853_v24 }
 0x34b   : > { %2910 = vst [vmem:[#allocation1] ss:$9 sm:$0xff] %v2361_v63  ;;  %v524_v63 = vld [vmem:[%s4084_s10 + $0x678] sm:$0xff]  ;;  %v1480_v8 = vpop.f32.mrf.mxu3 }
 0x34c   : > { %2911 = vst [vmem:[#allocation1 + $0x1] ss:$9 sm:$0xff] %v2362_v7  ;;  %1497 = vmatmul.f32.gmra.mxu3 %v524_v63  ;;  %v1707_v63 = vld [vmem:[#allocation2 + $0x130] sm:$0xff] }
 0x34d   : > { %2912 = vst [vmem:[#allocation1 + $0x2] ss:$9 sm:$0xff] %v2363_v18  ;;  %v3266_v18 = vpop.permute.xlu2 %3265  ;;  %v1771_v24 = vmax.f32 %v1707_v63, 0.0  ;;  %v529_v63 = vld [vmem:[%s4084_s10 + $0x6a0] sm:$0xff] }
 0x34e   : > { %2913 = vst [vmem:[#allocation1 + $0x3] ss:$9 sm:$0xff] %v2364_v31 }
 0x34f   : > { %2914 = vst [vmem:[#allocation1 + $0x4] ss:$9 sm:$0xff] %v2365_v30  ;;  %v1271_v30 = vpop.f32.mrf.mxu2  ;;  %v1839_v50 = vmul.f32 %v5023_v15, %v1771_v24 }
 0x350   : > { %2915 = vst [vmem:[#allocation1 + $0x5] ss:$9 sm:$0xff] %v2366_v36  ;;  %v681_v36 = vld [vmem:[#allocation2 + $0x160] sm:$0xff]  ;;  %v1272_v54 = vadd.f32 %v1271_v30, %v1063_v32  ;;  %v2385_v30 = vperm.slane %v5000_v58, 0 }
 0x351   : > { %2916 = vst [vmem:[#allocation1 + $0x6] ss:$9 sm:$0xff] %v2367_v45  ;;  %v1960_v2 = vpop.xlane.xlu1 %1959  ;;  %v3471_v45 = vperm.slane %v3266_v18, %v4640_v21  ;;  %v1979_v32 = vsel %vm252_vm0, %v1839_v50, 0.0 }
 0x352   : > { %2917 = vst [vmem:[#allocation1 + $0x7] ss:$9 sm:$0xff] %v2368_v19  ;;  %v2369_v5 = vperm.slane %v1960_v2, 0  ;;  %v2370_v7 = vperm.slane %v1960_v2, 1  ;;  %v2371_v10 = vperm.slane %v1960_v2, 2  ;;  %v2372_v20 = vperm.slane %v1960_v2, 3 }
 0x353   : > { %v2373_v31 = vperm.slane %v1960_v2, 4  ;;  %v2374_v6 = vperm.slane %v1960_v2, 5  ;;  %v2375_v37 = vperm.slane %v1960_v2, 6  ;;  %v1481_v57 = vadd.f32 %v1480_v8, %v1272_v54 }
 0x355   : > { %v1582_v4 = vadd.f32 %v1481_v57, %v682_v51  ;;  %v2389_v57 = vperm.slane %v5000_v58, 4 }
 0x356   : > { %1992 = vadd.xlane.f32.xlu0 %v1991_v3  ;;  %v1269_v3 = vadd.f32 %v1268_v11, %v1060_v49  ;;  %v527_v11 = vld [vmem:[%s4084_s10 + $0x690] sm:$0xff] }
 0x357   : > { %1647 = vst.msk [vmem:[#allocation2 + $0x168] sm:$0xff] %vm252_vm0, %v1582_v4  ;;  %1291 = vmatmul.f32.gmra.mxu2 %v527_v11  ;;  %v2391_v11 = vperm.slane %v5000_v58, 6 }
 0x358   : > { %v1478_v29 = vadd.f32 %v1477_v1, %v1269_v3 }
 0x359   : > { %v5008_v35 = vld [vmem:[#allocation1] sm:$0xff] }
 0x35a   : > { %2919 = vst [vmem:[#allocation1] ss:$9 sm:$0xff] %v2369_v5  ;;  %v1581_v62 = vadd.f32 %v1478_v29, %v681_v36  ;;  %v525_v36 = vld [vmem:[%s4084_s10 + $0x680] sm:$0xff] }
 0x35b   : > { %2920 = vst [vmem:[#allocation1 + $0x1] ss:$9 sm:$0xff] %v2370_v7  ;;  %873 = vmatmul.f32.gmra.mxu0 %v525_v36  ;;  %v536_v36 = vld [vmem:[%s4084_s10 + $0x6d8] sm:$0xff] }
 0x35c   : > { %2921 = vst [vmem:[#allocation1 + $0x2] ss:$9 sm:$0xff] %v2371_v10 }
 0x35d   : > { %2922 = vst [vmem:[#allocation1 + $0x3] ss:$9 sm:$0xff] %v2372_v20 }
 0x35e   : > { %2923 = vst [vmem:[#allocation1 + $0x4] ss:$9 sm:$0xff] %v2373_v31  ;;  %v1714_v49 = vld [vmem:[#allocation2 + $0x168] sm:$0xff] }
 0x35f   : > { %2924 = vst [vmem:[#allocation1 + $0x5] ss:$9 sm:$0xff] %v2374_v6  ;;  %v1778_v7 = vmax.f32 %v1714_v49, 0.0  ;;  %v2386_v6 = vperm.slane %v5000_v58, 1  ;;  %v683_v49 = vld [vmem:[#allocation2 + $0x170] sm:$0xff] }
 0x360   : > { %2925 = vst [vmem:[#allocation1 + $0x6] ss:$9 sm:$0xff] %v2375_v37  ;;  %3283 = vperm.xlu2 %3799, %v4837_v25   ;;  %v2387_v37 = vperm.slane %v5000_v58, 2 }
 0x361   : > { %1646 = vst.msk [vmem:[#allocation2 + $0x160] sm:$0xff] %vm252_vm0, %v1581_v62  ;;  %v1274_v62 = vpop.f32.mrf.mxu2 }
 0x363   : > { %876 = vmatmul.f32.gmra.mxu0 %v529_v63 }
 0x364   : > { %1977 = vadd.xlane.f32.xlu1 %v1976_v55 }
 0x369   : > { %v3269_v33 = vpop.permute.xlu1 %3268 }
 0x36a   : > { %3298 = vperm.xlu0 %3800, %v4956_v16   ;;  %v3472_v19 = vperm.slane %v3269_v33, %v4644_v23  ;;  %v2376_v16 = vperm.slane %v1960_v2, 7  ;;  %v528_v33 = vld [vmem:[%s4084_s10 + $0x698] sm:$0xff] }
 0x36b   : > { %1500 = vmatmul.f32.gmra.mxu3 %v528_v33  ;;  %v1483_v4 = vpop.f32.mrf.mxu3 }
 0x36c   : > { %v3473_v43 = vsel %vm3413_vm1, %v3472_v19, %v3471_v45  ;;  %2926 = vst [vmem:[#allocation1 + $0x7] ss:$9 sm:$0xff] %v2376_v16  ;;  %v1065_v45 = vpop.f32.mrf.mxu1  ;;  %v526_v19 = vld [vmem:[%s4084_s10 + $0x688] sm:$0xff]  ;;  %v2388_v16 = vperm.slane %v5000_v58, 3 }
 0x36d   : > { %v3475_v59 = vsel %vm3417_vm2, %v3474_v46, %v3473_v43  ;;  %v531_v46 = vld [vmem:[%s4084_s10 + $0x6b0] sm:$0xff]  ;;  %v1709_v43 = vld [vmem:[#allocation2 + $0x140] sm:$0xff]  ;;  %1082 = vmatmul.f32.gmra.mxu1 %v526_v19  ;;  %v534_v19 = vld [vmem:[%s4084_s10 + $0x6c8] sm:$0xff] }
 0x36e   : > { %1294 = vmatmul.f32.gmra.mxu2 %v531_v46 }
 0x373   : > { %v5021_v3 = vld [vmem:[#allocation1] sm:$0xff] }
 0x37a   : > { %v1963_v2 = vpop.xlane.xlu2 %1962 }
 0x37b   : > { %v2377_v1 = vperm.slane %v1963_v2, 0  ;;  %v2378_v55 = vperm.slane %v1963_v2, 1  ;;  %v2379_v5 = vperm.slane %v1963_v2, 2  ;;  %v2380_v14 = vperm.slane %v1963_v2, 3 }
 0x37c   : > { %v2381_v25 = vperm.slane %v1963_v2, 4  ;;  %v2382_v9 = vperm.slane %v1963_v2, 5  ;;  %v2383_v10 = vperm.slane %v1963_v2, 6  ;;  %v2384_v18 = vperm.slane %v1963_v2, 7 }
 0x37d   : > { %3286 = vperm.xlu1 %3798, %v4858_v52   ;;  %2928 = vst [vmem:[#allocation1] ss:$9 sm:$0xff] %v2377_v1  ;;  %v1846_v52 = vmul.f32 %v5023_v15, %v1778_v7  ;;  %v2390_v2 = vperm.slane %v5000_v58, 5  ;;  %v1773_v1 = vmax.f32 %v1709_v43, 0.0  ;;  %v530_v7 = vld [vmem:[%s4084_s10 + $0x6a8] sm:$0xff] }
 0x37e   : > { %2929 = vst [vmem:[#allocation1 + $0x1] ss:$9 sm:$0xff] %v2378_v55  ;;  %1085 = vmatmul.f32.gmra.mxu1 %v530_v7 }
 0x37f   : > { %2930 = vst [vmem:[#allocation1 + $0x2] ss:$9 sm:$0xff] %v2379_v5  ;;  %v2000_v20 = vsel %vm252_vm0, %v1846_v52, 0.0  ;;  %v2392_v5 = vperm.slane %v5000_v58, 7  ;;  %v1068_v52 = vpop.f32.mrf.mxu1  ;;  %v1841_v24 = vmul.f32 %v5023_v15, %v1773_v1  ;;  %v1277_v58 = vpop.f32.mrf.mxu2 }
 0x380   : > { %2931 = vst [vmem:[#allocation1 + $0x3] ss:$9 sm:$0xff] %v2380_v14  ;;  %v532_v14 = vld [vmem:[%s4084_s10 + $0x6b8] sm:$0xff] }
 0x381   : > { %2932 = vst [vmem:[#allocation1 + $0x4] ss:$9 sm:$0xff] %v2381_v25  ;;  %v856_v8 = vpop.f32.mrf.mxu0  ;;  %1503 = vmatmul.f32.gmra.mxu3 %v532_v14 }
 0x382   : > { %2933 = vst [vmem:[#allocation1 + $0x5] ss:$9 sm:$0xff] %v2382_v9  ;;  %v3275_v22 = vpop.permute.xlu2 %3274  ;;  %v1066_v54 = vadd.f32 %v1065_v45, %v856_v8  ;;  %v535_v9 = vld [vmem:[%s4084_s10 + $0x6d0] sm:$0xff]  ;;  %v533_v8 = vld [vmem:[%s4084_s10 + $0x6c0] sm:$0xff] }
 0x383   : > { %2934 = vst [vmem:[#allocation1 + $0x6] ss:$9 sm:$0xff] %v2383_v10  ;;  %v3476_v31 = vperm.slane %v3275_v22, %v4726_v53  ;;  %1297 = vmatmul.f32.gmra.mxu2 %v535_v9  ;;  %879 = vmatmul.f32.gmra.mxu0 %v533_v8 }
 0x384   : > { %2935 = vst [vmem:[#allocation1 + $0x7] ss:$9 sm:$0xff] %v2384_v18 }
 0x385   : > { %v5030_v29 = vsel %vm3421_vm3, %v3476_v31, %v3475_v59  ;;  %v1275_v59 = vadd.f32 %v1274_v62, %v1066_v54  ;;  %v1486_v31 = vpop.f32.mrf.mxu3 }
 0x386   : > { %1088 = vmatmul.f32.gmra.mxu1 %v534_v19 }
 0x387   : > { %v1484_v55 = vadd.f32 %v1483_v4, %v1275_v59 }
 0x389   : > { %1980 = vadd.xlane.f32.xlu2 %v1979_v32  ;;  %v1583_v25 = vadd.f32 %v1484_v55, %v683_v49  ;;  %v859_v10 = vpop.f32.mrf.mxu0  ;;  %v684_v32 = vld [vmem:[#allocation2 + $0x178] sm:$0xff]  ;;  %1506 = vmatmul.f32.gmra.mxu3 %v536_v36  ;;  %v685_v55 = vld [vmem:[#allocation2 + $0x180] sm:$0xff] }
 0x38a   : > { %v1069_v18 = vadd.f32 %v1068_v52, %v859_v10 }
 0x38b   : > { %v5041_v51 = vld [vmem:[#allocation1] sm:$0xff]  ;;  %1648 = vst.msk [vmem:[#allocation2 + $0x170] sm:$0xff] %vm252_vm0, %v1583_v25 }
 0x38c   : > { %2937 = vst [vmem:[#allocation1] ss:$9 sm:$0xff] %v2385_v30  ;;  %v1278_v50 = vadd.f32 %v1277_v58, %v1069_v18  ;;  %v1985_v30 = vsel %vm252_vm0, %v1841_v24, 0.0  ;;  %v539_v58 = vld [vmem:[%s4084_s10 + $0x6f0] sm:$0xff] }
 0x38d   : > { %2938 = vst [vmem:[#allocation1 + $0x1] ss:$9 sm:$0xff] %v2386_v6  ;;  %v1489_v49 = vpop.f32.mrf.mxu3  ;;  %1300 = vmatmul.f32.gmra.mxu2 %v539_v58 }
 0x38e   : > { %2939 = vst [vmem:[#allocation1 + $0x2] ss:$9 sm:$0xff] %v2387_v37  ;;  %v1487_v6 = vadd.f32 %v1486_v31, %v1278_v50 }
 0x38f   : > { %2940 = vst [vmem:[#allocation1 + $0x3] ss:$9 sm:$0xff] %v2388_v16  ;;  %v1071_v16 = vpop.f32.mrf.mxu1  ;;  %v1280_v4 = vpop.f32.mrf.mxu2 }
 0x390   : > { %2941 = vst [vmem:[#allocation1 + $0x4] ss:$9 sm:$0xff] %v2389_v57  ;;  %v1584_v37 = vadd.f32 %v1487_v6, %v684_v32  ;;  %v540_v32 = vld [vmem:[%s4084_s10 + $0x6f8] sm:$0xff]  ;;  %v1710_v6 = vld [vmem:[#allocation2 + $0x148] sm:$0xff] }
 0x391   : > { %2942 = vst [vmem:[#allocation1 + $0x5] ss:$9 sm:$0xff] %v2390_v2  ;;  %v862_v46 = vpop.f32.mrf.mxu0  ;;  %1509 = vmatmul.f32.gmra.mxu3 %v540_v32  ;;  %v1774_v19 = vmax.f32 %v1710_v6, 0.0 }
 0x392   : > { %2943 = vst [vmem:[#allocation1 + $0x6] ss:$9 sm:$0xff] %v2391_v11  ;;  %v1072_v57 = vadd.f32 %v1071_v16, %v862_v46 }
 0x393   : > { %2944 = vst [vmem:[#allocation1 + $0x7] ss:$9 sm:$0xff] %v2392_v5 }
 0x394   : > { %2001 = vadd.xlane.f32.xlu0 %v2000_v20  ;;  %v5052_v20 = vpop.xlane.xlu0 %1974  ;;  %v1969_v22 = vpop.xlane.xlu1 %1968  ;;  %1649 = vst.msk [vmem:[#allocation2 + $0x178] sm:$0xff] %vm252_vm0, %v1584_v37 }
 0x395   : > { %v2393_v33 = vperm.slane %v1969_v22, 0  ;;  %v2394_v45 = vperm.slane %v1969_v22, 1  ;;  %v2395_v54 = vperm.slane %v1969_v22, 2  ;;  %v2396_v62 = vperm.slane %v1969_v22, 3 }
 0x396   : > { %v2397_v59 = vperm.slane %v1969_v22, 4  ;;  %v2398_v2 = vperm.slane %v1969_v22, 5  ;;  %v2399_v1 = vperm.slane %v1969_v22, 6  ;;  %v2400_v5 = vperm.slane %v1969_v22, 7 }
 0x397   : > { %v2414_v58 = vperm.slane %v5052_v20, 5  ;;  %v2416_v6 = vperm.slane %v5052_v20, 7 }
 0x39a   : > { %v5060_v43 = vld [vmem:[#allocation1] sm:$0xff] }
 0x39b   : > { %2946 = vst [vmem:[#allocation1] ss:$9 sm:$0xff] %v2393_v33  ;;  %v538_v33 = vld [vmem:[%s4084_s10 + $0x6e8] sm:$0xff] }
 0x39c   : > { %2947 = vst [vmem:[#allocation1 + $0x1] ss:$9 sm:$0xff] %v2394_v45  ;;  %v3281_v11 = vpop.permute.xlu0 %3280  ;;  %1091 = vmatmul.f32.gmra.mxu1 %v538_v33  ;;  %v547_v33 = vld [vmem:[%s4084_s10 + $0x730] sm:$0xff] }
 0x39d   : > { %2948 = vst [vmem:[#allocation1 + $0x2] ss:$9 sm:$0xff] %v2395_v54  ;;  %v3480_v7 = vperm.slane %v3281_v11, %v4775_v27 }
 0x39e   : > { %2949 = vst [vmem:[#allocation1 + $0x3] ss:$9 sm:$0xff] %v2396_v62  ;;  %v1842_v62 = vmul.f32 %v5023_v15, %v1774_v19  ;;  %v546_v19 = vld [vmem:[%s4084_s10 + $0x728] sm:$0xff] }
 0x39f   : > { %2950 = vst [vmem:[#allocation1 + $0x4] ss:$9 sm:$0xff] %v2397_v59 }
 0x3a0   : > { %2951 = vst [vmem:[#allocation1 + $0x5] ss:$9 sm:$0xff] %v2398_v2  ;;  %v865_v2 = vpop.f32.mrf.mxu0 }
 0x3a1   : > { %2952 = vst [vmem:[#allocation1 + $0x6] ss:$9 sm:$0xff] %v2399_v1  ;;  %3292 = vperm.xlu2 %3799, %v4905_v40   ;;  %v2410_v1 = vperm.slane %v5052_v20, 1 }
 0x3a2   : > { %2953 = vst [vmem:[#allocation1 + $0x7] ss:$9 sm:$0xff] %v2400_v5  ;;  %v2411_v5 = vperm.slane %v5052_v20, 2 }
 0x3a7   : > { %1986 = vadd.xlane.f32.xlu1 %v1985_v30  ;;  %v537_v30 = vld [vmem:[%s4084_s10 + $0x6e0] sm:$0xff] }
 0x3a8   : > { %3307 = vperm.xlu0 %3800, %v5008_v35   ;;  %v1281_v35 = vadd.f32 %v1280_v4, %v1072_v57  ;;  %882 = vmatmul.f32.gmra.mxu0 %v537_v30  ;;  %v1988_v4 = vsel %vm252_vm0, %v1842_v62, 0.0  ;;  %v5105_v62 = vpop.xlane.xlu0 %1983 }
 0x3aa   : > { %v1490_v63 = vadd.f32 %v1489_v49, %v1281_v35  ;;  %v1074_v35 = vpop.f32.mrf.mxu1  ;;  %v2409_v49 = vperm.slane %v5052_v20, 0 }
 0x3ab   : > { %v1075_v11 = vadd.f32 %v1074_v35, %v865_v2 }
 0x3ac   : > { %v3278_v14 = vpop.permute.xlu1 %3277  ;;  %v1585_v9 = vadd.f32 %v1490_v63, %v685_v55  ;;  %v543_v55 = vld [vmem:[%s4084_s10 + $0x710] sm:$0xff]  ;;  %v2412_v63 = vperm.slane %v5052_v20, 3 }
 0x3ad   : > { %v3478_v25 = vperm.slane %v3278_v14, %v4731_v61  ;;  %1303 = vmatmul.f32.gmra.mxu2 %v543_v55  ;;  %v544_v14 = vld [vmem:[%s4084_s10 + $0x718] sm:$0xff] }
 0x3ae   : > { %1650 = vst.msk [vmem:[#allocation2 + $0x180] sm:$0xff] %vm252_vm0, %v1585_v9  ;;  %1512 = vmatmul.f32.gmra.mxu3 %v544_v14  ;;  %v541_v9 = vld [vmem:[%s4084_s10 + $0x700] sm:$0xff] }
 0x3af   : > { %v3479_v10 = vsel %vm3425_vm4, %v3478_v25, %v5030_v29  ;;  %v5074_v29 = vld [vmem:[#allocation1] sm:$0xff] }
 0x3b0   : > { %v3481_v52 = vsel %vm3429_vm5, %v3480_v7, %v3479_v10  ;;  %v1283_v7 = vpop.f32.mrf.mxu2  ;;  %v542_v10 = vld [vmem:[%s4084_s10 + $0x708] sm:$0xff]  ;;  %885 = vmatmul.f32.gmra.mxu0 %v541_v9 }
 0x3b1   : > { %1094 = vmatmul.f32.gmra.mxu1 %v542_v10 }
 0x3b5   : > { %v1717_v18 = vld [vmem:[#allocation2 + $0x180] sm:$0xff]  ;;  %1306 = vmatmul.f32.gmra.mxu2 %v547_v33 }
 0x3b6   : > { %v1781_v8 = vmax.f32 %v1717_v18, 0.0  ;;  %v1492_v18 = vpop.f32.mrf.mxu3 }
 0x3b8   : > { %v1849_v37 = vmul.f32 %v5023_v15, %v1781_v8 }
 0x3b9   : > { %1097 = vmatmul.f32.gmra.mxu1 %v546_v19 }
 0x3ba   : > { %v2009_v46 = vsel %vm252_vm0, %v1849_v37, 0.0  ;;  %v545_v37 = vld [vmem:[%s4084_s10 + $0x720] sm:$0xff] }
 0x3bb   : > { %v1972_v24 = vpop.xlane.xlu2 %1971  ;;  %888 = vmatmul.f32.gmra.mxu0 %v545_v37 }
 0x3bc   : > { %v2401_v22 = vperm.slane %v1972_v24, 0  ;;  %v2402_v50 = vperm.slane %v1972_v24, 1  ;;  %v2403_v31 = vperm.slane %v1972_v24, 2  ;;  %v2404_v40 = vperm.slane %v1972_v24, 3 }
 0x3bd   : > { %v2405_v36 = vperm.slane %v1972_v24, 4  ;;  %v2407_v45 = vperm.slane %v1972_v24, 6  ;;  %v2408_v54 = vperm.slane %v1972_v24, 7  ;;  %v868_v30 = vpop.f32.mrf.mxu0 }
 0x3be   : > { %2955 = vst [vmem:[#allocation1] ss:$9 sm:$0xff] %v2401_v22  ;;  %v1712_v22 = vld [vmem:[#allocation2 + $0x158] sm:$0xff] }
 0x3bf   : > { %2956 = vst [vmem:[#allocation1 + $0x1] ss:$9 sm:$0xff] %v2402_v50  ;;  %v686_v50 = vld [vmem:[#allocation2 + $0x188] sm:$0xff] }
 0x3c0   : > { %3295 = vperm.xlu1 %3798, %v4926_v17   ;;  %v2406_v17 = vperm.slane %v1972_v24, 5  ;;  %2957 = vst [vmem:[#allocation1 + $0x2] ss:$9 sm:$0xff] %v2403_v31  ;;  %v1284_v24 = vadd.f32 %v1283_v7, %v1075_v11  ;;  %v2415_v31 = vperm.slane %v5052_v20, 6 }
 0x3c1   : > { %2958 = vst [vmem:[#allocation1 + $0x3] ss:$9 sm:$0xff] %v2404_v40  ;;  %v1077_v40 = vpop.f32.mrf.mxu1 }
 0x3c2   : > { %2959 = vst [vmem:[#allocation1 + $0x4] ss:$9 sm:$0xff] %v2405_v36  ;;  %v1493_v32 = vadd.f32 %v1492_v18, %v1284_v24  ;;  %v1776_v36 = vmax.f32 %v1712_v22, 0.0  ;;  %v688_v22 = vld [vmem:[#allocation2 + $0x198] sm:$0xff] }
 0x3c3   : > { %2960 = vst [vmem:[#allocation1 + $0x5] ss:$9 sm:$0xff] %v2406_v17  ;;  %v3284_v16 = vpop.permute.xlu2 %3283  ;;  %v1078_v17 = vadd.f32 %v1077_v40, %v868_v30 }
 0x3c4   : > { %2961 = vst [vmem:[#allocation1 + $0x6] ss:$9 sm:$0xff] %v2407_v45  ;;  %v3482_v57 = vperm.slane %v3284_v16, %v4778_v13  ;;  %v1586_v8 = vadd.f32 %v1493_v32, %v686_v50  ;;  %v548_v45 = vld [vmem:[%s4084_s10 + $0x738] sm:$0xff]  ;;  %v1495_v16 = vpop.f32.mrf.mxu3  ;;  %v3290_v32 = vpop.permute.xlu0 %3289 }
 0x3c5   : > { %2962 = vst [vmem:[#allocation1 + $0x7] ss:$9 sm:$0xff] %v2408_v54  ;;  %v1286_v54 = vpop.f32.mrf.mxu2  ;;  %1515 = vmatmul.f32.gmra.mxu3 %v548_v45  ;;  %v871_v35 = vpop.f32.mrf.mxu0  ;;  %v3486_v33 = vperm.slane %v3290_v32, %v4820_v44  ;;  %v2434_v32 = vperm.slane %v5105_v62, 1 }
 0x3c6   : > { %v5082_v59 = vsel %vm3433_vm6, %v3482_v57, %v3481_v52  ;;  %v2413_v52 = vperm.slane %v5052_v20, 4  ;;  %1651 = vst.msk [vmem:[#allocation2 + $0x188] sm:$0xff] %vm252_vm0, %v1586_v8  ;;  %v1287_v20 = vadd.f32 %v1286_v54, %v1078_v17  ;;  %v687_v57 = vld [vmem:[#allocation2 + $0x190] sm:$0xff]  ;;  %v552_v54 = vld [vmem:[%s4084_s10 + $0x758] sm:$0xff] }
 0x3c8   : > { %v1496_v2 = vadd.f32 %v1495_v16, %v1287_v20 }
 0x3c9   : > { %v1080_v11 = vpop.f32.mrf.mxu1 }
 0x3ca   : > { %1989 = vadd.xlane.f32.xlu2 %v1988_v4  ;;  %v1081_v14 = vadd.f32 %v1080_v11, %v871_v35 }
 0x3cc   : > { %v5091_v25 = vld [vmem:[#allocation1] sm:$0xff] }
 0x3cd   : > { %2964 = vst [vmem:[#allocation1] ss:$9 sm:$0xff] %v2409_v49  ;;  %1518 = vmatmul.f32.gmra.mxu3 %v552_v54 }
 0x3ce   : > { %2965 = vst [vmem:[#allocation1 + $0x1] ss:$9 sm:$0xff] %v2410_v1 }
 0x3cf   : > { %2966 = vst [vmem:[#allocation1 + $0x2] ss:$9 sm:$0xff] %v2411_v5  ;;  %v1587_v5 = vadd.f32 %v1496_v2, %v687_v57  ;;  %v1498_v18 = vpop.f32.mrf.mxu3  ;;  %v550_v57 = vld [vmem:[%s4084_s10 + $0x748] sm:$0xff] }
 0x3d0   : > { %2967 = vst [vmem:[#allocation1 + $0x3] ss:$9 sm:$0xff] %v2412_v63  ;;  %1100 = vmatmul.f32.gmra.mxu1 %v550_v57 }
 0x3d1   : > { %2968 = vst [vmem:[#allocation1 + $0x4] ss:$9 sm:$0xff] %v2413_v52 }
 0x3d2   : > { %2010 = vadd.xlane.f32.xlu0 %v2009_v46  ;;  %2969 = vst [vmem:[#allocation1 + $0x5] ss:$9 sm:$0xff] %v2414_v58  ;;  %v1844_v46 = vmul.f32 %v5023_v15, %v1776_v36 }
 0x3d3   : > { %2970 = vst [vmem:[#allocation1 + $0x6] ss:$9 sm:$0xff] %v2415_v31 }
 0x3d4   : > { %2971 = vst [vmem:[#allocation1 + $0x7] ss:$9 sm:$0xff] %v2416_v6  ;;  %v1994_v55 = vsel %vm252_vm0, %v1844_v46, 0.0 }
 0x3d5   : > { %1652 = vst.msk [vmem:[#allocation2 + $0x190] sm:$0xff] %vm252_vm0, %v1587_v5 }
 0x3d7   : > { %v1978_v4 = vpop.xlane.xlu1 %1977 }
 0x3d8   : > { %v2417_v49 = vperm.slane %v1978_v4, 0  ;;  %v2418_v1 = vperm.slane %v1978_v4, 1  ;;  %v2419_v63 = vperm.slane %v1978_v4, 2  ;;  %v2420_v9 = vperm.slane %v1978_v4, 3 }
 0x3d9   : > { %v2421_v10 = vperm.slane %v1978_v4, 4  ;;  %v2422_v52 = vperm.slane %v1978_v4, 5  ;;  %v2423_v58 = vperm.slane %v1978_v4, 6  ;;  %v2424_v50 = vperm.slane %v1978_v4, 7 }
 0x3db   : > { %v5109_v7 = vld [vmem:[#allocation1] sm:$0xff] }
 0x3dc   : > { %2973 = vst [vmem:[#allocation1] ss:$9 sm:$0xff] %v2417_v49 }
 0x3dd   : > { %2974 = vst [vmem:[#allocation1 + $0x1] ss:$9 sm:$0xff] %v2418_v1 }
 0x3de   : > { %2975 = vst [vmem:[#allocation1 + $0x2] ss:$9 sm:$0xff] %v2419_v63  ;;  %v556_v63 = vld [vmem:[%s4084_s10 + $0x778] sm:$0xff] }
 0x3df   : > { %2976 = vst [vmem:[#allocation1 + $0x3] ss:$9 sm:$0xff] %v2420_v9  ;;  %1521 = vmatmul.f32.gmra.mxu3 %v556_v63 }
 0x3e0   : > { %2977 = vst [vmem:[#allocation1 + $0x4] ss:$9 sm:$0xff] %v2421_v10 }
 0x3e1   : > { %2978 = vst [vmem:[#allocation1 + $0x5] ss:$9 sm:$0xff] %v2422_v52 }
 0x3e2   : > { %2979 = vst [vmem:[#allocation1 + $0x6] ss:$9 sm:$0xff] %v2423_v58  ;;  %3301 = vperm.xlu2 %3799, %v4975_v56   ;;  %v551_v56 = vld [vmem:[%s4084_s10 + $0x750] sm:$0xff] }
 0x3e3   : > { %2980 = vst [vmem:[#allocation1 + $0x7] ss:$9 sm:$0xff] %v2424_v50  ;;  %1309 = vmatmul.f32.gmra.mxu2 %v551_v56 }
 0x3e6   : > { %3316 = vperm.xlu0 %3800, %v5060_v43   ;;  %v1289_v43 = vpop.f32.mrf.mxu2 }
 0x3e7   : > { %v1290_v24 = vadd.f32 %v1289_v43, %v1081_v14  ;;  %v555_v14 = vld [vmem:[%s4084_s10 + $0x770] sm:$0xff] }
 0x3e9   : > { %v1499_v31 = vadd.f32 %v1498_v18, %v1290_v24  ;;  %v874_v18 = vpop.f32.mrf.mxu0 }
 0x3ea   : > { %1995 = vadd.xlane.f32.xlu1 %v1994_v55  ;;  %v5125_v4 = vld [vmem:[#allocation1] sm:$0xff] }
 0x3eb   : > { %v1588_v40 = vadd.f32 %v1499_v31, %v688_v22  ;;  %1312 = vmatmul.f32.gmra.mxu2 %v555_v14  ;;  %v1083_v22 = vpop.f32.mrf.mxu1  ;;  %v2433_v31 = vperm.slane %v5105_v62, 0  ;;  %v690_v14 = vld [vmem:[#allocation2 + $0x1a8] sm:$0xff] }
 0x3ec   : > { %v1084_v50 = vadd.f32 %v1083_v22, %v874_v18  ;;  %v5155_v22 = vpop.xlane.xlu0 %1992 }
 0x3ed   : > { %1653 = vst.msk [vmem:[#allocation2 + $0x198] sm:$0xff] %vm252_vm0, %v1588_v40  ;;  %v553_v40 = vld [vmem:[%s4084_s10 + $0x760] sm:$0xff] }
 0x3ee   : > { %v1292_v43 = vpop.f32.mrf.mxu2 }
 0x3ef   : > { %v3287_v30 = vpop.permute.xlu1 %3286 }
 0x3f0   : > { %v3484_v6 = vperm.slane %v3287_v30, %v4787_v42  ;;  %v1293_v30 = vadd.f32 %v1292_v43, %v1084_v50 }
 0x3f2   : > { %v3485_v36 = vsel %vm3437_vm7, %v3484_v6, %v5082_v59  ;;  %v549_v59 = vld [vmem:[%s4084_s10 + $0x740] sm:$0xff]  ;;  %v554_v6 = vld [vmem:[%s4084_s10 + $0x768] sm:$0xff] }
 0x3f3   : > { %v3487_v8 = vsel %vm3441_vm8, %v3486_v33, %v3485_v36  ;;  %891 = vmatmul.f32.gmra.mxu0 %v549_v59  ;;  %v2435_v33 = vperm.slane %v5105_v62, 2  ;;  %1103 = vmatmul.f32.gmra.mxu1 %v554_v6  ;;  %v559_v36 = vld [vmem:[%s4084_s10 + $0x790] sm:$0xff]  ;;  %v2439_v59 = vperm.slane %v5105_v62, 6 }
 0x3f4   : > { %v1720_v17 = vld [vmem:[#allocation2 + $0x198] sm:$0xff]  ;;  %1315 = vmatmul.f32.gmra.mxu2 %v559_v36 }
 0x3f5   : > { %v1784_v45 = vmax.f32 %v1720_v17, 0.0  ;;  %v2436_v17 = vperm.slane %v5105_v62, 3 }
 0x3f6   : > { %v1295_v54 = vpop.f32.mrf.mxu2 }
 0x3f7   : > { %v1852_v19 = vmul.f32 %v5023_v15, %v1784_v45 }
 0x3f9   : > { %v2018_v49 = vsel %vm252_vm0, %v1852_v19, 0.0  ;;  %v2437_v19 = vperm.slane %v5105_v62, 4 }
 0x3fb   : > { %894 = vmatmul.f32.gmra.mxu0 %v553_v40  ;;  %v1086_v57 = vpop.f32.mrf.mxu1 }
 0x3fc   : > { %v1981_v37 = vpop.xlane.xlu2 %1980 }
 0x3fd   : > { %v2425_v46 = vperm.slane %v1981_v37, 0  ;;  %v2426_v20 = vperm.slane %v1981_v37, 1  ;;  %v2427_v16 = vperm.slane %v1981_v37, 2  ;;  %v2428_v2 = vperm.slane %v1981_v37, 3 }
 0x3fe   : > { %v2429_v35 = vperm.slane %v1981_v37, 4  ;;  %v2430_v11 = vperm.slane %v1981_v37, 5  ;;  %v2431_v1 = vperm.slane %v1981_v37, 6  ;;  %v2432_v5 = vperm.slane %v1981_v37, 7  ;;  %v1501_v37 = vpop.f32.mrf.mxu3 }
 0x3ff   : > { %2982 = vst [vmem:[#allocation1] ss:$9 sm:$0xff] %v2425_v46  ;;  %v1502_v56 = vadd.f32 %v1501_v37, %v1293_v30  ;;  %v2438_v46 = vperm.slane %v5105_v62, 5  ;;  %v691_v37 = vld [vmem:[#allocation2 + $0x1b0] sm:$0xff] }
 0x400   : > { %2983 = vst [vmem:[#allocation1 + $0x1] ss:$9 sm:$0xff] %v2426_v20  ;;  %v689_v20 = vld [vmem:[#allocation2 + $0x1a0] sm:$0xff] }
 0x401   : > { %2984 = vst [vmem:[#allocation1 + $0x2] ss:$9 sm:$0xff] %v2427_v16  ;;  %v877_v16 = vpop.f32.mrf.mxu0 }
 0x402   : > { %2985 = vst [vmem:[#allocation1 + $0x3] ss:$9 sm:$0xff] %v2428_v2  ;;  %v2440_v2 = vperm.slane %v5105_v62, 7 }
 0x403   : > { %3304 = vperm.xlu1 %3798, %v4989_v26   ;;  %v1713_v26 = vld [vmem:[#allocation2 + $0x160] sm:$0xff]  ;;  %2986 = vst [vmem:[#allocation1 + $0x4] ss:$9 sm:$0xff] %v2429_v35  ;;  %v1715_v35 = vld [vmem:[#allocation2 + $0x170] sm:$0xff]  ;;  %v1089_v18 = vpop.f32.mrf.mxu1 }
 0x404   : > { %v1777_v55 = vmax.f32 %v1713_v26, 0.0  ;;  %2987 = vst [vmem:[#allocation1 + $0x5] ss:$9 sm:$0xff] %v2430_v11  ;;  %v3293_v9 = vpop.permute.xlu2 %3292  ;;  %v1087_v26 = vadd.f32 %v1086_v57, %v877_v16  ;;  %v558_v11 = vld [vmem:[%s4084_s10 + $0x788] sm:$0xff] }
 0x405   : > { %2988 = vst [vmem:[#allocation1 + $0x6] ss:$9 sm:$0xff] %v2431_v1  ;;  %v3488_v52 = vperm.slane %v3293_v9, %v4824_v47  ;;  %v1589_v1 = vadd.f32 %v1502_v56, %v689_v20  ;;  %1106 = vmatmul.f32.gmra.mxu1 %v558_v11  ;;  %v3299_v20 = vpop.permute.xlu0 %3298 }
 0x406   : > { %v1845_v10 = vmul.f32 %v5023_v15, %v1777_v55  ;;  %2989 = vst [vmem:[#allocation1 + $0x7] ss:$9 sm:$0xff] %v2432_v5  ;;  %v1296_v55 = vadd.f32 %v1295_v54, %v1087_v26  ;;  %v1779_v5 = vmax.f32 %v1715_v35, 0.0  ;;  %v1504_v63 = vpop.f32.mrf.mxu3  ;;  %v3492_v57 = vperm.slane %v3299_v20, %v4876_v39 }
 0x407   : > { %v5133_v24 = vsel %vm3445_vm9, %v3488_v52, %v3487_v8  ;;  %v560_v8 = vld [vmem:[%s4084_s10 + $0x798] sm:$0xff]  ;;  %1654 = vst.msk [vmem:[#allocation2 + $0x1a0] sm:$0xff] %vm252_vm0, %v1589_v1 }
 0x408   : > { %v1997_v58 = vsel %vm252_vm0, %v1845_v10, 0.0  ;;  %1524 = vmatmul.f32.gmra.mxu3 %v560_v8  ;;  %v1505_v62 = vadd.f32 %v1504_v63, %v1296_v55  ;;  %v1847_v43 = vmul.f32 %v5023_v15, %v1779_v5  ;;  %v563_v55 = vld [vmem:[%s4084_s10 + $0x7b0] sm:$0xff]  ;;  %v564_v5 = vld [vmem:[%s4084_s10 + $0x7b8] sm:$0xff] }
 0x409   : > { %v880_v10 = vpop.f32.mrf.mxu0  ;;  %1318 = vmatmul.f32.gmra.mxu2 %v563_v55  ;;  %v571_v55 = vld [vmem:[%s4084_s10 + $0x7f0] sm:$0xff] }
 0x40a   : > { %v1590_v52 = vadd.f32 %v1505_v62, %v690_v14 }
 0x40b   : > { %1998 = vadd.xlane.f32.xlu2 %v1997_v58  ;;  %v1298_v58 = vpop.f32.mrf.mxu2 }
 0x40c   : > { %1655 = vst.msk [vmem:[#allocation2 + $0x1a8] sm:$0xff] %vm252_vm0, %v1590_v52 }
 0x40d   : > { %v5144_v45 = vld [vmem:[#allocation1] sm:$0xff] }
 0x40e   : > { %2991 = vst [vmem:[#allocation1] ss:$9 sm:$0xff] %v2433_v31  ;;  %v1090_v31 = vadd.f32 %v1089_v18, %v880_v10  ;;  %v1507_v8 = vpop.f32.mrf.mxu3 }
 0x40f   : > { %2992 = vst [vmem:[#allocation1 + $0x1] ss:$9 sm:$0xff] %v2434_v32 }
 0x410   : > { %2019 = vadd.xlane.f32.xlu0 %v2018_v49  ;;  %2993 = vst [vmem:[#allocation1 + $0x2] ss:$9 sm:$0xff] %v2435_v33  ;;  %v557_v49 = vld [vmem:[%s4084_s10 + $0x780] sm:$0xff]  ;;  %v1299_v30 = vadd.f32 %v1298_v58, %v1090_v31  ;;  %v2003_v33 = vsel %vm252_vm0, %v1847_v43, 0.0  ;;  %1527 = vmatmul.f32.gmra.mxu3 %v564_v5  ;;  %v572_v5 = vld [vmem:[%s4084_s10 + $0x7f8] sm:$0xff] }
 0x411   : > { %2994 = vst [vmem:[#allocation1 + $0x3] ss:$9 sm:$0xff] %v2436_v17  ;;  %897 = vmatmul.f32.gmra.mxu0 %v557_v49 }
 0x412   : > { %2995 = vst [vmem:[#allocation1 + $0x4] ss:$9 sm:$0xff] %v2437_v19  ;;  %v1508_v19 = vadd.f32 %v1507_v8, %v1299_v30 }
 0x413   : > { %2996 = vst [vmem:[#allocation1 + $0x5] ss:$9 sm:$0xff] %v2438_v46 }
 0x414   : > { %2997 = vst [vmem:[#allocation1 + $0x6] ss:$9 sm:$0xff] %v2439_v59  ;;  %v1591_v46 = vadd.f32 %v1508_v19, %v691_v37 }
 0x415   : > { %2998 = vst [vmem:[#allocation1 + $0x7] ss:$9 sm:$0xff] %v2440_v2 }
 0x416   : > { %1656 = vst.msk [vmem:[#allocation2 + $0x1b0] sm:$0xff] %vm252_vm0, %v1591_v46  ;;  %v566_v46 = vld [vmem:[%s4084_s10 + $0x7c8] sm:$0xff] }
 0x419   : > { %v1092_v58 = vpop.f32.mrf.mxu1 }
 0x41a   : > { %v1987_v9 = vpop.xlane.xlu1 %1986 }
 0x41b   : > { %v2441_v50 = vperm.slane %v1987_v9, 0  ;;  %v2442_v32 = vperm.slane %v1987_v9, 1  ;;  %v2444_v6 = vperm.slane %v1987_v9, 3  ;;  %v2445_v36 = vperm.slane %v1987_v9, 4 }
 0x41c   : > { %v5158_v40 = vld [vmem:[#allocation1] sm:$0xff]  ;;  %v2446_v17 = vperm.slane %v1987_v9, 5  ;;  %v2447_v56 = vperm.slane %v1987_v9, 6  ;;  %v2448_v54 = vperm.slane %v1987_v9, 7 }
 0x41d   : > { %3000 = vst [vmem:[#allocation1] ss:$9 sm:$0xff] %v2441_v50  ;;  %v1723_v35 = vld [vmem:[#allocation2 + $0x1b0] sm:$0xff] }
 0x41e   : > { %3001 = vst [vmem:[#allocation1 + $0x1] ss:$9 sm:$0xff] %v2442_v32  ;;  %v1787_v49 = vmax.f32 %v1723_v35, 0.0 }
 0x41f   : > { %3003 = vst [vmem:[#allocation1 + $0x3] ss:$9 sm:$0xff] %v2444_v6  ;;  %v1301_v6 = vpop.f32.mrf.mxu2 }
 0x420   : > { %3004 = vst [vmem:[#allocation1 + $0x4] ss:$9 sm:$0xff] %v2445_v36  ;;  %v568_v36 = vld [vmem:[%s4084_s10 + $0x7d8] sm:$0xff] }
 0x421   : > { %3005 = vst [vmem:[#allocation1 + $0x5] ss:$9 sm:$0xff] %v2446_v17  ;;  %v565_v17 = vld [vmem:[%s4084_s10 + $0x7c0] sm:$0xff]  ;;  %1530 = vmatmul.f32.gmra.mxu3 %v568_v36  ;;  %v1718_v36 = vld [vmem:[#allocation2 + $0x188] sm:$0xff] }
 0x422   : > { %3006 = vst [vmem:[#allocation1 + $0x6] ss:$9 sm:$0xff] %v2447_v56  ;;  %v692_v56 = vld [vmem:[#allocation2 + $0x1b8] sm:$0xff] }
 0x423   : > { %3310 = vperm.xlu2 %3799, %v5021_v3   ;;  %3007 = vst [vmem:[#allocation1 + $0x7] ss:$9 sm:$0xff] %v2448_v54  ;;  %v1855_v3 = vmul.f32 %v5023_v15, %v1787_v49  ;;  %v1510_v54 = vpop.f32.mrf.mxu3 }
 0x424   : > { %3325 = vperm.xlu0 %3800, %v5109_v7   ;;  %v2443_v7 = vperm.slane %v1987_v9, 2  ;;  %v562_v9 = vld [vmem:[%s4084_s10 + $0x7a8] sm:$0xff] }
 0x425   : > { %v2027_v11 = vsel %vm252_vm0, %v1855_v3, 0.0  ;;  %1109 = vmatmul.f32.gmra.mxu1 %v562_v9  ;;  %v883_v18 = vpop.f32.mrf.mxu0  ;;  %v2457_v3 = vperm.slane %v5155_v22, 0 }
 0x426   : > { %3002 = vst [vmem:[#allocation1 + $0x2] ss:$9 sm:$0xff] %v2443_v7  ;;  %v1093_v7 = vadd.f32 %v1092_v58, %v883_v18  ;;  %v2462_v18 = vperm.slane %v5155_v22, 5  ;;  %v2463_v58 = vperm.slane %v5155_v22, 6 }
 0x428   : > { %v1302_v8 = vadd.f32 %v1301_v6, %v1093_v7 }
 0x429   : > { %1533 = vmatmul.f32.gmra.mxu3 %v572_v5 }
 0x42d   : > { %2004 = vadd.xlane.f32.xlu1 %v2003_v33  ;;  %v5175_v10 = vld [vmem:[#allocation1] sm:$0xff]  ;;  %v567_v33 = vld [vmem:[%s4084_s10 + $0x7d0] sm:$0xff]  ;;  %1112 = vmatmul.f32.gmra.mxu1 %v566_v46  ;;  %v886_v35 = vpop.f32.mrf.mxu0 }
 0x42e   : > { %1321 = vmatmul.f32.gmra.mxu2 %v567_v33  ;;  %v1095_v49 = vpop.f32.mrf.mxu1 }
 0x430   : > { %v1304_v9 = vpop.f32.mrf.mxu2 }
 0x432   : > { %v3296_v16 = vpop.permute.xlu1 %3295 }
 0x433   : > { %v3490_v59 = vperm.slane %v3296_v16, %v4840_v34  ;;  %v1511_v16 = vadd.f32 %v1510_v54, %v1302_v8 }
 0x435   : > { %v3491_v2 = vsel %vm3449_vm10, %v3490_v59, %v5133_v24  ;;  %v561_v24 = vld [vmem:[%s4084_s10 + $0x7a0] sm:$0xff] }
 0x436   : > { %v3493_v26 = vsel %vm3453_vm11, %v3492_v57, %v3491_v2  ;;  %900 = vmatmul.f32.gmra.mxu0 %v561_v24  ;;  %v1592_v57 = vadd.f32 %v1511_v16, %v692_v56  ;;  %1324 = vmatmul.f32.gmra.mxu2 %v571_v55 }
 0x438   : > { %1657 = vst.msk [vmem:[#allocation2 + $0x1b8] sm:$0xff] %vm252_vm0, %v1592_v57  ;;  %v889_v7 = vpop.f32.mrf.mxu0  ;;  %v1307_v8 = vpop.f32.mrf.mxu2 }
 0x439   : > { %v5205_v57 = vpop.xlane.xlu0 %2001 }
 0x43d   : > { %v1990_v1 = vpop.xlane.xlu2 %1989 }
 0x43e   : > { %v2449_v14 = vperm.slane %v1990_v1, 0  ;;  %v2450_v63 = vperm.slane %v1990_v1, 1  ;;  %v2451_v62 = vperm.slane %v1990_v1, 2  ;;  %v2452_v43 = vperm.slane %v1990_v1, 3  ;;  %903 = vmatmul.f32.gmra.mxu0 %v565_v17 }
 0x43f   : > { %v2453_v52 = vperm.slane %v1990_v1, 4  ;;  %v2454_v50 = vperm.slane %v1990_v1, 5  ;;  %v2455_v31 = vperm.slane %v1990_v1, 6  ;;  %v2456_v30 = vperm.slane %v1990_v1, 7 }
 0x440   : > { %3009 = vst [vmem:[#allocation1] ss:$9 sm:$0xff] %v2449_v14  ;;  %v2458_v1 = vperm.slane %v5155_v22, 1  ;;  %v2459_v14 = vperm.slane %v5155_v22, 2  ;;  %v1782_v17 = vmax.f32 %v1718_v36, 0.0 }
 0x441   : > { %3010 = vst [vmem:[#allocation1 + $0x1] ss:$9 sm:$0xff] %v2450_v63  ;;  %v570_v63 = vld [vmem:[%s4084_s10 + $0x7e8] sm:$0xff] }
 0x442   : > { %3011 = vst [vmem:[#allocation1 + $0x2] ss:$9 sm:$0xff] %v2451_v62  ;;  %v2460_v62 = vperm.slane %v5155_v22, 3  ;;  %1115 = vmatmul.f32.gmra.mxu1 %v570_v63  ;;  %v1850_v16 = vmul.f32 %v5023_v15, %v1782_v17 }
 0x443   : > { %3012 = vst [vmem:[#allocation1 + $0x3] ss:$9 sm:$0xff] %v2452_v43  ;;  %v2461_v43 = vperm.slane %v5155_v22, 4 }
 0x444   : > { %3013 = vst [vmem:[#allocation1 + $0x4] ss:$9 sm:$0xff] %v2453_v52  ;;  %v1513_v52 = vpop.f32.mrf.mxu3 }
 0x445   : > { %3014 = vst [vmem:[#allocation1 + $0x5] ss:$9 sm:$0xff] %v2454_v50  ;;  %v3302_v37 = vpop.permute.xlu2 %3301  ;;  %v693_v50 = vld [vmem:[#allocation2 + $0x1c0] sm:$0xff] }
 0x446   : > { %3313 = vperm.xlu1 %3798, %v5041_v51   ;;  %v1716_v51 = vld [vmem:[#allocation2 + $0x178] sm:$0xff]  ;;  %3015 = vst [vmem:[#allocation1 + $0x6] ss:$9 sm:$0xff] %v2455_v31  ;;  %v3494_v20 = vperm.slane %v3302_v37, %v4879_v48  ;;  %v2464_v31 = vperm.slane %v5155_v22, 7  ;;  %v694_v22 = vld [vmem:[#allocation2 + $0x1c8] sm:$0xff] }
 0x447   : > { %v1780_v32 = vmax.f32 %v1716_v51, 0.0  ;;  %3016 = vst [vmem:[#allocation1 + $0x7] ss:$9 sm:$0xff] %v2456_v30  ;;  %v1098_v30 = vpop.f32.mrf.mxu1 }
 0x448   : > { %v5184_v59 = vsel %vm3457_vm12, %v3494_v20, %v3493_v26  ;;  %v569_v26 = vld [vmem:[%s4084_s10 + $0x7e0] sm:$0xff]  ;;  %v1099_v6 = vadd.f32 %v1098_v30, %v889_v7  ;;  %v1719_v7 = vld [vmem:[#allocation2 + $0x190] sm:$0xff]  ;;  %s3714_s10 = sshll.u32 %s4080_s9, 2 }
 0x449   : > { %v1848_v19 = vmul.f32 %v5023_v15, %v1780_v32  ;;  %906 = vmatmul.f32.gmra.mxu0 %v569_v26  ;;  %v3308_v15 = vpop.permute.xlu0 %3307  ;;  %s238_s15 = scalar_lea.vmem [#allocation8], %s3714_s10 }
 0x44a   : > { %v1308_v37 = vadd.f32 %v1307_v8, %v1099_v6  ;;  %v3498_v63 = vperm.slane %v3308_v15, %v4945_v0  ;;  %s3592_s11 = sshll.u32 %s238_s15, 4  ;;  %s3593_s11 = int_to_ptr.vmem [resolvable:$true] %s3592_s11 }
 0x44b   : > { %v2006_v2 = vsel %vm252_vm0, %v1848_v19, 0.0 }
 0x44c   : > { %2007 = vadd.xlane.f32.xlu2 %v2006_v2  ;;  %v1516_v19 = vpop.f32.mrf.mxu3 }
 0x44d   : > { %v1517_v54 = vadd.f32 %v1516_v19, %v1308_v37 }
 0x44e   : > { %2028 = vadd.xlane.f32.xlu0 %v2027_v11  ;;  %v1096_v11 = vadd.f32 %v1095_v49, %v886_v35  ;;  %v5196_v24 = vld [vmem:[#allocation1] sm:$0xff] }
 0x44f   : > { %3018 = vst [vmem:[#allocation1] ss:$9 sm:$0xff] %v2457_v3 }
 0x450   : > { %v1305_v51 = vadd.f32 %v1304_v9, %v1096_v11  ;;  %3019 = vst [vmem:[#allocation1 + $0x1] ss:$9 sm:$0xff] %v2458_v1  ;;  %v2012_v1 = vsel %vm252_vm0, %v1850_v16, 0.0 }
 0x451   : > { %3020 = vst [vmem:[#allocation1 + $0x2] ss:$9 sm:$0xff] %v2459_v14 }
 0x452   : > { %3021 = vst [vmem:[#allocation1 + $0x3] ss:$9 sm:$0xff] %v2460_v62  ;;  %v1514_v32 = vadd.f32 %v1513_v52, %v1305_v51  ;;  %v5217_v52 = vld [vmem:[#allocation6] ss:$0 sm:$0xff] }
 0x453   : > { %3022 = vst [vmem:[#allocation1 + $0x4] ss:$9 sm:$0xff] %v2461_v43 }
 0x454   : > { %3023 = vst [vmem:[#allocation1 + $0x5] ss:$9 sm:$0xff] %v2462_v18  ;;  %v1593_v33 = vadd.f32 %v1514_v32, %v693_v50  ;;  %v1519_v8 = vpop.f32.mrf.mxu3 }
 0x455   : > { %3024 = vst [vmem:[#allocation1 + $0x6] ss:$9 sm:$0xff] %v2463_v58 }
 0x456   : > { %3025 = vst [vmem:[#allocation1 + $0x7] ss:$9 sm:$0xff] %v2464_v31 }
 0x457   : > { %1658 = vst.msk [vmem:[#allocation2 + $0x1c0] sm:$0xff] %vm252_vm0, %v1593_v33 }
 0x45d   : > { %v1996_v56 = vpop.xlane.xlu1 %1995  ;;  %v5207_v35 = vld [vmem:[#allocation1] sm:$0xff] }
 0x45e   : > { %v2465_v46 = vperm.slane %v1996_v56, 0  ;;  %v2466_v20 = vperm.slane %v1996_v56, 1  ;;  %v2467_v2 = vperm.slane %v1996_v56, 2  ;;  %v2468_v49 = vperm.slane %v1996_v56, 3 }
 0x45f   : > { %v2469_v3 = vperm.slane %v1996_v56, 4  ;;  %v2470_v11 = vperm.slane %v1996_v56, 5  ;;  %v2471_v55 = vperm.slane %v1996_v56, 6  ;;  %v2472_v5 = vperm.slane %v1996_v56, 7 }
 0x460   : > { %3027 = vst [vmem:[#allocation1] ss:$9 sm:$0xff] %v2465_v46  ;;  %v695_v46 = vld [vmem:[#allocation2 + $0x1d0] sm:$0xff] }
 0x461   : > { %3028 = vst [vmem:[#allocation1 + $0x1] ss:$9 sm:$0xff] %v2466_v20 }
 0x462   : > { %3334 = vperm.xlu0 %3800, %v5158_v40   ;;  %v1594_v40 = vadd.f32 %v1517_v54, %v694_v22  ;;  %3029 = vst [vmem:[#allocation1 + $0x2] ss:$9 sm:$0xff] %v2467_v2  ;;  %v1783_v22 = vmax.f32 %v1719_v7, 0.0 }
 0x463   : > { %3030 = vst [vmem:[#allocation1 + $0x3] ss:$9 sm:$0xff] %v2468_v49 }
 0x464   : > { %1659 = vst.msk [vmem:[#allocation2 + $0x1c8] sm:$0xff] %vm252_vm0, %v1594_v40  ;;  %3319 = vperm.xlu2 %3799, %v5074_v29   ;;  %v1851_v40 = vmul.f32 %v5217_v52, %v1783_v22 }
 0x465   : > { %3031 = vst [vmem:[#allocation1 + $0x4] ss:$9 sm:$0xff] %v2469_v3 }
 0x466   : > { %3032 = vst [vmem:[#allocation1 + $0x5] ss:$9 sm:$0xff] %v2470_v11  ;;  %v1310_v36 = vpop.f32.mrf.mxu2  ;;  %v2015_v15 = vsel %vm252_vm0, %v1851_v40, 0.0 }
 0x467   : > { %3033 = vst [vmem:[#allocation1 + $0x6] ss:$9 sm:$0xff] %v2471_v55 }
 0x468   : > { %3034 = vst [vmem:[#allocation1 + $0x7] ss:$9 sm:$0xff] %v2472_v5 }
 0x46b   : > { %v1726_v43 = vld [vmem:[#allocation2 + $0x1c8] sm:$0xff] }
 0x46c   : > { %v1790_v51 = vmax.f32 %v1726_v43, 0.0 }
 0x46e   : > { %v1858_v18 = vmul.f32 %v5217_v52, %v1790_v51  ;;  %v1313_v3 = vpop.f32.mrf.mxu2  ;;  %v2482_v51 = vperm.slane %v5205_v57, 1 }
 0x46f   : > { %v5222_v6 = vld [vmem:[#allocation1] sm:$0xff] }
 0x470   : > { %2013 = vadd.xlane.f32.xlu1 %v2012_v1  ;;  %v2036_v29 = vsel %vm252_vm0, %v1858_v18, 0.0  ;;  %v892_v30 = vpop.f32.mrf.mxu0  ;;  %v2484_v18 = vperm.slane %v5205_v57, 3 }
 0x475   : > { %v3305_v14 = vpop.permute.xlu1 %3304 }
 0x476   : > { %v3496_v26 = vperm.slane %v3305_v14, %v4908_v38 }
 0x478   : > { %v3497_v62 = vsel %vm3461_vm13, %v3496_v26, %v5184_v59  ;;  %v1101_v59 = vpop.f32.mrf.mxu1  ;;  %v895_v1 = vpop.f32.mrf.mxu0 }
 0x479   : > { %v3499_v9 = vsel %vm5431_vm14, %v3498_v63, %v3497_v62  ;;  %v1102_v37 = vadd.f32 %v1101_v59, %v892_v30  ;;  %vm3567_vm14 = vcmask 1040384   ;;  %v1522_v26 = vpop.f32.mrf.mxu3  ;;  %v2481_v63 = vperm.slane %v5205_v57, 0 }
 0x47a   : > { %v2487_v30 = vperm.slane %v5205_v57, 6 }
 0x47b   : > { %v1311_v56 = vadd.f32 %v1310_v36, %v1102_v37  ;;  %v2488_v36 = vperm.slane %v5205_v57, 7 }
 0x47d   : > { %v1520_v20 = vadd.f32 %v1519_v8, %v1311_v56 }
 0x47e   : > { %v1999_v58 = vpop.xlane.xlu2 %1998 }
 0x47f   : > { %v2473_v50 = vperm.slane %v1999_v58, 0  ;;  %v2474_v31 = vperm.slane %v1999_v58, 1  ;;  %v2475_v32 = vperm.slane %v1999_v58, 2  ;;  %v2476_v33 = vperm.slane %v1999_v58, 3 }
 0x480   : > { %v2477_v17 = vperm.slane %v1999_v58, 4  ;;  %v2478_v19 = vperm.slane %v1999_v58, 5  ;;  %v2480_v54 = vperm.slane %v1999_v58, 7  ;;  %v1595_v49 = vadd.f32 %v1520_v20, %v695_v46  ;;  %v1104_v55 = vpop.f32.mrf.mxu1 }
 0x481   : > { %3036 = vst [vmem:[#allocation1] ss:$9 sm:$0xff] %v2473_v50  ;;  %v1105_v14 = vadd.f32 %v1104_v55, %v895_v1 }
 0x482   : > { %3037 = vst [vmem:[#allocation1 + $0x1] ss:$9 sm:$0xff] %v2474_v31  ;;  %v2486_v31 = vperm.slane %v5205_v57, 5 }
 0x483   : > { %3038 = vst [vmem:[#allocation1 + $0x2] ss:$9 sm:$0xff] %v2475_v32  ;;  %v1314_v43 = vadd.f32 %v1313_v3, %v1105_v14 }
 0x484   : > { %3039 = vst [vmem:[#allocation1 + $0x3] ss:$9 sm:$0xff] %v2476_v33  ;;  %v1316_v33 = vpop.f32.mrf.mxu2 }
 0x485   : > { %3040 = vst [vmem:[#allocation1 + $0x4] ss:$9 sm:$0xff] %v2477_v17  ;;  %v1523_v50 = vadd.f32 %v1522_v26, %v1314_v43 }
 0x486   : > { %3041 = vst [vmem:[#allocation1 + $0x5] ss:$9 sm:$0xff] %v2478_v19  ;;  %v3311_v16 = vpop.permute.xlu2 %3310  ;;  %v697_v19 = vld [vmem:[#allocation2 + $0x1e0] sm:$0xff] }
 0x487   : > { %v3500_v2 = vperm.slane %v3311_v16, %v4949_v60  ;;  %3043 = vst [vmem:[#allocation1 + $0x7] ss:$9 sm:$0xff] %v2480_v54  ;;  %v5245_v16 = vpop.xlane.xlu0 %2010 }
 0x488   : > { %1660 = vst.msk [vmem:[#allocation2 + $0x1d0] sm:$0xff] %vm252_vm0, %v1595_v49  ;;  %v1107_v7 = vpop.f32.mrf.mxu1 }
 0x489   : > { %3322 = vperm.xlu1 %3798, %v5091_v25   ;;  %v2479_v25 = vperm.slane %v1999_v58, 6  ;;  %v3501_v11 = vsel %vm3469_vm15, %v3500_v2, %v3499_v9  ;;  %v2483_v9 = vperm.slane %v5205_v57, 2  ;;  %v2485_v58 = vperm.slane %v5205_v57, 4 }
 0x48a   : > { %v3564_v5 = vrot.slane %v3501_v11, 7 }
 0x48b   : > { %3042 = vst [vmem:[#allocation1 + $0x6] ss:$9 sm:$0xff] %v2479_v25  ;;  %v1525_v17 = vpop.f32.mrf.mxu3 }
 0x48c   : > { %2037 = vadd.xlane.f32.xlu0 %v2036_v29  ;;  %v5231_v62 = vsel %vm3567_vm14, %v4969_v12, %v3564_v5  ;;  %v696_v12 = vld [vmem:[#allocation2 + $0x1d8] sm:$0xff] }
 0x48d   : > { %2016 = vadd.xlane.f32.xlu2 %v2015_v15  ;;  %v1596_v8 = vadd.f32 %v1523_v50, %v696_v12 }
 0x48e   : > { %v898_v32 = vpop.f32.mrf.mxu0 }
 0x48f   : > { %v1108_v59 = vadd.f32 %v1107_v7, %v898_v32  ;;  %1661 = vst.msk [vmem:[#allocation2 + $0x1d8] sm:$0xff] %vm252_vm0, %v1596_v8  ;;  %v3317_v15 = vpop.permute.xlu0 %3316  ;;  %v1722_v7 = vld [vmem:[#allocation2 + $0x1a8] sm:$0xff] }
 0x490   : > { %v3503_v26 = vperm.slane %v3317_v15, %v4644_v23 }
 0x491   : > { %v1317_v37 = vadd.f32 %v1316_v33, %v1108_v59 }
 0x492   : > { %v5236_v29 = vld [vmem:[#allocation1] sm:$0xff] }
 0x493   : > { %3045 = vst [vmem:[#allocation1] ss:$9 sm:$0xff] %v2481_v63  ;;  %v1526_v22 = vadd.f32 %v1525_v17, %v1317_v37  ;;  %v1528_v8 = vpop.f32.mrf.mxu3 }
 0x494   : > { %3046 = vst [vmem:[#allocation1 + $0x1] ss:$9 sm:$0xff] %v2482_v51 }
 0x495   : > { %3047 = vst [vmem:[#allocation1 + $0x2] ss:$9 sm:$0xff] %v2483_v9  ;;  %v1597_v25 = vadd.f32 %v1526_v22, %v697_v19 }
 0x496   : > { %3048 = vst [vmem:[#allocation1 + $0x3] ss:$9 sm:$0xff] %v2484_v18 }
 0x497   : > { %3049 = vst [vmem:[#allocation1 + $0x4] ss:$9 sm:$0xff] %v2485_v58 }
 0x498   : > { %3050 = vst [vmem:[#allocation1 + $0x5] ss:$9 sm:$0xff] %v2486_v31 }
 0x499   : > { %3051 = vst [vmem:[#allocation1 + $0x6] ss:$9 sm:$0xff] %v2487_v30 }
 0x49a   : > { %3052 = vst [vmem:[#allocation1 + $0x7] ss:$9 sm:$0xff] %v2488_v36  ;;  %v1319_v36 = vpop.f32.mrf.mxu2 }
 0x49b   : > { %1662 = vst.msk [vmem:[#allocation2 + $0x1e0] sm:$0xff] %vm252_vm0, %v1597_v25 }
 0x4a0   : > { %3343 = vperm.xlu0 %3800, %v5207_v35   ;;  %v1721_v35 = vld [vmem:[#allocation2 + $0x1a0] sm:$0xff]  ;;  %v2005_v56 = vpop.xlane.xlu1 %2004 }
 0x4a1   : > { %v1785_v54 = vmax.f32 %v1721_v35, 0.0  ;;  %v2489_v46 = vperm.slane %v2005_v56, 0  ;;  %v2490_v57 = vperm.slane %v2005_v56, 1  ;;  %v2491_v20 = vperm.slane %v2005_v56, 2  ;;  %v5247_v40 = vld [vmem:[#allocation1] sm:$0xff] }
 0x4a2   : > { %v2492_v2 = vperm.slane %v2005_v56, 3  ;;  %v2493_v3 = vperm.slane %v2005_v56, 4  ;;  %v2494_v11 = vperm.slane %v2005_v56, 5  ;;  %v2495_v1 = vperm.slane %v2005_v56, 6  ;;  %v1729_v51 = vld [vmem:[#allocation2 + $0x1e0] sm:$0xff]  ;;  %v1110_v30 = vpop.f32.mrf.mxu1 }
 0x4a3   : > { %v1853_v49 = vmul.f32 %v5217_v52, %v1785_v54  ;;  %3054 = vst [vmem:[#allocation1] ss:$9 sm:$0xff] %v2489_v46  ;;  %v2496_v55 = vperm.slane %v2005_v56, 7  ;;  %v1793_v9 = vmax.f32 %v1729_v51, 0.0  ;;  %v1786_v35 = vmax.f32 %v1722_v7, 0.0  ;;  %v698_v56 = vld [vmem:[#allocation2 + $0x1e8] sm:$0xff] }
 0x4a4   : > { %3055 = vst [vmem:[#allocation1 + $0x1] ss:$9 sm:$0xff] %v2490_v57  ;;  %v2507_v51 = vperm.slane %v5245_v16, 2  ;;  %v699_v7 = vld [vmem:[#allocation2 + $0x1f0] sm:$0xff] }
 0x4a5   : > { %3056 = vst [vmem:[#allocation1 + $0x2] ss:$9 sm:$0xff] %v2491_v20  ;;  %v2021_v5 = vsel %vm252_vm0, %v1853_v49, 0.0  ;;  %3328 = vperm.xlu2 %3799, %v5125_v4   ;;  %v1861_v18 = vmul.f32 %v5217_v52, %v1793_v9  ;;  %v1854_v57 = vmul.f32 %v5217_v52, %v1786_v35  ;;  %v1724_v35 = vld [vmem:[#allocation2 + $0x1b8] sm:$0xff] }
 0x4a6   : > { %3057 = vst [vmem:[#allocation1 + $0x3] ss:$9 sm:$0xff] %v2492_v2 }
 0x4a7   : > { %3058 = vst [vmem:[#allocation1 + $0x4] ss:$9 sm:$0xff] %v2493_v3  ;;  %v2045_v58 = vsel %vm252_vm0, %v1861_v18, 0.0  ;;  %v2024_v15 = vsel %vm252_vm0, %v1854_v57, 0.0  ;;  %v2508_v18 = vperm.slane %v5245_v16, 3 }
 0x4a8   : > { %3059 = vst [vmem:[#allocation1 + $0x5] ss:$9 sm:$0xff] %v2494_v11 }
 0x4a9   : > { %3060 = vst [vmem:[#allocation1 + $0x6] ss:$9 sm:$0xff] %v2495_v1 }
 0x4aa   : > { %3061 = vst [vmem:[#allocation1 + $0x7] ss:$9 sm:$0xff] %v2496_v55  ;;  %v1113_v3 = vpop.f32.mrf.mxu1  ;;  %v1531_v55 = vpop.f32.mrf.mxu3 }
 0x4b1   : > { %v5258_v59 = vld [vmem:[#allocation1] sm:$0xff]  ;;  %v1322_v1 = vpop.f32.mrf.mxu2 }
 0x4b3   : > { %2022 = vadd.xlane.f32.xlu1 %v2021_v5  ;;  %v901_v4 = vpop.f32.mrf.mxu0 }
 0x4b4   : > { %v1111_v37 = vadd.f32 %v1110_v30, %v901_v4  ;;  %v1534_v30 = vpop.f32.mrf.mxu3 }
 0x4b8   : > { %v3314_v14 = vpop.permute.xlu1 %3313 }
 0x4b9   : > { %v3502_v63 = vperm.slane %v3314_v14, %v4640_v21  ;;  %v2505_v14 = vperm.slane %v5245_v16, 0 }
 0x4bb   : > { %v3504_v43 = vsel %vm3413_vm1, %v3503_v26, %v3502_v63  ;;  %v904_v20 = vpop.f32.mrf.mxu0  ;;  %v2506_v63 = vperm.slane %v5245_v16, 1 }
 0x4bc   : > { %v1114_v11 = vadd.f32 %v1113_v3, %v904_v20 }
 0x4be   : > { %v1323_v26 = vadd.f32 %v1322_v1, %v1114_v11  ;;  %v5281_v11 = vpop.xlane.xlu0 %2019 }
 0x4bf   : > { %v2008_v50 = vpop.xlane.xlu2 %2007 }
 0x4c0   : > { %v2497_v31 = vperm.slane %v2008_v50, 0  ;;  %v2498_v12 = vperm.slane %v2008_v50, 1  ;;  %v2499_v32 = vperm.slane %v2008_v50, 2  ;;  %v2500_v33 = vperm.slane %v2008_v50, 3 }
 0x4c1   : > { %v2501_v17 = vperm.slane %v2008_v50, 4  ;;  %v2502_v19 = vperm.slane %v2008_v50, 5  ;;  %v2503_v22 = vperm.slane %v2008_v50, 6  ;;  %v2504_v25 = vperm.slane %v2008_v50, 7 }
 0x4c2   : > { %3063 = vst [vmem:[#allocation1] ss:$9 sm:$0xff] %v2497_v31  ;;  %v2509_v50 = vperm.slane %v5245_v16, 4  ;;  %v1532_v4 = vadd.f32 %v1531_v55, %v1323_v26 }
 0x4c3   : > { %3064 = vst [vmem:[#allocation1 + $0x1] ss:$9 sm:$0xff] %v2498_v12  ;;  %v1325_v12 = vpop.f32.mrf.mxu2 }
 0x4c4   : > { %3065 = vst [vmem:[#allocation1 + $0x2] ss:$9 sm:$0xff] %v2499_v32  ;;  %v2510_v32 = vperm.slane %v5245_v16, 5 }
 0x4c5   : > { %3066 = vst [vmem:[#allocation1 + $0x3] ss:$9 sm:$0xff] %v2500_v33  ;;  %v2511_v33 = vperm.slane %v5245_v16, 6 }
 0x4c6   : > { %3067 = vst [vmem:[#allocation1 + $0x4] ss:$9 sm:$0xff] %v2501_v17  ;;  %v907_v9 = vpop.f32.mrf.mxu0  ;;  %v1599_v17 = vadd.f32 %v1532_v4, %v699_v7 }
 0x4c7   : > { %3068 = vst [vmem:[#allocation1 + $0x5] ss:$9 sm:$0xff] %v2502_v19  ;;  %v3320_v46 = vpop.permute.xlu2 %3319 }
 0x4c8   : > { %3069 = vst [vmem:[#allocation1 + $0x6] ss:$9 sm:$0xff] %v2503_v22  ;;  %v3505_v2 = vperm.slane %v3320_v46, %v4673_v28 }
 0x4c9   : > { %3070 = vst [vmem:[#allocation1 + $0x7] ss:$9 sm:$0xff] %v2504_v25 }
 0x4ca   : > { %2046 = vadd.xlane.f32.xlu0 %v2045_v58  ;;  %v5263_v5 = vsel %vm3417_vm2, %v3505_v2, %v3504_v43  ;;  %v1116_v43 = vpop.f32.mrf.mxu1  ;;  %1664 = vst.msk [vmem:[#allocation2 + $0x1f0] sm:$0xff] %vm252_vm0, %v1599_v17 }
 0x4cb   : > { %v1117_v31 = vadd.f32 %v1116_v43, %v907_v9 }
 0x4cc   : > { %3331 = vperm.xlu1 %3798, %v5144_v45   ;;  %v1320_v45 = vadd.f32 %v1319_v36, %v1111_v37  ;;  %v2512_v36 = vperm.slane %v5245_v16, 7 }
 0x4ce   : > { %v1529_v54 = vadd.f32 %v1528_v8, %v1320_v45  ;;  %2025 = vadd.xlane.f32.xlu2 %v2024_v15  ;;  %v700_v8 = vld [vmem:[#allocation2 + $0x1f8] sm:$0xff] }
 0x4d0   : > { %v1598_v49 = vadd.f32 %v1529_v54, %v698_v56  ;;  %v5272_v58 = vld [vmem:[#allocation1] sm:$0xff]  ;;  %v1788_v56 = vmax.f32 %v1724_v35, 0.0 }
 0x4d1   : > { %3072 = vst [vmem:[#allocation1] ss:$9 sm:$0xff] %v2505_v14  ;;  %v3326_v14 = vpop.permute.xlu0 %3325 }
 0x4d2   : > { %1663 = vst.msk [vmem:[#allocation2 + $0x1e8] sm:$0xff] %vm252_vm0, %v1598_v49  ;;  %v1856_v2 = vmul.f32 %v5217_v52, %v1788_v56  ;;  %v3509_v9 = vperm.slane %v3326_v14, %v4731_v61  ;;  %v2532_v56 = vperm.slane %v5281_v11, 3 }
 0x4d3   : > { %3073 = vst [vmem:[#allocation1 + $0x1] ss:$9 sm:$0xff] %v2506_v63 }
 0x4d4   : > { %3074 = vst [vmem:[#allocation1 + $0x2] ss:$9 sm:$0xff] %v2507_v51  ;;  %v2030_v1 = vsel %vm252_vm0, %v1856_v2, 0.0 }
 0x4d5   : > { %3075 = vst [vmem:[#allocation1 + $0x3] ss:$9 sm:$0xff] %v2508_v18 }
 0x4d6   : > { %3076 = vst [vmem:[#allocation1 + $0x4] ss:$9 sm:$0xff] %v2509_v50 }
 0x4d7   : > { %3077 = vst [vmem:[#allocation1 + $0x5] ss:$9 sm:$0xff] %v2510_v32  ;;  %v1725_v32 = vld [vmem:[#allocation2 + $0x1c0] sm:$0xff] }
 0x4d8   : > { %3078 = vst [vmem:[#allocation1 + $0x6] ss:$9 sm:$0xff] %v2511_v33 }
 0x4d9   : > { %3079 = vst [vmem:[#allocation1 + $0x7] ss:$9 sm:$0xff] %v2512_v36 }
 0x4de   : > { %3352 = vperm.xlu0 %3800, %v5247_v40   ;;  %v1326_v40 = vadd.f32 %v1325_v12, %v1117_v31 }
 0x4e0   : > { %v1535_v37 = vadd.f32 %v1534_v30, %v1326_v40  ;;  %v3080_v16 = vld [vmem:[#allocation1] sm:$0xff]  ;;  %v1789_v40 = vmax.f32 %v1725_v32, 0.0 }
 0x4e2   : > { %v1600_v19 = vadd.f32 %v1535_v37, %v700_v8  ;;  %v1857_v37 = vmul.f32 %v5217_v52, %v1789_v40 }
 0x4e3   : > { %v2014_v22 = vpop.xlane.xlu1 %2013 }
 0x4e4   : > { %1665 = vst.msk [vmem:[#allocation2 + $0x1f8] sm:$0xff] %vm252_vm0, %v1600_v19  ;;  %v2513_v45 = vperm.slane %v2014_v22, 0  ;;  %v2514_v25 = vperm.slane %v2014_v22, 1  ;;  %v2515_v54 = vperm.slane %v2014_v22, 2  ;;  %v2516_v46 = vperm.slane %v2014_v22, 3 }
 0x4e5   : > { %v2517_v57 = vperm.slane %v2014_v22, 4  ;;  %v2518_v20 = vperm.slane %v2014_v22, 5  ;;  %v2519_v49 = vperm.slane %v2014_v22, 6  ;;  %v2520_v3 = vperm.slane %v2014_v22, 7 }
 0x4e6   : > { %3081 = vst [vmem:[#allocation1] ss:$9 sm:$0xff] %v2513_v45  ;;  %3337 = vperm.xlu2 %3799, %v5175_v10   ;;  %v2033_v35 = vsel %vm252_vm0, %v1857_v37, 0.0  ;;  %v2529_v22 = vperm.slane %v5281_v11, 0  ;;  %v2530_v45 = vperm.slane %v5281_v11, 1 }
 0x4e7   : > { %3082 = vst [vmem:[#allocation1 + $0x1] ss:$9 sm:$0xff] %v2514_v25  ;;  %v2531_v25 = vperm.slane %v5281_v11, 2 }
 0x4e8   : > { %3083 = vst [vmem:[#allocation1 + $0x2] ss:$9 sm:$0xff] %v2515_v54 }
 0x4e9   : > { %3084 = vst [vmem:[#allocation1 + $0x3] ss:$9 sm:$0xff] %v2516_v46  ;;  %v2533_v46 = vperm.slane %v5281_v11, 4 }
 0x4ea   : > { %3085 = vst [vmem:[#allocation1 + $0x4] ss:$9 sm:$0xff] %v2517_v57  ;;  %v2534_v57 = vperm.slane %v5281_v11, 5 }
 0x4eb   : > { %3086 = vst [vmem:[#allocation1 + $0x5] ss:$9 sm:$0xff] %v2518_v20  ;;  %v1732_v55 = vld [vmem:[#allocation2 + $0x1f8] sm:$0xff]  ;;  %v2535_v20 = vperm.slane %v5281_v11, 6 }
 0x4ec   : > { %3087 = vst [vmem:[#allocation1 + $0x6] ss:$9 sm:$0xff] %v2519_v49  ;;  %v1796_v63 = vmax.f32 %v1732_v55, 0.0 }
 0x4ed   : > { %3088 = vst [vmem:[#allocation1 + $0x7] ss:$9 sm:$0xff] %v2520_v3  ;;  %v1727_v3 = vld [vmem:[#allocation2 + $0x1d0] sm:$0xff] }
 0x4ee   : > { %v1864_v18 = vmul.f32 %v5217_v52, %v1796_v63 }
 0x4f0   : > { %v2054_v50 = vsel %vm252_vm0, %v1864_v18, 0.0 }
 0x4f4   : > { %v5293_v7 = vld [vmem:[#allocation1] sm:$0xff] }
 0x4f6   : > { %2031 = vadd.xlane.f32.xlu1 %v2030_v1 }
 0x4fb   : > { %v3323_v15 = vpop.permute.xlu1 %3322 }
 0x4fc   : > { %v3507_v26 = vperm.slane %v3323_v15, %v4726_v53 }
 0x4fe   : > { %v3508_v51 = vsel %vm3421_vm3, %v3507_v26, %v5263_v5  ;;  %v1791_v26 = vmax.f32 %v1727_v3, 0.0 }
 0x4ff   : > { %v3510_v43 = vsel %vm3425_vm4, %v3509_v9, %v3508_v51 }
 0x500   : > { %v2017_v10 = vpop.xlane.xlu2 %2016  ;;  %v1859_v18 = vmul.f32 %v5217_v52, %v1791_v26 }
 0x501   : > { %v2521_v4 = vperm.slane %v2017_v10, 0  ;;  %v2522_v31 = vperm.slane %v2017_v10, 1  ;;  %v2523_v12 = vperm.slane %v2017_v10, 2  ;;  %v2524_v30 = vperm.slane %v2017_v10, 3 }
 0x502   : > { %v2525_v5 = vperm.slane %v2017_v10, 4  ;;  %v2526_v33 = vperm.slane %v2017_v10, 5  ;;  %v2527_v36 = vperm.slane %v2017_v10, 6  ;;  %v2528_v8 = vperm.slane %v2017_v10, 7 }
 0x503   : > { %3090 = vst [vmem:[#allocation1] ss:$9 sm:$0xff] %v2521_v4 }
 0x504   : > { %3091 = vst [vmem:[#allocation1 + $0x1] ss:$9 sm:$0xff] %v2522_v31 }
 0x505   : > { %3092 = vst [vmem:[#allocation1 + $0x2] ss:$9 sm:$0xff] %v2523_v12 }
 0x506   : > { %3093 = vst [vmem:[#allocation1 + $0x3] ss:$9 sm:$0xff] %v2524_v30 }
 0x507   : > { %3094 = vst [vmem:[#allocation1 + $0x4] ss:$9 sm:$0xff] %v2525_v5 }
 0x508   : > { %2055 = vadd.xlane.f32.xlu0 %v2054_v50  ;;  %3095 = vst [vmem:[#allocation1 + $0x5] ss:$9 sm:$0xff] %v2526_v33  ;;  %v3329_v17 = vpop.permute.xlu2 %3328  ;;  %v2039_v50 = vsel %vm252_vm0, %v1859_v18, 0.0 }
 0x509   : > { %3096 = vst [vmem:[#allocation1 + $0x6] ss:$9 sm:$0xff] %v2527_v36 }
 0x50a   : > { %3097 = vst [vmem:[#allocation1 + $0x7] ss:$9 sm:$0xff] %v2528_v8 }
 0x50f   : > { %3340 = vperm.xlu1 %3798, %v5196_v24   ;;  %v3511_v24 = vperm.slane %v3329_v17, %v4775_v27  ;;  %2034 = vadd.xlane.f32.xlu2 %v2033_v35 }
 0x511   : > { %v3512_v19 = vsel %vm3429_vm5, %v3511_v24, %v3510_v43  ;;  %v5303_v54 = vld [vmem:[#allocation1] sm:$0xff]  ;;  %v2029_v43 = vpop.xlane.xlu0 %2028 }
 0x512   : > { %3099 = vst [vmem:[#allocation1] ss:$9 sm:$0xff] %v2529_v22  ;;  %v2557_v3 = vperm.slane %v2029_v43, 4 }
 0x513   : > { %3100 = vst [vmem:[#allocation1 + $0x1] ss:$9 sm:$0xff] %v2530_v45 }
 0x514   : > { %3101 = vst [vmem:[#allocation1 + $0x2] ss:$9 sm:$0xff] %v2531_v25 }
 0x515   : > { %3102 = vst [vmem:[#allocation1 + $0x3] ss:$9 sm:$0xff] %v2532_v56 }
 0x516   : > { %3103 = vst [vmem:[#allocation1 + $0x4] ss:$9 sm:$0xff] %v2533_v46 }
 0x517   : > { %3104 = vst [vmem:[#allocation1 + $0x5] ss:$9 sm:$0xff] %v2534_v57  ;;  %v2553_v57 = vperm.slane %v2029_v43, 0 }
 0x518   : > { %3105 = vst [vmem:[#allocation1 + $0x6] ss:$9 sm:$0xff] %v2535_v20  ;;  %v2554_v20 = vperm.slane %v2029_v43, 1 }
 0x519   : > { %v3335_v10 = vpop.permute.xlu0 %3334 }
 0x51a   : > { %v3515_v12 = vperm.slane %v3335_v10, %v4787_v42 }
 0x51c   : > { %3361 = vperm.xlu0 %3800, %v3080_v16   ;;  %v2536_v16 = vperm.slane %v5281_v11, 7 }
 0x51e   : > { %3106 = vst [vmem:[#allocation1 + $0x7] ss:$9 sm:$0xff] %v2536_v16  ;;  %v2555_v16 = vperm.slane %v2029_v43, 2 }
 0x525   : > { %v3107_v15 = vld [vmem:[#allocation1] sm:$0xff] }
 0x526   : > { %v2023_v2 = vpop.xlane.xlu1 %2022  ;;  %3370 = vperm.xlu0 %3800, %v3107_v15   ;;  %v2560_v15 = vperm.slane %v2029_v43, 7 }
 0x527   : > { %v2537_v49 = vperm.slane %v2023_v2, 0  ;;  %v2538_v1 = vperm.slane %v2023_v2, 1  ;;  %v2539_v55 = vperm.slane %v2023_v2, 2  ;;  %v2540_v14 = vperm.slane %v2023_v2, 3  ;;  %3346 = vperm.xlu2 %3799, %v5222_v6   ;;  %v1728_v6 = vld [vmem:[#allocation2 + $0x1d8] sm:$0xff] }
 0x528   : > { %v2541_v63 = vperm.slane %v2023_v2, 4  ;;  %v2542_v51 = vperm.slane %v2023_v2, 5  ;;  %v2543_v9 = vperm.slane %v2023_v2, 6  ;;  %v2544_v11 = vperm.slane %v2023_v2, 7 }
 0x529   : > { %3108 = vst [vmem:[#allocation1] ss:$9 sm:$0xff] %v2537_v49  ;;  %v1792_v35 = vmax.f32 %v1728_v6, 0.0  ;;  %v2556_v2 = vperm.slane %v2029_v43, 3 }
 0x52a   : > { %3109 = vst [vmem:[#allocation1 + $0x1] ss:$9 sm:$0xff] %v2538_v1  ;;  %v2558_v1 = vperm.slane %v2029_v43, 5 }
 0x52b   : > { %3110 = vst [vmem:[#allocation1 + $0x2] ss:$9 sm:$0xff] %v2539_v55  ;;  %v1860_v25 = vmul.f32 %v5217_v52, %v1792_v35  ;;  %v2559_v55 = vperm.slane %v2029_v43, 6 }
 0x52c   : > { %3111 = vst [vmem:[#allocation1 + $0x3] ss:$9 sm:$0xff] %v2540_v14 }
 0x52d   : > { %3112 = vst [vmem:[#allocation1 + $0x4] ss:$9 sm:$0xff] %v2541_v63 }
 0x52e   : > { %3113 = vst [vmem:[#allocation1 + $0x5] ss:$9 sm:$0xff] %v2542_v51 }
 0x52f   : > { %3114 = vst [vmem:[#allocation1 + $0x6] ss:$9 sm:$0xff] %v2543_v9  ;;  %v1730_v9 = vld [vmem:[#allocation2 + $0x1e8] sm:$0xff] }
 0x530   : > { %3115 = vst [vmem:[#allocation1 + $0x7] ss:$9 sm:$0xff] %v2544_v11 }
 0x537   : > { %v5316_v8 = vld [vmem:[#allocation1] sm:$0xff] }
 0x539   : > { %2040 = vadd.xlane.f32.xlu1 %v2039_v50 }
 0x53e   : > { %v3332_v4 = vpop.permute.xlu1 %3331 }
 0x53f   : > { %v3513_v31 = vperm.slane %v3332_v4, %v4778_v13  ;;  %v1794_v4 = vmax.f32 %v1730_v9, 0.0 }
 0x541   : > { %v3514_v32 = vsel %vm3433_vm6, %v3513_v31, %v3512_v19  ;;  %v2026_v5 = vpop.xlane.xlu2 %2025 }
 0x542   : > { %v3516_v30 = vsel %vm3437_vm7, %v3515_v12, %v3514_v32  ;;  %v2545_v33 = vperm.slane %v2026_v5, 0  ;;  %v2546_v40 = vperm.slane %v2026_v5, 1  ;;  %v2547_v36 = vperm.slane %v2026_v5, 2  ;;  %v2038_v32 = vpop.xlane.xlu0 %2037 }
 0x543   : > { %v2548_v17 = vperm.slane %v2026_v5, 3  ;;  %v2549_v37 = vperm.slane %v2026_v5, 4  ;;  %v2550_v24 = vperm.slane %v2026_v5, 5  ;;  %v2551_v22 = vperm.slane %v2026_v5, 6 }
 0x544   : > { %3117 = vst [vmem:[#allocation1] ss:$9 sm:$0xff] %v2545_v33  ;;  %v2552_v19 = vperm.slane %v2026_v5, 7  ;;  %v1862_v12 = vmul.f32 %v5217_v52, %v1794_v4  ;;  %v2584_v9 = vperm.slane %v2038_v32, 7 }
 0x545   : > { %3118 = vst [vmem:[#allocation1 + $0x1] ss:$9 sm:$0xff] %v2546_v40 }
 0x546   : > { %3119 = vst [vmem:[#allocation1 + $0x2] ss:$9 sm:$0xff] %v2547_v36 }
 0x547   : > { %3120 = vst [vmem:[#allocation1 + $0x3] ss:$9 sm:$0xff] %v2548_v17 }
 0x548   : > { %3121 = vst [vmem:[#allocation1 + $0x4] ss:$9 sm:$0xff] %v2549_v37 }
 0x549   : > { %3122 = vst [vmem:[#allocation1 + $0x5] ss:$9 sm:$0xff] %v2550_v24  ;;  %v3338_v45 = vpop.permute.xlu2 %3337 }
 0x54a   : > { %3123 = vst [vmem:[#allocation1 + $0x6] ss:$9 sm:$0xff] %v2551_v22  ;;  %v3517_v56 = vperm.slane %v3338_v45, %v4820_v44  ;;  %v3344_v5 = vpop.permute.xlu0 %3343 }
 0x54b   : > { %3124 = vst [vmem:[#allocation1 + $0x7] ss:$9 sm:$0xff] %v2552_v19  ;;  %v3521_v36 = vperm.slane %v3344_v5, %v4840_v34 }
 0x54c   : > { %v3518_v46 = vsel %vm3441_vm8, %v3517_v56, %v3516_v30  ;;  %v2048_v30 = vsel %vm252_vm0, %v1862_v12, 0.0 }
 0x552   : > { %3349 = vperm.xlu1 %3798, %v5236_v29   ;;  %v2042_v29 = vsel %vm252_vm0, %v1860_v25, 0.0  ;;  %v5323_v49 = vld [vmem:[#allocation1] sm:$0xff] }
 0x553   : > { %2043 = vadd.xlane.f32.xlu2 %v2042_v29  ;;  %3126 = vst [vmem:[#allocation1] ss:$9 sm:$0xff] %v2553_v57 }
 0x554   : > { %3127 = vst [vmem:[#allocation1 + $0x1] ss:$9 sm:$0xff] %v2554_v20 }
 0x555   : > { %3128 = vst [vmem:[#allocation1 + $0x2] ss:$9 sm:$0xff] %v2555_v16 }
 0x556   : > { %3129 = vst [vmem:[#allocation1 + $0x3] ss:$9 sm:$0xff] %v2556_v2 }
 0x557   : > { %3130 = vst [vmem:[#allocation1 + $0x4] ss:$9 sm:$0xff] %v2557_v3 }
 0x558   : > { %3131 = vst [vmem:[#allocation1 + $0x5] ss:$9 sm:$0xff] %v2558_v1 }
 0x559   : > { %3132 = vst [vmem:[#allocation1 + $0x6] ss:$9 sm:$0xff] %v2559_v55  ;;  %v2577_v55 = vperm.slane %v2038_v32, 0 }
 0x55a   : > { %3133 = vst [vmem:[#allocation1 + $0x7] ss:$9 sm:$0xff] %v2560_v15  ;;  %v2579_v15 = vperm.slane %v2038_v32, 2 }
 0x561   : > { %v3134_v11 = vld [vmem:[#allocation1] sm:$0xff] }
 0x562   : > { %3379 = vperm.xlu0 %3800, %v3134_v11  }
 0x569   : > { %v2032_v14 = vpop.xlane.xlu1 %2031 }
 0x56a   : > { %v2561_v26 = vperm.slane %v2032_v14, 0  ;;  %v2562_v63 = vperm.slane %v2032_v14, 1  ;;  %v2563_v51 = vperm.slane %v2032_v14, 2  ;;  %v2564_v18 = vperm.slane %v2032_v14, 3 }
 0x56b   : > { %v2565_v50 = vperm.slane %v2032_v14, 4  ;;  %v2566_v10 = vperm.slane %v2032_v14, 5  ;;  %v2567_v31 = vperm.slane %v2032_v14, 6  ;;  %v2568_v43 = vperm.slane %v2032_v14, 7  ;;  %3355 = vperm.xlu2 %3799, %v5258_v59   ;;  %v1731_v59 = vld [vmem:[#allocation2 + $0x1f0] sm:$0xff] }
 0x56c   : > { %3135 = vst [vmem:[#allocation1] ss:$9 sm:$0xff] %v2561_v26  ;;  %v1795_v29 = vmax.f32 %v1731_v59, 0.0  ;;  %v2580_v14 = vperm.slane %v2038_v32, 3 }
 0x56d   : > { %3136 = vst [vmem:[#allocation1 + $0x1] ss:$9 sm:$0xff] %v2562_v63  ;;  %v2581_v63 = vperm.slane %v2038_v32, 4 }
 0x56e   : > { %3137 = vst [vmem:[#allocation1 + $0x2] ss:$9 sm:$0xff] %v2563_v51  ;;  %v1863_v16 = vmul.f32 %v5217_v52, %v1795_v29  ;;  %v2582_v52 = vperm.slane %v2038_v32, 5  ;;  %v2583_v51 = vperm.slane %v2038_v32, 6 }
 0x56f   : > { %3138 = vst [vmem:[#allocation1 + $0x3] ss:$9 sm:$0xff] %v2564_v18 }
 0x570   : > { %3139 = vst [vmem:[#allocation1 + $0x4] ss:$9 sm:$0xff] %v2565_v50  ;;  %v2051_v1 = vsel %vm252_vm0, %v1863_v16, 0.0  ;;  %vm5441_vm0 = vcmask 982912  }
 0x571   : > { %3140 = vst [vmem:[#allocation1 + $0x5] ss:$9 sm:$0xff] %v2566_v10 }
 0x572   : > { %3141 = vst [vmem:[#allocation1 + $0x6] ss:$9 sm:$0xff] %v2567_v31 }
 0x573   : > { %3142 = vst [vmem:[#allocation1 + $0x7] ss:$9 sm:$0xff] %v2568_v43 }
 0x57a   : > { %v5332_v45 = vld [vmem:[#allocation1] sm:$0xff] }
 0x57c   : > { %2049 = vadd.xlane.f32.xlu1 %v2048_v30 }
 0x581   : > { %v3341_v33 = vpop.permute.xlu1 %3340 }
 0x582   : > { %v3519_v40 = vperm.slane %v3341_v33, %v4824_v47  ;;  %v2035_v37 = vpop.xlane.xlu2 %2034 }
 0x583   : > { %v2569_v24 = vperm.slane %v2035_v37, 0  ;;  %v2570_v35 = vperm.slane %v2035_v37, 1  ;;  %v2571_v22 = vperm.slane %v2035_v37, 2  ;;  %v2572_v19 = vperm.slane %v2035_v37, 3 }
 0x584   : > { %v3520_v6 = vsel %vm3445_vm9, %v3519_v40, %v3518_v46  ;;  %v2573_v25 = vperm.slane %v2035_v37, 4  ;;  %v2574_v56 = vperm.slane %v2035_v37, 5  ;;  %v2575_v57 = vperm.slane %v2035_v37, 6 }
 0x585   : > { %v3522_v17 = vsel %vm3449_vm10, %v3521_v36, %v3520_v6  ;;  %3144 = vst [vmem:[#allocation1] ss:$9 sm:$0xff] %v2569_v24  ;;  %v2576_v46 = vperm.slane %v2035_v37, 7 }
 0x586   : > { %3145 = vst [vmem:[#allocation1 + $0x1] ss:$9 sm:$0xff] %v2570_v35 }
 0x587   : > { %3146 = vst [vmem:[#allocation1 + $0x2] ss:$9 sm:$0xff] %v2571_v22 }
 0x588   : > { %3147 = vst [vmem:[#allocation1 + $0x3] ss:$9 sm:$0xff] %v2572_v19 }
 0x589   : > { %3148 = vst [vmem:[#allocation1 + $0x4] ss:$9 sm:$0xff] %v2573_v25 }
 0x58a   : > { %v3347_v20 = vpop.permute.xlu2 %3346  ;;  %3149 = vst [vmem:[#allocation1 + $0x5] ss:$9 sm:$0xff] %v2574_v56 }
 0x58b   : > { %v3523_v2 = vperm.slane %v3347_v20, %v4876_v39  ;;  %3150 = vst [vmem:[#allocation1 + $0x6] ss:$9 sm:$0xff] %v2575_v57 }
 0x58c   : > { %3151 = vst [vmem:[#allocation1 + $0x7] ss:$9 sm:$0xff] %v2576_v46 }
 0x58d   : > { %v3524_v3 = vsel %vm3453_vm11, %v3523_v2, %v3522_v17 }
 0x593   : > { %v3152_v26 = vld [vmem:[#allocation1] sm:$0xff] }
 0x594   : > { %2052 = vadd.xlane.f32.xlu2 %v2051_v1  ;;  %3153 = vst [vmem:[#allocation1] ss:$9 sm:$0xff] %v2577_v55 }
 0x595   : > { %3358 = vperm.xlu1 %3798, %v5272_v58   ;;  %v2578_v58 = vperm.slane %v2038_v32, 1  ;;  %3155 = vst [vmem:[#allocation1 + $0x2] ss:$9 sm:$0xff] %v2579_v15 }
 0x596   : > { %3156 = vst [vmem:[#allocation1 + $0x3] ss:$9 sm:$0xff] %v2580_v14 }
 0x597   : > { %3154 = vst [vmem:[#allocation1 + $0x1] ss:$9 sm:$0xff] %v2578_v58 }
 0x598   : > { %3157 = vst [vmem:[#allocation1 + $0x4] ss:$9 sm:$0xff] %v2581_v63 }
 0x599   : > { %3158 = vst [vmem:[#allocation1 + $0x5] ss:$9 sm:$0xff] %v2582_v52 }
 0x59a   : > { %3159 = vst [vmem:[#allocation1 + $0x6] ss:$9 sm:$0xff] %v2583_v51 }
 0x59b   : > { %3160 = vst [vmem:[#allocation1 + $0x7] ss:$9 sm:$0xff] %v2584_v9 }
 0x59d   : > { %3367 = vperm.xlu1 %3798, %v5303_v54  }
 0x5a2   : > { %v3161_v10 = vld [vmem:[#allocation1] sm:$0xff] }
 0x5a3   : > { %3388 = vperm.xlu0 %3800, %v3161_v10  }
 0x5a5   : > { %3376 = vperm.xlu1 %3798, %v5323_v49   ;;  %v2047_v49 = vpop.xlane.xlu0 %2046 }
 0x5a6   : > { %v2601_v57 = vperm.slane %v2047_v49, 0  ;;  %v2602_v46 = vperm.slane %v2047_v49, 1  ;;  %v2603_v20 = vperm.slane %v2047_v49, 2  ;;  %v2604_v16 = vperm.slane %v2047_v49, 3 }
 0x5a7   : > { %v2606_v1 = vperm.slane %v2047_v49, 5  ;;  %v2607_v55 = vperm.slane %v2047_v49, 6  ;;  %v2608_v58 = vperm.slane %v2047_v49, 7 }
 0x5ac   : > { %v2041_v54 = vpop.xlane.xlu1 %2040  ;;  %3364 = vperm.xlu2 %3799, %v5293_v7  }
 0x5ad   : > { %3385 = vperm.xlu1 %3798, %v3152_v26   ;;  %v2585_v11 = vperm.slane %v2041_v54, 0  ;;  %v2586_v18 = vperm.slane %v2041_v54, 1  ;;  %v2587_v50 = vperm.slane %v2041_v54, 2  ;;  %v2588_v4 = vperm.slane %v2041_v54, 3  ;;  %v3353_v30 = vpop.permute.xlu0 %3352 }
 0x5ae   : > { %v2589_v31 = vperm.slane %v2041_v54, 4  ;;  %v2590_v43 = vperm.slane %v2041_v54, 5  ;;  %v2591_v12 = vperm.slane %v2041_v54, 6  ;;  %v2592_v32 = vperm.slane %v2041_v54, 7 }
 0x5af   : > { %3162 = vst [vmem:[#allocation1] ss:$9 sm:$0xff] %v2585_v11  ;;  %v3527_v40 = vperm.slane %v3353_v30, %v4908_v38 }
 0x5b0   : > { %3163 = vst [vmem:[#allocation1 + $0x1] ss:$9 sm:$0xff] %v2586_v18 }
 0x5b1   : > { %3164 = vst [vmem:[#allocation1 + $0x2] ss:$9 sm:$0xff] %v2587_v50 }
 0x5b2   : > { %3165 = vst [vmem:[#allocation1 + $0x3] ss:$9 sm:$0xff] %v2588_v4 }
 0x5b3   : > { %3166 = vst [vmem:[#allocation1 + $0x4] ss:$9 sm:$0xff] %v2589_v31 }
 0x5b4   : > { %3167 = vst [vmem:[#allocation1 + $0x5] ss:$9 sm:$0xff] %v2590_v43  ;;  %3373 = vperm.xlu2 %3799, %v5316_v8  }
 0x5b5   : > { %3168 = vst [vmem:[#allocation1 + $0x6] ss:$9 sm:$0xff] %v2591_v12 }
 0x5b6   : > { %3169 = vst [vmem:[#allocation1 + $0x7] ss:$9 sm:$0xff] %v2592_v32 }
 0x5bc   : > { %3382 = vperm.xlu2 %3799, %v5332_v45  }
 0x5bd   : > { %v3170_v17 = vld [vmem:[#allocation1] sm:$0xff] }
 0x5c4   : > { %v3350_v5 = vpop.permute.xlu1 %3349  ;;  %3391 = vperm.xlu2 %3799, %v3170_v17  }
 0x5c5   : > { %v3525_v33 = vperm.slane %v3350_v5, %v4879_v48 }
 0x5c6   : > { %v2044_v7 = vpop.xlane.xlu2 %2043 }
 0x5c7   : > { %v3526_v36 = vsel %vm3457_vm12, %v3525_v33, %v3524_v3  ;;  %v2593_v37 = vperm.slane %v2044_v7, 0  ;;  %v2594_v24 = vperm.slane %v2044_v7, 1  ;;  %v2595_v35 = vperm.slane %v2044_v7, 2  ;;  %v2056_v33 = vpop.xlane.xlu0 %2055 }
 0x5c8   : > { %v3528_v6 = vsel %vm3461_vm13, %v3527_v40, %v3526_v36  ;;  %v2596_v22 = vperm.slane %v2044_v7, 3  ;;  %v2597_v8 = vperm.slane %v2044_v7, 4  ;;  %v2598_v59 = vperm.slane %v2044_v7, 5 }
 0x5c9   : > { %3171 = vst [vmem:[#allocation1] ss:$9 sm:$0xff] %v2593_v37  ;;  %v2599_v19 = vperm.slane %v2044_v7, 6  ;;  %v2600_v25 = vperm.slane %v2044_v7, 7  ;;  %v2605_v3 = vperm.slane %v2047_v49, 4  ;;  %v2625_v40 = vperm.slane %v2056_v33, 0 }
 0x5ca   : > { %3172 = vst [vmem:[#allocation1 + $0x1] ss:$9 sm:$0xff] %v2594_v24  ;;  %v2626_v36 = vperm.slane %v2056_v33, 1  ;;  %v2628_v17 = vperm.slane %v2056_v33, 3  ;;  %v2629_v37 = vperm.slane %v2056_v33, 4  ;;  %v2630_v24 = vperm.slane %v2056_v33, 5 }
 0x5cb   : > { %3173 = vst [vmem:[#allocation1 + $0x2] ss:$9 sm:$0xff] %v2595_v35  ;;  %v2631_v35 = vperm.slane %v2056_v33, 6 }
 0x5cc   : > { %3174 = vst [vmem:[#allocation1 + $0x3] ss:$9 sm:$0xff] %v2596_v22  ;;  %v2632_v22 = vperm.slane %v2056_v33, 7 }
 0x5cd   : > { %3175 = vst [vmem:[#allocation1 + $0x4] ss:$9 sm:$0xff] %v2597_v8 }
 0x5ce   : > { %3176 = vst [vmem:[#allocation1 + $0x5] ss:$9 sm:$0xff] %v2598_v59  ;;  %v3356_v45 = vpop.permute.xlu2 %3355 }
 0x5cf   : > { %3177 = vst [vmem:[#allocation1 + $0x6] ss:$9 sm:$0xff] %v2599_v19  ;;  %v3529_v56 = vperm.slane %v3356_v45, %v4945_v0  ;;  %v3362_v19 = vpop.permute.xlu0 %3361 }
 0x5d0   : > { %3178 = vst [vmem:[#allocation1 + $0x7] ss:$9 sm:$0xff] %v2600_v25 }
 0x5d1   : > { %v5350_v29 = vsel %vm5441_vm0, %v3529_v56, %v3528_v6  ;;  %v2627_v6 = vperm.slane %v2056_v33, 2 }
 0x5d7   : > { %v3179_v2 = vld [vmem:[#allocation1] sm:$0xff]  ;;  %v3371_v56 = vpop.permute.xlu0 %3370 }
 0x5d8   : > { %3394 = vperm.xlu1 %3798, %v3179_v2   ;;  %3180 = vst [vmem:[#allocation1] ss:$9 sm:$0xff] %v2601_v57 }
 0x5d9   : > { %3181 = vst [vmem:[#allocation1 + $0x1] ss:$9 sm:$0xff] %v2602_v46 }
 0x5da   : > { %3182 = vst [vmem:[#allocation1 + $0x2] ss:$9 sm:$0xff] %v2603_v20 }
 0x5db   : > { %3183 = vst [vmem:[#allocation1 + $0x3] ss:$9 sm:$0xff] %v2604_v16  ;;  %v3533_v16 = vperm.slane %v3362_v19, %v4640_v21 }
 0x5dc   : > { %3184 = vst [vmem:[#allocation1 + $0x4] ss:$9 sm:$0xff] %v2605_v3 }
 0x5dd   : > { %3185 = vst [vmem:[#allocation1 + $0x5] ss:$9 sm:$0xff] %v2606_v1 }
 0x5de   : > { %3186 = vst [vmem:[#allocation1 + $0x6] ss:$9 sm:$0xff] %v2607_v55 }
 0x5df   : > { %3187 = vst [vmem:[#allocation1 + $0x7] ss:$9 sm:$0xff] %v2608_v58  ;;  %v3380_v2 = vpop.permute.xlu0 %3379 }
 0x5e6   : > { %v3188_v52 = vld [vmem:[#allocation1] sm:$0xff] }
 0x5e7   : > { %3397 = vperm.xlu0 %3800, %v3188_v52  }
 0x5ef   : > { %v2050_v15 = vpop.xlane.xlu1 %2049 }
 0x5f0   : > { %v2609_v14 = vperm.slane %v2050_v15, 0  ;;  %v2610_v26 = vperm.slane %v2050_v15, 1  ;;  %v2611_v63 = vperm.slane %v2050_v15, 2  ;;  %v2612_v51 = vperm.slane %v2050_v15, 3 }
 0x5f1   : > { %v2613_v9 = vperm.slane %v2050_v15, 4  ;;  %v2614_v54 = vperm.slane %v2050_v15, 5  ;;  %v2615_v11 = vperm.slane %v2050_v15, 6  ;;  %v2616_v18 = vperm.slane %v2050_v15, 7 }
 0x5f2   : > { %3189 = vst [vmem:[#allocation1] ss:$9 sm:$0xff] %v2609_v14  ;;  %v3538_v14 = vperm.slane %v3371_v56, %v4726_v53 }
 0x5f3   : > { %3190 = vst [vmem:[#allocation1 + $0x1] ss:$9 sm:$0xff] %v2610_v26 }
 0x5f4   : > { %3191 = vst [vmem:[#allocation1 + $0x2] ss:$9 sm:$0xff] %v2611_v63 }
 0x5f5   : > { %3192 = vst [vmem:[#allocation1 + $0x3] ss:$9 sm:$0xff] %v2612_v51 }
 0x5f6   : > { %3193 = vst [vmem:[#allocation1 + $0x4] ss:$9 sm:$0xff] %v2613_v9 }
 0x5f7   : > { %3194 = vst [vmem:[#allocation1 + $0x5] ss:$9 sm:$0xff] %v2614_v54 }
 0x5f8   : > { %3195 = vst [vmem:[#allocation1 + $0x6] ss:$9 sm:$0xff] %v2615_v11 }
 0x5f9   : > { %3196 = vst [vmem:[#allocation1 + $0x7] ss:$9 sm:$0xff] %v2616_v18 }
 0x600   : > { %v3197_v50 = vld [vmem:[#allocation1] sm:$0xff] }
 0x601   : > { %3400 = vperm.xlu2 %3799, %v3197_v50  }
 0x607   : > { %v2053_v10 = vpop.xlane.xlu2 %2052  ;;  %v3359_v59 = vpop.permute.xlu1 %3358 }
 0x608   : > { %v2617_v4 = vperm.slane %v2053_v10, 0  ;;  %v2618_v31 = vperm.slane %v2053_v10, 1  ;;  %v2619_v43 = vperm.slane %v2053_v10, 2  ;;  %v2620_v12 = vperm.slane %v2053_v10, 3 }
 0x609   : > { %v2621_v32 = vperm.slane %v2053_v10, 4  ;;  %v2622_v49 = vperm.slane %v2053_v10, 5  ;;  %v2623_v30 = vperm.slane %v2053_v10, 6  ;;  %v2624_v5 = vperm.slane %v2053_v10, 7 }
 0x60a   : > { %3198 = vst [vmem:[#allocation1] ss:$9 sm:$0xff] %v2617_v4 }
 0x60b   : > { %3199 = vst [vmem:[#allocation1 + $0x1] ss:$9 sm:$0xff] %v2618_v31 }
 0x60c   : > { %3200 = vst [vmem:[#allocation1 + $0x2] ss:$9 sm:$0xff] %v2619_v43 }
 0x60d   : > { %3201 = vst [vmem:[#allocation1 + $0x3] ss:$9 sm:$0xff] %v2620_v12 }
 0x60e   : > { %3202 = vst [vmem:[#allocation1 + $0x4] ss:$9 sm:$0xff] %v2621_v32 }
 0x60f   : > { %3203 = vst [vmem:[#allocation1 + $0x5] ss:$9 sm:$0xff] %v2622_v49  ;;  %v3365_v25 = vpop.permute.xlu2 %3364  ;;  %v3368_v45 = vpop.permute.xlu1 %3367  ;;  %v3531_v49 = vperm.slane %v3359_v59, %v4949_v60 }
 0x610   : > { %3204 = vst [vmem:[#allocation1 + $0x6] ss:$9 sm:$0xff] %v2623_v30  ;;  %v3534_v20 = vperm.slane %v3365_v25, %v4644_v23  ;;  %v3536_v1 = vperm.slane %v3368_v45, %v4673_v28  ;;  %v3544_v28 = vperm.slane %v3380_v2, %v4778_v13 }
 0x611   : > { %3205 = vst [vmem:[#allocation1 + $0x7] ss:$9 sm:$0xff] %v2624_v5 }
 0x612   : > { %v3535_v3 = vsel %vm3413_vm1, %v3534_v20, %v3533_v16  ;;  %vm5442_vm1 = vmmov %vm5441_vm0 }
 0x613   : > { %v3537_v55 = vsel %vm3417_vm2, %v3536_v1, %v3535_v3  ;;  %vm3569_vm2 = vcmask 1042434  }
 0x614   : > { %v3539_v63 = vsel %vm3421_vm3, %v3538_v14, %v3537_v55  ;;  %vm3571_vm3 = vcmask 1041408  }
 0x615   : > { %v3389_v23 = vpop.permute.xlu0 %3388 }
 0x616   : > { %v3550_v4 = vperm.slane %v3389_v23, %v4824_v47 }
 0x617   : > { %v3374_v57 = vpop.permute.xlu2 %3373  ;;  %v3377_v46 = vpop.permute.xlu1 %3376 }
 0x618   : > { %v3206_v7 = vld [vmem:[#allocation1] sm:$0xff]  ;;  %v3540_v58 = vperm.slane %v3374_v57, %v4731_v61  ;;  %v3542_v21 = vperm.slane %v3377_v46, %v4775_v27 }
 0x619   : > { %3403 = vperm.xlu1 %3798, %v3206_v7   ;;  %3207 = vst [vmem:[#allocation1] ss:$9 sm:$0xff] %v2625_v40 }
 0x61a   : > { %3208 = vst [vmem:[#allocation1 + $0x1] ss:$9 sm:$0xff] %v2626_v36  ;;  %v3541_v52 = vsel %vm3425_vm4, %v3540_v58, %v3539_v63  ;;  %vm3576_vm4 = vcmp.lt.s32.totalorder %v3408_v41, 512 }
 0x61b   : > { %3209 = vst [vmem:[#allocation1 + $0x2] ss:$9 sm:$0xff] %v2627_v6  ;;  %v3543_v51 = vsel %vm3429_vm5, %v3542_v21, %v3541_v52 }
 0x61c   : > { %3210 = vst [vmem:[#allocation1 + $0x3] ss:$9 sm:$0xff] %v2628_v17  ;;  %v3545_v61 = vsel %vm3433_vm6, %v3544_v28, %v3543_v51 }
 0x61d   : > { %3211 = vst [vmem:[#allocation1 + $0x4] ss:$9 sm:$0xff] %v2629_v37 }
 0x61e   : > { %3212 = vst [vmem:[#allocation1 + $0x5] ss:$9 sm:$0xff] %v2630_v24 }
 0x61f   : > { %3213 = vst [vmem:[#allocation1 + $0x6] ss:$9 sm:$0xff] %v2631_v35  ;;  %v3383_v15 = vpop.permute.xlu2 %3382  ;;  %v3386_v26 = vpop.permute.xlu1 %3385 }
 0x620   : > { %3214 = vst [vmem:[#allocation1 + $0x7] ss:$9 sm:$0xff] %v2632_v22  ;;  %v3546_v9 = vperm.slane %v3383_v15, %v4787_v42  ;;  %v3548_v18 = vperm.slane %v3386_v26, %v4820_v44 }
 0x622   : > { %v3547_v53 = vsel %vm3437_vm7, %v3546_v9, %v3545_v61 }
 0x623   : > { %v3549_v10 = vsel %vm3441_vm8, %v3548_v18, %v3547_v53 }
 0x624   : > { %v3551_v31 = vsel %vm3445_vm9, %v3550_v4, %v3549_v10 }
 0x627   : > { %v3215_v8 = vld [vmem:[#allocation1] sm:$0xff]  ;;  %v3392_v11 = vpop.permute.xlu2 %3391 }
 0x628   : > { %3406 = vperm.xlu0 %3800, %v3215_v8   ;;  %v3552_v27 = vperm.slane %v3392_v11, %v4840_v34 }
 0x62a   : > { %v3553_v12 = vsel %vm3449_vm10, %v3552_v27, %v3551_v31 }
 0x64a   : > { %v3395_v54 = vpop.permute.xlu1 %3394 }
 0x64b   : > { %v3554_v42 = vperm.slane %v3395_v54, %v4876_v39 }
 0x64d   : > { %v3555_v44 = vsel %vm3453_vm11, %v3554_v42, %v3553_v12 }
 0x659   : > { %v3398_v50 = vpop.permute.xlu0 %3397 }
 0x65a   : > { %v3556_v13 = vperm.slane %v3398_v50, %v4879_v48  ;;  %v3532_v48 = vsel %vm3469_vm15, %v3531_v49, %v5350_v29 }
 0x65b   : > { %v3401_v32 = vpop.permute.xlu2 %3400 }
 0x65c   : > { %v3557_v34 = vsel %vm3457_vm12, %v3556_v13, %v3555_v44  ;;  %v3558_v39 = vperm.slane %v3401_v32, %v4908_v38  ;;  %v3565_v38 = vrot.slane %v3532_v48, 6 }
 0x65e   : > { %v3559_v5 = vsel %vm3461_vm13, %v3558_v39, %v3557_v34 }
 0x68b   : > { %v3404_v43 = vpop.permute.xlu1 %3403 }
 0x68c   : > { %v3560_v47 = vperm.slane %v3404_v43, %v4945_v0 }
 0x68e   : > { %v3561_v40 = vsel %vm5442_vm1, %v3560_v47, %v3559_v5 }
 0x69a   : > { %v3407_v30 = vpop.permute.xlu0 %3406 }
 0x69b   : > { %v3562_v33 = vperm.slane %v3407_v30, %v4949_v60 }
 0x69d   : > { %v3563_v0 = vsel %vm3469_vm15, %v3562_v33, %v3561_v40 }
 0x69e   : > { %v3566_v36 = vrot.slane %v3563_v0, 5 }
 0x6a0   : > { %v3570_v29 = vsel %vm3569_vm2, %v3565_v38, %v3566_v36 }
 0x6a1   : > { %v3572_v60 = vsel %vm3571_vm3, %v5231_v62, %v3570_v29 }
 0x6a2   : > { %3578 = vst.msk [vmem:[%s238_s15] sm:$0xf] %vm3576_vm4, %v3572_v60 }
 0x6a3   : > { %3893 = shalt.err (!%p3890_p1)
}
 0x6a4   : > { %3727 = dma.vmem_to_hbm [thread:$0]  (%p4031_p8), %s3593_s11, 64, %s3595_s18, %s3580_s23  }
 0x6a5 PF: > { %s3606_s9 = sand.u32 1, %s3932_s12   ;;  %p3738_p2 = pnand %p3706_p13, %p4035_p9 }
 0x6a6   : > { %s3607_s8 = scalar_lea.sflag [#allocation5], %s3606_s9 }
 0x6a7   : > { %p3739_p4 = pneg %p3738_p2 }
 0x6a9   : > { %3927 = dma.done.wait (%p3739_p4), %s3607_s8, 64  }
 0x6aa   : > { %3929 = vsyncadd (%p3739_p4), %s3607_s8, 4294967232  ;;  %s20_s17 = sadd.s32 1, %s3952_s17   ;;  %s5443_s12 = smov %s3936_s13 }
 0x6ab   : > { %p17_p6 = scmp.ge.s32.totalorder %s20_s17, 4   ;;  %s5444_s13 = smov %s3940_s14 }
 0x6ac   : > { %s5445_s14 = smov %s4073_s27  ;;  %s5446_s15 = smov %s3948_s16 }
 0x6ad   : > { %s5447_s16 = smov %s5449_s6  ;;  %19 = sbr.rel (!%p17_p6) target bundleno = 9 (0x9), region = 99 }
 0x6b2   :  { %3613 = vsyncpa [#allocation4], 1 }
 0x6b3   :  { %3615 = vsyncpa [#allocation4 + $0x1], 1 }
 0x6b4   :  { %3616 = vsyncpa [#allocation7], 1 }
 0x6b5   :  { %3617 = vsyncpa [#allocation5], 1 }
 0x6b6   :  { %3619 = vsyncpa [#allocation5 + $0x1], 1 }

</bundles_post_ra>
